<compile_context>
chip_gen: v7x
topology: tpu7x:2x2x1
jax: 0.10.0
libtpu: 0.0.40
codegen_flags: <defaults>
</compile_context>

<pallas_src>
import functools

import jax
import jax.numpy as jnp
from jax.experimental import pallas as pl
from jax.experimental.pallas import tpu as pltpu


# ---------------------------------------------------------------------------
# Kernel 1: fused 3x3-conv projections (in-kernel, chunked im2col) + both
# column-tiled attentions.  grid = (batch, key-block); outputs are accumulated
# in-place (resident blocks) across key blocks; softmax(dim=1) is per column so
# column tiling is exact.
# ---------------------------------------------------------------------------
def _rtb_attn_kernel(fl_ref, fv_ref, mask_ref,
                     wkvl_ref, bkvl_ref, wkvv_ref, bkvv_ref,
                     wqst_ref, bqs_ref, wqct_ref, bqc_ref,
                     gs_out, gc_out,
                     kvs, kvc, qs_t, qc_t,
                     *, c, w, ch, tb, n_sub, use_roll):
    hw = fl_ref.shape[-1]
    bf16 = jnp.bfloat16
    kb = pl.program_id(1)

    @pl.when(kb == 0)
    def _init():
        mask = mask_ref[...]                       # (9, hw) boundary masks (f32, 0/1)
        x_l = fl_ref[0]                            # (c, hw) f32
        x_v = fv_ref[0]
        wkvl = wkvl_ref[...]                       # (2c, 9c) bf16  rows [Ks; Vs]
        wkvv = wkvv_ref[...]                       # (2c, 9c) bf16  rows [Kc; Vc]
        wqst = wqst_ref[...]                       # (9c, c)  f32   Qs weight, transposed
        wqct = wqct_ref[...]                       # (9c, c)  f32   Qc weight, transposed
        bkvl = bkvl_ref[...]                       # (2c, 1) f32
        bkvv = bkvv_ref[...]
        bqs = bqs_ref[...]                         # (1, c) f32
        bqc = bqc_ref[...]

        def shifted(x, off):
            # result[:, p] = x[:, (p + off) % hw]; wrap-around is zeroed by the mask.
            if off == 0:
                return x
            if use_roll:
                return pltpu.roll(x, (-off) % hw, axis=1)   # XLU rotate, no copies
            o = off % hw
            return jnp.concatenate([x[:, o:], x[:, :o]], axis=1)

        def patches(x, j0):
            # (9c, ch) f32 patch chunk; rows ordered t*c + ci with t = ky*3 + kx.
            taps = []
            for ky in range(3):
                for kx in range(3):
                    off = (ky - 1) * w + (kx - 1)
                    t = ky * 3 + kx
                    sh = shifted(x, off)[:, j0:j0 + ch]
                    taps.append(sh * mask[t:t + 1, j0:j0 + ch])
            return jnp.concatenate(taps, axis=0)

        # Chunked im2col + projection GEMMs: bounds the (9c, ch) temporaries on v7x.
        for j0 in range(0, hw, ch):
            pat_l = patches(x_l, j0)               # (9c, ch) f32
            pat_v = patches(x_v, j0)
            pat_l_b = pat_l.astype(bf16)
            pat_v_b = pat_v.astype(bf16)
            # K/V projections: standard-orientation bf16 MXU matmuls, f32 accumulate.
            kvs[:, j0:j0 + ch] = (jnp.dot(wkvl, pat_l_b,
                                          preferred_element_type=jnp.float32)
                                  + bkvl).astype(bf16)
            kvc[:, j0:j0 + ch] = (jnp.dot(wkvv, pat_v_b,
                                          preferred_element_type=jnp.float32)
                                  + bkvv).astype(bf16)
            # Q projections produced directly transposed: q_t[p, o] = Q[o, p].
            qs_t[j0:j0 + ch, :] = (jax.lax.dot_general(
                pat_l, wqst, (((0,), (0,)), ((), ())),
                preferred_element_type=jnp.float32) + bqs).astype(bf16)
            qc_t[j0:j0 + ch, :] = (jax.lax.dot_general(
                pat_l, wqct, (((0,), (0,)), ((), ())),
                preferred_element_type=jnp.float32) + bqc).astype(bf16)

        gs_out[...] = jnp.zeros(gs_out.shape, dtype=gs_out.dtype)
        gc_out[...] = jnp.zeros(gc_out.shape, dtype=gc_out.dtype)

    # --------------------------- hot loop (per key block) ----------------------------
    tbs = tb // n_sub
    col0 = kb * tb
    qsv = qs_t[...]                                # (hw, c) bf16
    qcv = qc_t[...]

    def attend(q_t, kv_blk):
        k = kv_blk[0:c]                            # (c, tbs) bf16
        v = kv_blk[c:2 * c]
        # s[a_q, a_k] = sum_c Q[c, a_q] * K[c, a_k]  == torch multi[:, a_q, a_k]
        s = jnp.dot(q_t, k, preferred_element_type=jnp.float32)        # (hw, tbs) f32
        s = s - jnp.max(s, axis=0, keepdims=True)  # torch softmax(dim=1) -> axis 0 here
        e = jnp.exp(s)
        # Fold 1/colsum into V: (1, tbs) reciprocal + (c, tbs) mul, not an (hw, tbs) div.
        r = pl.reciprocal(jnp.sum(e, axis=0, keepdims=True), approx=False)
        v_sc = (v.astype(jnp.float32) * r).astype(bf16)                 # (c, tbs)
        # G[a_q, co] += sum_{a_k} e[a_q, a_k] * v_sc[co, a_k]
        return jax.lax.dot_general(e.astype(bf16), v_sc,
                                   (((1,), (1,)), ((), ())),
                                   preferred_element_type=jnp.float32)  # (hw, c)

    # Two independent sub-tiles per key block so exp (EUP) of one can overlap the
    # score / AV matmuls (MXU) of the other.
    parts_s, parts_c = [], []
    for sub in range(n_sub):
        start = col0 + sub * tbs
        if tbs % 128 == 0:
            start = pl.multiple_of(start, 128)
        cols = pl.ds(start, tbs)
        parts_s.append(attend(qsv, kvs[:, cols]))
        parts_c.append(attend(qcv, kvc[:, cols]))

    acc_s = parts_s[0]
    for p in parts_s[1:]:
        acc_s = acc_s + p
    acc_c = parts_c[0]
    for p in parts_c[1:]:
        acc_c = acc_c + p
    gs_out[...] = gs_out[...] + acc_s[None]
    gc_out[...] = gc_out[...] + acc_c[None]


# ---------------------------------------------------------------------------
# Kernel 2: Gs_conv (1x1) on both branches + residuals + fuse_conv (1x1),
# channel-major, tiled over hw (memory-bound).  NB: the PyTorch module applies
# Gs_conv (not Gc_conv) to the cross branch as well — reproduced faithfully.
# ---------------------------------------------------------------------------
def _rtb_fuse_kernel(gs_ref, gc_ref, fl_ref, fv_ref,
                     wg_ref, bg_ref, wfs_ref, wfc_ref, bf_ref, out_ref):
    wg = wg_ref[...]
    bg = bg_ref[...]
    gs = jnp.dot(wg, gs_ref[0], preferred_element_type=jnp.float32) + bg + fl_ref[0]
    gc = jnp.dot(wg, gc_ref[0], preferred_element_type=jnp.float32) + bg + fv_ref[0]
    out_ref[...] = (jnp.dot(wfs_ref[...], gs, preferred_element_type=jnp.float32)
                    + jnp.dot(wfc_ref[...], gc, preferred_element_type=jnp.float32)
                    + bf_ref[...])[None].astype(out_ref.dtype)


# ---------------------------------------------------------------------------
# Size / VMEM heuristics (generation-aware).
# ---------------------------------------------------------------------------
def _vmem_cap_bytes():
    cap = 64 << 20                    # conservative default (v7x per-TC)
    try:
        info = pltpu.get_tpu_info()
        v = int(getattr(info, "vmem_capacity_bytes", 0) or 0)
        if v > 0:
            cap = v
    except Exception:
        pass
    return max(cap - (16 << 20), 32 << 20)   # leave headroom for the compiler


def _pick_col_tile(hw, c, cap):
    """Key-block width: multiple of 128 dividing hw, sized from a VMEM budget."""
    if hw % 128 != 0 or hw <= 512:
        return hw
    fixed = (2 * 2 * c * hw * 4          # Fl/Fv input blocks (double-buffered)
             + 2 * 9 * hw * 4            # masks
             + 2 * 2 * hw * c * 4        # two resident (hw, c) outputs
             + 2 * 2 * c * hw * 2        # kvs / kvc bf16 scratch
             + 2 * hw * c * 2)           # qs_t / qc_t bf16 scratch
    budget = max(cap - fixed - (8 << 20), 4 << 20)
    per_col = 10 * hw + 16 * c           # score/exp temporaries + AV partials per column
    tb_cap = max(budget // per_col, 128)
    for cand in (4096, 2048, 1024, 512, 256, 128):
        if cand <= tb_cap and hw % cand == 0:
            return cand
    return 128


def _pick_im2col_chunk(hw):
    if hw <= 2048 or hw % 128 != 0:
        return hw
    for cand in (2048, 1024, 512, 256, 128):
        if hw % cand == 0:
            return cand
    return hw


def _attn_vmem_limit(c, hw, tb, ch, cap):
    f32, bf16 = 4, 2
    blocks = (2 * 2 * c * hw * f32
              + 2 * 9 * hw * f32
              + 2 * 2 * hw * c * f32
              + 2 * (2 * 2 * c * 9 * c * bf16 + 2 * 9 * c * c * f32)
              + 2 * 8 * c * f32)
    scratch = 2 * 2 * c * hw * bf16 + 2 * hw * c * bf16
    init_tmp = 2 * 9 * c * ch * (f32 + bf16) + 2 * c * hw * f32 + 6 * c * ch * f32
    loop_tmp = 2 * hw * tb * (2 * f32 + bf16) + 4 * hw * c * f32
    est = blocks + scratch + max(init_tmp, loop_tmp)
    return int(min(max(2 * est, 32 << 20), cap))


def _pick_fuse_tile(hw, c, cap):
    if hw % 128 != 0:
        return hw
    budget = min(cap // 2, 32 << 20)
    t_cap = max(budget // (12 * c * 4), 128)
    for cand in (8192, 4096, 2048, 1024, 512, 256, 128):
        if hw % cand == 0 and cand <= t_cap:
            return cand
    return 128


def _fuse_vmem_limit(c, thw, cap):
    est = 20 * c * thw * 4 + (4 * c * c + 4 * c) * 4
    return int(min(max(2 * est, 32 << 20), cap))


def _boundary_masks(h, w):
    """(9, hw) float mask: 1 where the 3x3 tap stays inside the image (zero padding)."""
    hw = h * w
    p = jnp.arange(hw, dtype=jnp.int32)
    y = p // w
    x = p % w
    rows = []
    for ky in range(3):
        for kx in range(3):
            yy = y + (ky - 1)
            xx = x + (kx - 1)
            rows.append(((yy >= 0) & (yy < h) & (xx >= 0) & (xx < w)).astype(jnp.float32))
    return jnp.stack(rows, axis=0)


# ---------------------------------------------------------------------------
# JAX glue
# ---------------------------------------------------------------------------
def rtb_forward(Fl, Fv, kp):
    b, c, h, w = Fl.shape
    hw = h * w
    f32 = jnp.float32
    bf16 = jnp.bfloat16

    fl_cm = Fl.reshape(b, c, hw)                 # channel-major, free reshape
    fv_cm = Fv.reshape(b, c, hw)
    mask9 = _boundary_masks(h, w)

    cap = _vmem_cap_bytes()
    tb = _pick_col_tile(hw, c, cap)
    nkb = hw // tb
    n_sub = 2 if (tb % 256 == 0) else 1
    ch = _pick_im2col_chunk(hw)
    use_roll = (hw % 128 == 0)

    def bspec2(shape):                            # per-batch blocks on a (b, key) grid
        nd = len(shape)
        return pl.BlockSpec((1,) + shape, lambda i, k: (i,) + (0,) * nd)

    def sspec2(shape):                            # shared (weights / masks)
        nd = len(shape)
        return pl.BlockSpec(shape, lambda i, k: (0,) * nd)

    attn = pl.pallas_call(
        functools.partial(_rtb_attn_kernel, c=c, w=w, ch=ch, tb=tb,
                          n_sub=n_sub, use_roll=use_roll),
        out_shape=(jax.ShapeDtypeStruct((b, hw, c), f32),
                   jax.ShapeDtypeStruct((b, hw, c), f32)),
        grid=(b, nkb),
        in_specs=[bspec2((c, hw)), bspec2((c, hw)), sspec2((9, hw)),
                  sspec2((2 * c, 9 * c)), sspec2((2 * c, 1)),
                  sspec2((2 * c, 9 * c)), sspec2((2 * c, 1)),
                  sspec2((9 * c, c)), sspec2((1, c)),
                  sspec2((9 * c, c)), sspec2((1, c))],
        out_specs=(bspec2((hw, c)), bspec2((hw, c))),
        scratch_shapes=[pltpu.VMEM((2 * c, hw), bf16),     # [Ks; Vs]
                        pltpu.VMEM((2 * c, hw), bf16),     # [Kc; Vc]
                        pltpu.VMEM((hw, c), bf16),         # Qs^T
                        pltpu.VMEM((hw, c), bf16)],        # Qc^T
        compiler_params=pltpu.CompilerParams(
            dimension_semantics=("parallel", "arbitrary"),
            vmem_limit_bytes=_attn_vmem_limit(c, hw, tb, ch, cap)),
    )
    gs_att, gc_att = attn(fl_cm, fv_cm, mask9,
                          kp['w_kv_l'], kp['b_kv_l'], kp['w_kv_v'], kp['b_kv_v'],
                          kp['w_qs_t'], kp['b_qs'], kp['w_qc_t'], kp['b_qc'])

    # PyTorch does a *raw* reshape (b, hw, c) -> (b, c, h, w); it is a flat,
    # order-preserving reshape, so (b, c, hw) channel-major is obtained directly.
    gs_cm = gs_att.reshape(b, c, hw)
    gc_cm = gc_att.reshape(b, c, hw)

    thw = _pick_fuse_tile(hw, c, cap)
    nhw = hw // thw

    def bspec1(shape):
        nd = len(shape)
        return pl.BlockSpec((1,) + shape[:-1] + (thw,),
                            lambda i, j: (i,) + (0,) * (nd - 1) + (j,))

    def sspec1(shape):
        nd = len(shape)
        return pl.BlockSpec(shape, lambda i, j: (0,) * nd)

    fuse = pl.pallas_call(
        _rtb_fuse_kernel,
        out_shape=jax.ShapeDtypeStruct((b, c, hw), f32),
        grid=(b, nhw),
        in_specs=[bspec1((c, hw)), bspec1((c, hw)),
                  bspec1((c, hw)), bspec1((c, hw)),
                  sspec1((c, c)), sspec1((c, 1)),
                  sspec1((c, c)), sspec1((c, c)), sspec1((c, 1))],
        out_specs=bspec1((c, hw)),
        compiler_params=pltpu.CompilerParams(
            dimension_semantics=("parallel", "parallel"),
            vmem_limit_bytes=_fuse_vmem_limit(c, thw, cap)),
    )
    out_cm = fuse(gs_cm, gc_cm, fl_cm, fv_cm,
                  kp['w_gs'], kp['b_gs'], kp['w_fuse_s'], kp['w_fuse_c'], kp['b_fuse'])
    return out_cm.reshape(b, c, h, w)            # already channel-major -> free reshape


# ---------------------------------------------------------------------------
# Deterministic parameter init (PyTorch Conv2d layouts) + conversion to kernel layout.
# Gc_conv exists in __init__ but is unused in forward(), so it is not materialized.
# ---------------------------------------------------------------------------
def init_torch_params(key, c):
    names3 = ['qs', 'ks', 'vs', 'qc', 'kc', 'vc']
    keys = jax.random.split(key, 2 * len(names3) + 4)
    tp, idx = {}, 0
    for n in names3:
        bound = 1.0 / ((c * 9) ** 0.5)
        tp['w_' + n] = jax.random.uniform(keys[idx], (c, c, 3, 3), jnp.float32, -bound, bound); idx += 1
        tp['b_' + n] = jax.random.uniform(keys[idx], (c,), jnp.float32, -bound, bound); idx += 1
    bound = 1.0 / (c ** 0.5)
    tp['w_gs'] = jax.random.uniform(keys[idx], (c, c, 1, 1), jnp.float32, -bound, bound); idx += 1
    tp['b_gs'] = jax.random.uniform(keys[idx], (c,), jnp.float32, -bound, bound); idx += 1
    bound = 1.0 / ((2 * c) ** 0.5)
    tp['w_fuse'] = jax.random.uniform(keys[idx], (c, 2 * c, 1, 1), jnp.float32, -bound, bound); idx += 1
    tp['b_fuse'] = jax.random.uniform(keys[idx], (c,), jnp.float32, -bound, bound); idx += 1
    return tp


def to_kernel_params(tp, c):
    bf16 = jnp.bfloat16

    def w3(n):  # torch OIHW (c, c, 3, 3) -> (c, 9c); column index = (ky*3+kx)*c + ci
        return tp['w_' + n].transpose(0, 2, 3, 1).reshape(c, 9 * c)

    return {
        'w_kv_l': jnp.concatenate([w3('ks'), w3('vs')], axis=0).astype(bf16),   # (2c, 9c)
        'b_kv_l': jnp.concatenate([tp['b_ks'], tp['b_vs']]).reshape(2 * c, 1),
        'w_kv_v': jnp.concatenate([w3('kc'), w3('vc')], axis=0).astype(bf16),   # (2c, 9c)
        'b_kv_v': jnp.concatenate([tp['b_kc'], tp['b_vc']]).reshape(2 * c, 1),
        'w_qs_t': w3('qs').T,                                                   # (9c, c) f32
        'b_qs': tp['b_qs'].reshape(1, c),
        'w_qc_t': w3('qc').T,                                                   # (9c, c) f32
        'b_qc': tp['b_qc'].reshape(1, c),
        'w_gs': tp['w_gs'][:, :, 0, 0],                                         # (c, c) [co, ci]
        'b_gs': tp['b_gs'].reshape(c, 1),
        'w_fuse_s': tp['w_fuse'][:, :c, 0, 0],                                  # (c, c)
        'w_fuse_c': tp['w_fuse'][:, c:, 0, 0],                                  # (c, c)
        'b_fuse': tp['b_fuse'].reshape(c, 1),
    }


# ---------------------------------------------------------------------------
# Pure-JAX reference (mirrors the PyTorch forward exactly) for validation.
# ---------------------------------------------------------------------------
def _conv_nchw(x, w, bias, pad):
    y = jax.lax.conv_general_dilated(
        x, w, window_strides=(1, 1), padding=((pad, pad), (pad, pad)),
        dimension_numbers=('NCHW', 'OIHW', 'NCHW'),
        precision=jax.lax.Precision.HIGHEST)
    return y + bias[None, :, None, None]


def rtb_reference(Fl, Fv, tp):
    b, c, h, w = Fl.shape
    hw = h * w
    hi = jax.lax.Precision.HIGHEST
    Qs = _conv_nchw(Fl, tp['w_qs'], tp['b_qs'], 1).reshape(b, -1, hw)
    Ks = _conv_nchw(Fl, tp['w_ks'], tp['b_ks'], 1).reshape(b, -1, hw)
    Vs = _conv_nchw(Fl, tp['w_vs'], tp['b_vs'], 1).reshape(b, -1, hw)
    multi_s = jnp.einsum('ijk,ijq->ikq', Qs, Ks, precision=hi)
    multi_s = jax.nn.softmax(multi_s, axis=1)
    Gs = jnp.einsum('bik,bjk->bij', multi_s, Vs, precision=hi).reshape(b, c, h, w)
    Gs = _conv_nchw(Gs, tp['w_gs'], tp['b_gs'], 0) + Fl
    Qc = _conv_nchw(Fl, tp['w_qc'], tp['b_qc'], 1).reshape(b, -1, hw)
    Kc = _conv_nchw(Fv, tp['w_kc'], tp['b_kc'], 1).reshape(b, -1, hw)
    Vc = _conv_nchw(Fv, tp['w_vc'], tp['b_vc'], 1).reshape(b, -1, hw)
    multi_c = jnp.einsum('ijk,ijq->ikq', Qc, Kc, precision=hi)
    multi_c = jax.nn.softmax(multi_c, axis=1)
    Gc = jnp.einsum('bik,bjk->bij', multi_c, Vc, precision=hi).reshape(b, c, h, w)
    Gc = _conv_nchw(Gc, tp['w_gs'], tp['b_gs'], 0) + Fv          # module uses Gs_conv here too
    cat = jnp.concatenate([Gs, Gc], axis=1)
    return _conv_nchw(cat, tp['w_fuse'], tp['b_fuse'], 0)


if __name__ == "__main__":
    B, C, H, W = 2, 4, 16, 16
    key = jax.random.PRNGKey(0)
    k1, k2, k3 = jax.random.split(key, 3)
    Fl = jax.random.normal(k1, (B, C, H, W), jnp.float32)
    Fv = jax.random.normal(k2, (B, C, H, W), jnp.float32)

    tp = init_torch_params(k3, C)
    kp = to_kernel_params(tp, C)

    out = jax.jit(rtb_forward)(Fl, Fv, kp)
    out = jax.block_until_ready(out)

    ref = rtb_reference(Fl, Fv, tp)
    assert out.shape == (B, C, H, W)
    # bf16 MXU operands (per perf review) with f32 accumulation + f32 softmax:
    # tolerance widened accordingly vs the pure-f32 reference.
    if not jnp.allclose(out, ref, atol=2.5e-2, rtol=2.5e-2):
        raise AssertionError(
            f"mismatch vs reference, max abs err = {jnp.max(jnp.abs(out - ref))}")
    print("KERNEL_OK")
</pallas_src>

<mosaic_0001>
module attributes {stable_mosaic.version = 11 : i64} {
  func.func @_rtb_attn_kernel(%arg0: i32, %arg1: i32, %arg2: memref<1x4x256xf32, #tpu.memory_space<vmem>>, %arg3: memref<1x4x256xf32, #tpu.memory_space<vmem>>, %arg4: memref<9x256xf32, #tpu.memory_space<vmem>>, %arg5: memref<8x36xbf16, #tpu.memory_space<vmem>>, %arg6: memref<8x1xf32, #tpu.memory_space<vmem>>, %arg7: memref<8x36xbf16, #tpu.memory_space<vmem>>, %arg8: memref<8x1xf32, #tpu.memory_space<vmem>>, %arg9: memref<36x4xf32, #tpu.memory_space<vmem>>, %arg10: memref<1x4xf32, #tpu.memory_space<vmem>>, %arg11: memref<36x4xf32, #tpu.memory_space<vmem>>, %arg12: memref<1x4xf32, #tpu.memory_space<vmem>>, %arg13: memref<1x256x4xf32, #tpu.memory_space<vmem>>, %arg14: memref<1x256x4xf32, #tpu.memory_space<vmem>>, %arg15: memref<8x256xbf16, #tpu.memory_space<vmem>>, %arg16: memref<8x256xbf16, #tpu.memory_space<vmem>>, %arg17: memref<256x4xbf16, #tpu.memory_space<vmem>>, %arg18: memref<256x4xbf16, #tpu.memory_space<vmem>>) attributes {dimension_semantics = [#tpu.dimension_semantics<parallel>, #tpu.dimension_semantics<arbitrary>], iteration_bounds = array<i64: 2, 1>, scalar_prefetch = 0 : i64, scratch_operands = 4 : i64, tpu.core_type = #tpu.core_type<tc>, window_params = [{transform_indices = @transform_0, window_bounds = array<i64: 1, 4, 256>}, {transform_indices = @transform_1, window_bounds = array<i64: 1, 4, 256>}, {pipeline_mode = #tpu.pipeline_mode<synchronous>, transform_indices = @transform_2, window_bounds = array<i64: 9, 256>}, {pipeline_mode = #tpu.pipeline_mode<synchronous>, transform_indices = @transform_3, window_bounds = array<i64: 8, 36>}, {pipeline_mode = #tpu.pipeline_mode<synchronous>, transform_indices = @transform_4, window_bounds = array<i64: 8, 1>}, {pipeline_mode = #tpu.pipeline_mode<synchronous>, transform_indices = @transform_5, window_bounds = array<i64: 8, 36>}, {pipeline_mode = #tpu.pipeline_mode<synchronous>, transform_indices = @transform_6, window_bounds = array<i64: 8, 1>}, {pipeline_mode = #tpu.pipeline_mode<synchronous>, transform_indices = @transform_7, window_bounds = array<i64: 36, 4>}, {pipeline_mode = #tpu.pipeline_mode<synchronous>, transform_indices = @transform_8, window_bounds = array<i64: 1, 4>}, {pipeline_mode = #tpu.pipeline_mode<synchronous>, transform_indices = @transform_9, window_bounds = array<i64: 36, 4>}, {pipeline_mode = #tpu.pipeline_mode<synchronous>, transform_indices = @transform_10, window_bounds = array<i64: 1, 4>}, {transform_indices = @transform_11, window_bounds = array<i64: 1, 256, 4>}, {transform_indices = @transform_12, window_bounds = array<i64: 1, 256, 4>}]} {
    %c0_i32 = arith.constant 0 : i32
    %0 = arith.cmpi eq, %arg1, %c0_i32 : i32
    %1 = arith.extui %0 : i1 to i32
    %c0_i32_0 = arith.constant 0 : i32
    %2 = arith.cmpi ne, %1, %c0_i32_0 : i32
    scf.if %2 {
      %c0_36 = arith.constant 0 : index
      %c0_37 = arith.constant 0 : index
      %96 = vector.load %arg4[%c0_36, %c0_37] : memref<9x256xf32, #tpu.memory_space<vmem>>, vector<9x256xf32>
      %c0_38 = arith.constant 0 : index
      %c0_39 = arith.constant 0 : index
      %c0_40 = arith.constant 0 : index
      %97 = vector.load %arg2[%c0_38, %c0_39, %c0_40] : memref<1x4x256xf32, #tpu.memory_space<vmem>>, vector<1x4x256xf32>
      %98 = vector.shape_cast %97 : vector<1x4x256xf32> to vector<4x256xf32>
      %c0_41 = arith.constant 0 : index
      %c0_42 = arith.constant 0 : index
      %c0_43 = arith.constant 0 : index
      %99 = vector.load %arg3[%c0_41, %c0_42, %c0_43] : memref<1x4x256xf32, #tpu.memory_space<vmem>>, vector<1x4x256xf32>
      %100 = vector.shape_cast %99 : vector<1x4x256xf32> to vector<4x256xf32>
      %c0_44 = arith.constant 0 : index
      %c0_45 = arith.constant 0 : index
      %101 = vector.load %arg5[%c0_44, %c0_45] : memref<8x36xbf16, #tpu.memory_space<vmem>>, vector<8x36xbf16>
      %c0_46 = arith.constant 0 : index
      %c0_47 = arith.constant 0 : index
      %102 = vector.load %arg7[%c0_46, %c0_47] : memref<8x36xbf16, #tpu.memory_space<vmem>>, vector<8x36xbf16>
      %c0_48 = arith.constant 0 : index
      %c0_49 = arith.constant 0 : index
      %103 = vector.load %arg9[%c0_48, %c0_49] : memref<36x4xf32, #tpu.memory_space<vmem>>, vector<36x4xf32>
      %c0_50 = arith.constant 0 : index
      %c0_51 = arith.constant 0 : index
      %104 = vector.load %arg11[%c0_50, %c0_51] : memref<36x4xf32, #tpu.memory_space<vmem>>, vector<36x4xf32>
      %c0_52 = arith.constant 0 : index
      %c0_53 = arith.constant 0 : index
      %105 = vector.load %arg6[%c0_52, %c0_53] : memref<8x1xf32, #tpu.memory_space<vmem>>, vector<8x1xf32>
      %c0_54 = arith.constant 0 : index
      %c0_55 = arith.constant 0 : index
      %106 = vector.load %arg8[%c0_54, %c0_55] : memref<8x1xf32, #tpu.memory_space<vmem>>, vector<8x1xf32>
      %c0_56 = arith.constant 0 : index
      %c0_57 = arith.constant 0 : index
      %107 = vector.load %arg10[%c0_56, %c0_57] : memref<1x4xf32, #tpu.memory_space<vmem>>, vector<1x4xf32>
      %c0_58 = arith.constant 0 : index
      %c0_59 = arith.constant 0 : index
      %108 = vector.load %arg12[%c0_58, %c0_59] : memref<1x4xf32, #tpu.memory_space<vmem>>, vector<1x4xf32>
      %c17_i32 = arith.constant 17 : i32
      %109 = tpu.dynamic_rotate %98 by %c17_i32 dim 1 : vector<4x256xf32>, i32 -> vector<4x256xf32>
      %110 = vector.extract_strided_slice %96 {offsets = [0, 0], sizes = [1, 256], strides = [1, 1]} : vector<9x256xf32> to vector<1x256xf32>
      %111 = vector.broadcast %110 : vector<1x256xf32> to vector<4x256xf32>
      %112 = arith.mulf %109, %111 : vector<4x256xf32>
      %c16_i32 = arith.constant 16 : i32
      %113 = tpu.dynamic_rotate %98 by %c16_i32 dim 1 : vector<4x256xf32>, i32 -> vector<4x256xf32>
      %114 = vector.extract_strided_slice %96 {offsets = [1, 0], sizes = [1, 256], strides = [1, 1]} : vector<9x256xf32> to vector<1x256xf32>
      %115 = vector.broadcast %114 : vector<1x256xf32> to vector<4x256xf32>
      %116 = arith.mulf %113, %115 : vector<4x256xf32>
      %c15_i32 = arith.constant 15 : i32
      %117 = tpu.dynamic_rotate %98 by %c15_i32 dim 1 : vector<4x256xf32>, i32 -> vector<4x256xf32>
      %118 = vector.extract_strided_slice %96 {offsets = [2, 0], sizes = [1, 256], strides = [1, 1]} : vector<9x256xf32> to vector<1x256xf32>
      %119 = vector.broadcast %118 : vector<1x256xf32> to vector<4x256xf32>
      %120 = arith.mulf %117, %119 : vector<4x256xf32>
      %c1_i32 = arith.constant 1 : i32
      %121 = tpu.dynamic_rotate %98 by %c1_i32 dim 1 : vector<4x256xf32>, i32 -> vector<4x256xf32>
      %122 = vector.extract_strided_slice %96 {offsets = [3, 0], sizes = [1, 256], strides = [1, 1]} : vector<9x256xf32> to vector<1x256xf32>
      %123 = vector.broadcast %122 : vector<1x256xf32> to vector<4x256xf32>
      %124 = arith.mulf %121, %123 : vector<4x256xf32>
      %125 = vector.extract_strided_slice %96 {offsets = [4, 0], sizes = [1, 256], strides = [1, 1]} : vector<9x256xf32> to vector<1x256xf32>
      %126 = vector.broadcast %125 : vector<1x256xf32> to vector<4x256xf32>
      %127 = arith.mulf %98, %126 : vector<4x256xf32>
      %c255_i32 = arith.constant 255 : i32
      %128 = tpu.dynamic_rotate %98 by %c255_i32 dim 1 : vector<4x256xf32>, i32 -> vector<4x256xf32>
      %129 = vector.extract_strided_slice %96 {offsets = [5, 0], sizes = [1, 256], strides = [1, 1]} : vector<9x256xf32> to vector<1x256xf32>
      %130 = vector.broadcast %129 : vector<1x256xf32> to vector<4x256xf32>
      %131 = arith.mulf %128, %130 : vector<4x256xf32>
      %c241_i32 = arith.constant 241 : i32
      %132 = tpu.dynamic_rotate %98 by %c241_i32 dim 1 : vector<4x256xf32>, i32 -> vector<4x256xf32>
      %133 = vector.extract_strided_slice %96 {offsets = [6, 0], sizes = [1, 256], strides = [1, 1]} : vector<9x256xf32> to vector<1x256xf32>
      %134 = vector.broadcast %133 : vector<1x256xf32> to vector<4x256xf32>
      %135 = arith.mulf %132, %134 : vector<4x256xf32>
      %c240_i32 = arith.constant 240 : i32
      %136 = tpu.dynamic_rotate %98 by %c240_i32 dim 1 : vector<4x256xf32>, i32 -> vector<4x256xf32>
      %137 = vector.extract_strided_slice %96 {offsets = [7, 0], sizes = [1, 256], strides = [1, 1]} : vector<9x256xf32> to vector<1x256xf32>
      %138 = vector.broadcast %137 : vector<1x256xf32> to vector<4x256xf32>
      %139 = arith.mulf %136, %138 : vector<4x256xf32>
      %c239_i32 = arith.constant 239 : i32
      %140 = tpu.dynamic_rotate %98 by %c239_i32 dim 1 : vector<4x256xf32>, i32 -> vector<4x256xf32>
      %141 = vector.extract_strided_slice %96 {offsets = [8, 0], sizes = [1, 256], strides = [1, 1]} : vector<9x256xf32> to vector<1x256xf32>
      %142 = vector.broadcast %141 : vector<1x256xf32> to vector<4x256xf32>
      %143 = arith.mulf %140, %142 : vector<4x256xf32>
      %144 = tpu.concatenate %112, %116, %120, %124, %127, %131, %135, %139, %143 in 0 : vector<4x256xf32>, vector<4x256xf32>, vector<4x256xf32>, vector<4x256xf32>, vector<4x256xf32>, vector<4x256xf32>, vector<4x256xf32>, vector<4x256xf32>, vector<4x256xf32> -> vector<36x256xf32>
      %c17_i32_60 = arith.constant 17 : i32
      %145 = tpu.dynamic_rotate %100 by %c17_i32_60 dim 1 : vector<4x256xf32>, i32 -> vector<4x256xf32>
      %146 = vector.extract_strided_slice %96 {offsets = [0, 0], sizes = [1, 256], strides = [1, 1]} : vector<9x256xf32> to vector<1x256xf32>
      %147 = vector.broadcast %146 : vector<1x256xf32> to vector<4x256xf32>
      %148 = arith.mulf %145, %147 : vector<4x256xf32>
      %c16_i32_61 = arith.constant 16 : i32
      %149 = tpu.dynamic_rotate %100 by %c16_i32_61 dim 1 : vector<4x256xf32>, i32 -> vector<4x256xf32>
      %150 = vector.extract_strided_slice %96 {offsets = [1, 0], sizes = [1, 256], strides = [1, 1]} : vector<9x256xf32> to vector<1x256xf32>
      %151 = vector.broadcast %150 : vector<1x256xf32> to vector<4x256xf32>
      %152 = arith.mulf %149, %151 : vector<4x256xf32>
      %c15_i32_62 = arith.constant 15 : i32
      %153 = tpu.dynamic_rotate %100 by %c15_i32_62 dim 1 : vector<4x256xf32>, i32 -> vector<4x256xf32>
      %154 = vector.extract_strided_slice %96 {offsets = [2, 0], sizes = [1, 256], strides = [1, 1]} : vector<9x256xf32> to vector<1x256xf32>
      %155 = vector.broadcast %154 : vector<1x256xf32> to vector<4x256xf32>
      %156 = arith.mulf %153, %155 : vector<4x256xf32>
      %c1_i32_63 = arith.constant 1 : i32
      %157 = tpu.dynamic_rotate %100 by %c1_i32_63 dim 1 : vector<4x256xf32>, i32 -> vector<4x256xf32>
      %158 = vector.extract_strided_slice %96 {offsets = [3, 0], sizes = [1, 256], strides = [1, 1]} : vector<9x256xf32> to vector<1x256xf32>
      %159 = vector.broadcast %158 : vector<1x256xf32> to vector<4x256xf32>
      %160 = arith.mulf %157, %159 : vector<4x256xf32>
      %161 = vector.extract_strided_slice %96 {offsets = [4, 0], sizes = [1, 256], strides = [1, 1]} : vector<9x256xf32> to vector<1x256xf32>
      %162 = vector.broadcast %161 : vector<1x256xf32> to vector<4x256xf32>
      %163 = arith.mulf %100, %162 : vector<4x256xf32>
      %c255_i32_64 = arith.constant 255 : i32
      %164 = tpu.dynamic_rotate %100 by %c255_i32_64 dim 1 : vector<4x256xf32>, i32 -> vector<4x256xf32>
      %165 = vector.extract_strided_slice %96 {offsets = [5, 0], sizes = [1, 256], strides = [1, 1]} : vector<9x256xf32> to vector<1x256xf32>
      %166 = vector.broadcast %165 : vector<1x256xf32> to vector<4x256xf32>
      %167 = arith.mulf %164, %166 : vector<4x256xf32>
      %c241_i32_65 = arith.constant 241 : i32
      %168 = tpu.dynamic_rotate %100 by %c241_i32_65 dim 1 : vector<4x256xf32>, i32 -> vector<4x256xf32>
      %169 = vector.extract_strided_slice %96 {offsets = [6, 0], sizes = [1, 256], strides = [1, 1]} : vector<9x256xf32> to vector<1x256xf32>
      %170 = vector.broadcast %169 : vector<1x256xf32> to vector<4x256xf32>
      %171 = arith.mulf %168, %170 : vector<4x256xf32>
      %c240_i32_66 = arith.constant 240 : i32
      %172 = tpu.dynamic_rotate %100 by %c240_i32_66 dim 1 : vector<4x256xf32>, i32 -> vector<4x256xf32>
      %173 = vector.extract_strided_slice %96 {offsets = [7, 0], sizes = [1, 256], strides = [1, 1]} : vector<9x256xf32> to vector<1x256xf32>
      %174 = vector.broadcast %173 : vector<1x256xf32> to vector<4x256xf32>
      %175 = arith.mulf %172, %174 : vector<4x256xf32>
      %c239_i32_67 = arith.constant 239 : i32
      %176 = tpu.dynamic_rotate %100 by %c239_i32_67 dim 1 : vector<4x256xf32>, i32 -> vector<4x256xf32>
      %177 = vector.extract_strided_slice %96 {offsets = [8, 0], sizes = [1, 256], strides = [1, 1]} : vector<9x256xf32> to vector<1x256xf32>
      %178 = vector.broadcast %177 : vector<1x256xf32> to vector<4x256xf32>
      %179 = arith.mulf %176, %178 : vector<4x256xf32>
      %180 = tpu.concatenate %148, %152, %156, %160, %163, %167, %171, %175, %179 in 0 : vector<4x256xf32>, vector<4x256xf32>, vector<4x256xf32>, vector<4x256xf32>, vector<4x256xf32>, vector<4x256xf32>, vector<4x256xf32>, vector<4x256xf32>, vector<4x256xf32> -> vector<36x256xf32>
      %181 = arith.truncf %144 : vector<36x256xf32> to vector<36x256xbf16>
      %182 = arith.truncf %180 : vector<36x256xf32> to vector<36x256xbf16>
      %cst_68 = arith.constant dense<0.000000e+00> : vector<8x256xf32>
      %183 = tpu.matmul %101, %181, %cst_68 {dimension_numbers = #tpu.dot_dimension_numbers<[1], [0], [0], [1], [0, 0, 1, 1], [], []>} : vector<8x36xbf16>, vector<36x256xbf16>, vector<8x256xf32> -> vector<8x256xf32>
      %184 = vector.broadcast %105 : vector<8x1xf32> to vector<8x256xf32>
      %185 = arith.addf %183, %184 : vector<8x256xf32>
      %186 = arith.truncf %185 : vector<8x256xf32> to vector<8x256xbf16>
      %c0_69 = arith.constant 0 : index
      %c0_70 = arith.constant 0 : index
      %187 = vector.load %arg15[%c0_69, %c0_70] : memref<8x256xbf16, #tpu.memory_space<vmem>>, vector<8x256xbf16>
      tpu.vector_store %arg15[%c0_69, %c0_70], %186 {strides = array<i32>} : memref<8x256xbf16, #tpu.memory_space<vmem>>, vector<8x256xbf16>,
      %cst_71 = arith.constant dense<0.000000e+00> : vector<8x256xf32>
      %188 = tpu.matmul %102, %182, %cst_71 {dimension_numbers = #tpu.dot_dimension_numbers<[1], [0], [0], [1], [0, 0, 1, 1], [], []>} : vector<8x36xbf16>, vector<36x256xbf16>, vector<8x256xf32> -> vector<8x256xf32>
      %189 = vector.broadcast %106 : vector<8x1xf32> to vector<8x256xf32>
      %190 = arith.addf %188, %189 : vector<8x256xf32>
      %191 = arith.truncf %190 : vector<8x256xf32> to vector<8x256xbf16>
      %c0_72 = arith.constant 0 : index
      %c0_73 = arith.constant 0 : index
      %192 = vector.load %arg16[%c0_72, %c0_73] : memref<8x256xbf16, #tpu.memory_space<vmem>>, vector<8x256xbf16>
      tpu.vector_store %arg16[%c0_72, %c0_73], %191 {strides = array<i32>} : memref<8x256xbf16, #tpu.memory_space<vmem>>, vector<8x256xbf16>,
      %cst_74 = arith.constant dense<0.000000e+00> : vector<256x4xf32>
      %193 = tpu.matmul %144, %103, %cst_74 {dimension_numbers = #tpu.dot_dimension_numbers<[0], [0], [1], [1], [0, 1, 1, 1], [], []>} : vector<36x256xf32>, vector<36x4xf32>, vector<256x4xf32> -> vector<256x4xf32>
      %194 = vector.broadcast %107 : vector<1x4xf32> to vector<256x4xf32>
      %195 = arith.addf %193, %194 : vector<256x4xf32>
      %196 = arith.truncf %195 : vector<256x4xf32> to vector<256x4xbf16>
      %c0_75 = arith.constant 0 : index
      %c0_76 = arith.constant 0 : index
      %197 = vector.load %arg17[%c0_75, %c0_76] : memref<256x4xbf16, #tpu.memory_space<vmem>>, vector<256x4xbf16>
      tpu.vector_store %arg17[%c0_75, %c0_76], %196 {strides = array<i32>} : memref<256x4xbf16, #tpu.memory_space<vmem>>, vector<256x4xbf16>,
      %cst_77 = arith.constant dense<0.000000e+00> : vector<256x4xf32>
      %198 = tpu.matmul %144, %104, %cst_77 {dimension_numbers = #tpu.dot_dimension_numbers<[0], [0], [1], [1], [0, 1, 1, 1], [], []>} : vector<36x256xf32>, vector<36x4xf32>, vector<256x4xf32> -> vector<256x4xf32>
      %199 = vector.broadcast %108 : vector<1x4xf32> to vector<256x4xf32>
      %200 = arith.addf %198, %199 : vector<256x4xf32>
      %201 = arith.truncf %200 : vector<256x4xf32> to vector<256x4xbf16>
      %c0_78 = arith.constant 0 : index
      %c0_79 = arith.constant 0 : index
      %202 = vector.load %arg18[%c0_78, %c0_79] : memref<256x4xbf16, #tpu.memory_space<vmem>>, vector<256x4xbf16>
      tpu.vector_store %arg18[%c0_78, %c0_79], %201 {strides = array<i32>} : memref<256x4xbf16, #tpu.memory_space<vmem>>, vector<256x4xbf16>,
      %cst_80 = arith.constant 0.000000e+00 : f32
      %203 = vector.broadcast %cst_80 : f32 to vector<1x256x4xf32>
      %c0_81 = arith.constant 0 : index
      %c0_82 = arith.constant 0 : index
      %c0_83 = arith.constant 0 : index
      %204 = vector.load %arg13[%c0_81, %c0_82, %c0_83] : memref<1x256x4xf32, #tpu.memory_space<vmem>>, vector<1x256x4xf32>
      tpu.vector_store %arg13[%c0_81, %c0_82, %c0_83], %203 {strides = array<i32>} : memref<1x256x4xf32, #tpu.memory_space<vmem>>, vector<1x256x4xf32>,
      %cst_84 = arith.constant 0.000000e+00 : f32
      %205 = vector.broadcast %cst_84 : f32 to vector<1x256x4xf32>
      %c0_85 = arith.constant 0 : index
      %c0_86 = arith.constant 0 : index
      %c0_87 = arith.constant 0 : index
      %206 = vector.load %arg14[%c0_85, %c0_86, %c0_87] : memref<1x256x4xf32, #tpu.memory_space<vmem>>, vector<1x256x4xf32>
      tpu.vector_store %arg14[%c0_85, %c0_86, %c0_87], %205 {strides = array<i32>} : memref<1x256x4xf32, #tpu.memory_space<vmem>>, vector<1x256x4xf32>,
    } else {
    }
    %c256_i32 = arith.constant 256 : i32
    %3 = arith.muli %arg1, %c256_i32 : i32
    %c0 = arith.constant 0 : index
    %c0_1 = arith.constant 0 : index
    %4 = vector.load %arg17[%c0, %c0_1] : memref<256x4xbf16, #tpu.memory_space<vmem>>, vector<256x4xbf16>
    %c0_2 = arith.constant 0 : index
    %c0_3 = arith.constant 0 : index
    %5 = vector.load %arg18[%c0_2, %c0_3] : memref<256x4xbf16, #tpu.memory_space<vmem>>, vector<256x4xbf16>
    %c0_i32_4 = arith.constant 0 : i32
    %6 = arith.addi %3, %c0_i32_4 : i32
    %7 = tpu.assume_multiple %6, 128 : i32
    %c0_5 = arith.constant 0 : index
    %8 = arith.index_cast %7 : i32 to index
    %9 = vector.load %arg15[%c0_5, %8] : memref<8x256xbf16, #tpu.memory_space<vmem>>, vector<8x128xbf16>
    %10 = vector.extract_strided_slice %9 {offsets = [0, 0], sizes = [4, 128], strides = [1, 1]} : vector<8x128xbf16> to vector<4x128xbf16>
    %11 = vector.extract_strided_slice %9 {offsets = [4, 0], sizes = [4, 128], strides = [1, 1]} : vector<8x128xbf16> to vector<4x128xbf16>
    %cst = arith.constant dense<0.000000e+00> : vector<256x128xf32>
    %12 = tpu.matmul %4, %10, %cst {dimension_numbers = #tpu.dot_dimension_numbers<[1], [0], [0], [1], [0, 0, 1, 1], [], []>} : vector<256x4xbf16>, vector<4x128xbf16>, vector<256x128xf32> -> vector<256x128xf32>
    %cst_6 = arith.constant dense<0xFF800000> : vector<128xf32>
    %13 = vector.multi_reduction <maximumf>, %12, %cst_6 [0] : vector<256x128xf32> to vector<128xf32>
    %14 = vector.shape_cast %13 : vector<128xf32> to vector<1x128xf32>
    %15 = vector.broadcast %14 : vector<1x128xf32> to vector<256x128xf32>
    %16 = arith.subf %12, %15 : vector<256x128xf32>
    %17 = math.exp %16 : vector<256x128xf32>
    %cst_7 = arith.constant dense<0.000000e+00> : vector<128xf32>
    %18 = vector.multi_reduction <add>, %17, %cst_7 [0] : vector<256x128xf32> to vector<128xf32>
    %19 = vector.shape_cast %18 : vector<128xf32> to vector<1x128xf32>
    %20 = tpu.reciprocal %19 : vector<1x128xf32> -> vector<1x128xf32>
    %21 = arith.extf %11 : vector<4x128xbf16> to vector<4x128xf32>
    %22 = vector.broadcast %20 : vector<1x128xf32> to vector<4x128xf32>
    %23 = arith.mulf %21, %22 : vector<4x128xf32>
    %24 = arith.truncf %23 : vector<4x128xf32> to vector<4x128xbf16>
    %25 = arith.truncf %17 : vector<256x128xf32> to vector<256x128xbf16>
    %cst_8 = arith.constant dense<0.000000e+00> : vector<256x4xf32>
    %26 = tpu.matmul %25, %24, %cst_8 {dimension_numbers = #tpu.dot_dimension_numbers<[1], [1], [0], [0], [0, 0, 1, 0], [], []>} : vector<256x128xbf16>, vector<4x128xbf16>, vector<256x4xf32> -> vector<256x4xf32>
    %c0_9 = arith.constant 0 : index
    %27 = arith.index_cast %7 : i32 to index
    %28 = vector.load %arg16[%c0_9, %27] : memref<8x256xbf16, #tpu.memory_space<vmem>>, vector<8x128xbf16>
    %29 = vector.extract_strided_slice %28 {offsets = [0, 0], sizes = [4, 128], strides = [1, 1]} : vector<8x128xbf16> to vector<4x128xbf16>
    %30 = vector.extract_strided_slice %28 {offsets = [4, 0], sizes = [4, 128], strides = [1, 1]} : vector<8x128xbf16> to vector<4x128xbf16>
    %cst_10 = arith.constant dense<0.000000e+00> : vector<256x128xf32>
    %31 = tpu.matmul %5, %29, %cst_10 {dimension_numbers = #tpu.dot_dimension_numbers<[1], [0], [0], [1], [0, 0, 1, 1], [], []>} : vector<256x4xbf16>, vector<4x128xbf16>, vector<256x128xf32> -> vector<256x128xf32>
    %cst_11 = arith.constant dense<0xFF800000> : vector<128xf32>
    %32 = vector.multi_reduction <maximumf>, %31, %cst_11 [0] : vector<256x128xf32> to vector<128xf32>
    %33 = vector.shape_cast %32 : vector<128xf32> to vector<1x128xf32>
    %34 = vector.broadcast %33 : vector<1x128xf32> to vector<256x128xf32>
    %35 = arith.subf %31, %34 : vector<256x128xf32>
    %36 = math.exp %35 : vector<256x128xf32>
    %cst_12 = arith.constant dense<0.000000e+00> : vector<128xf32>
    %37 = vector.multi_reduction <add>, %36, %cst_12 [0] : vector<256x128xf32> to vector<128xf32>
    %38 = vector.shape_cast %37 : vector<128xf32> to vector<1x128xf32>
    %39 = tpu.reciprocal %38 : vector<1x128xf32> -> vector<1x128xf32>
    %40 = arith.extf %30 : vector<4x128xbf16> to vector<4x128xf32>
    %41 = vector.broadcast %39 : vector<1x128xf32> to vector<4x128xf32>
    %42 = arith.mulf %40, %41 : vector<4x128xf32>
    %43 = arith.truncf %42 : vector<4x128xf32> to vector<4x128xbf16>
    %44 = arith.truncf %36 : vector<256x128xf32> to vector<256x128xbf16>
    %cst_13 = arith.constant dense<0.000000e+00> : vector<256x4xf32>
    %45 = tpu.matmul %44, %43, %cst_13 {dimension_numbers = #tpu.dot_dimension_numbers<[1], [1], [0], [0], [0, 0, 1, 0], [], []>} : vector<256x128xbf16>, vector<4x128xbf16>, vector<256x4xf32> -> vector<256x4xf32>
    %c128_i32 = arith.constant 128 : i32
    %46 = arith.addi %3, %c128_i32 : i32
    %47 = tpu.assume_multiple %46, 128 : i32
    %c0_14 = arith.constant 0 : index
    %48 = arith.index_cast %47 : i32 to index
    %49 = vector.load %arg15[%c0_14, %48] : memref<8x256xbf16, #tpu.memory_space<vmem>>, vector<8x128xbf16>
    %50 = vector.extract_strided_slice %49 {offsets = [0, 0], sizes = [4, 128], strides = [1, 1]} : vector<8x128xbf16> to vector<4x128xbf16>
    %51 = vector.extract_strided_slice %49 {offsets = [4, 0], sizes = [4, 128], strides = [1, 1]} : vector<8x128xbf16> to vector<4x128xbf16>
    %cst_15 = arith.constant dense<0.000000e+00> : vector<256x128xf32>
    %52 = tpu.matmul %4, %50, %cst_15 {dimension_numbers = #tpu.dot_dimension_numbers<[1], [0], [0], [1], [0, 0, 1, 1], [], []>} : vector<256x4xbf16>, vector<4x128xbf16>, vector<256x128xf32> -> vector<256x128xf32>
    %cst_16 = arith.constant dense<0xFF800000> : vector<128xf32>
    %53 = vector.multi_reduction <maximumf>, %52, %cst_16 [0] : vector<256x128xf32> to vector<128xf32>
    %54 = vector.shape_cast %53 : vector<128xf32> to vector<1x128xf32>
    %55 = vector.broadcast %54 : vector<1x128xf32> to vector<256x128xf32>
    %56 = arith.subf %52, %55 : vector<256x128xf32>
    %57 = math.exp %56 : vector<256x128xf32>
    %cst_17 = arith.constant dense<0.000000e+00> : vector<128xf32>
    %58 = vector.multi_reduction <add>, %57, %cst_17 [0] : vector<256x128xf32> to vector<128xf32>
    %59 = vector.shape_cast %58 : vector<128xf32> to vector<1x128xf32>
    %60 = tpu.reciprocal %59 : vector<1x128xf32> -> vector<1x128xf32>
    %61 = arith.extf %51 : vector<4x128xbf16> to vector<4x128xf32>
    %62 = vector.broadcast %60 : vector<1x128xf32> to vector<4x128xf32>
    %63 = arith.mulf %61, %62 : vector<4x128xf32>
    %64 = arith.truncf %63 : vector<4x128xf32> to vector<4x128xbf16>
    %65 = arith.truncf %57 : vector<256x128xf32> to vector<256x128xbf16>
    %cst_18 = arith.constant dense<0.000000e+00> : vector<256x4xf32>
    %66 = tpu.matmul %65, %64, %cst_18 {dimension_numbers = #tpu.dot_dimension_numbers<[1], [1], [0], [0], [0, 0, 1, 0], [], []>} : vector<256x128xbf16>, vector<4x128xbf16>, vector<256x4xf32> -> vector<256x4xf32>
    %c0_19 = arith.constant 0 : index
    %67 = arith.index_cast %47 : i32 to index
    %68 = vector.load %arg16[%c0_19, %67] : memref<8x256xbf16, #tpu.memory_space<vmem>>, vector<8x128xbf16>
    %69 = vector.extract_strided_slice %68 {offsets = [0, 0], sizes = [4, 128], strides = [1, 1]} : vector<8x128xbf16> to vector<4x128xbf16>
    %70 = vector.extract_strided_slice %68 {offsets = [4, 0], sizes = [4, 128], strides = [1, 1]} : vector<8x128xbf16> to vector<4x128xbf16>
    %cst_20 = arith.constant dense<0.000000e+00> : vector<256x128xf32>
    %71 = tpu.matmul %5, %69, %cst_20 {dimension_numbers = #tpu.dot_dimension_numbers<[1], [0], [0], [1], [0, 0, 1, 1], [], []>} : vector<256x4xbf16>, vector<4x128xbf16>, vector<256x128xf32> -> vector<256x128xf32>
    %cst_21 = arith.constant dense<0xFF800000> : vector<128xf32>
    %72 = vector.multi_reduction <maximumf>, %71, %cst_21 [0] : vector<256x128xf32> to vector<128xf32>
    %73 = vector.shape_cast %72 : vector<128xf32> to vector<1x128xf32>
    %74 = vector.broadcast %73 : vector<1x128xf32> to vector<256x128xf32>
    %75 = arith.subf %71, %74 : vector<256x128xf32>
    %76 = math.exp %75 : vector<256x128xf32>
    %cst_22 = arith.constant dense<0.000000e+00> : vector<128xf32>
    %77 = vector.multi_reduction <add>, %76, %cst_22 [0] : vector<256x128xf32> to vector<128xf32>
    %78 = vector.shape_cast %77 : vector<128xf32> to vector<1x128xf32>
    %79 = tpu.reciprocal %78 : vector<1x128xf32> -> vector<1x128xf32>
    %80 = arith.extf %70 : vector<4x128xbf16> to vector<4x128xf32>
    %81 = vector.broadcast %79 : vector<1x128xf32> to vector<4x128xf32>
    %82 = arith.mulf %80, %81 : vector<4x128xf32>
    %83 = arith.truncf %82 : vector<4x128xf32> to vector<4x128xbf16>
    %84 = arith.truncf %76 : vector<256x128xf32> to vector<256x128xbf16>
    %cst_23 = arith.constant dense<0.000000e+00> : vector<256x4xf32>
    %85 = tpu.matmul %84, %83, %cst_23 {dimension_numbers = #tpu.dot_dimension_numbers<[1], [1], [0], [0], [0, 0, 1, 0], [], []>} : vector<256x128xbf16>, vector<4x128xbf16>, vector<256x4xf32> -> vector<256x4xf32>
    %86 = arith.addf %26, %66 : vector<256x4xf32>
    %87 = arith.addf %45, %85 : vector<256x4xf32>
    %c0_24 = arith.constant 0 : index
    %c0_25 = arith.constant 0 : index
    %c0_26 = arith.constant 0 : index
    %88 = vector.load %arg13[%c0_24, %c0_25, %c0_26] : memref<1x256x4xf32, #tpu.memory_space<vmem>>, vector<1x256x4xf32>
    %89 = vector.shape_cast %86 : vector<256x4xf32> to vector<1x256x4xf32>
    %90 = arith.addf %88, %89 : vector<1x256x4xf32>
    %c0_27 = arith.constant 0 : index
    %c0_28 = arith.constant 0 : index
    %c0_29 = arith.constant 0 : index
    %91 = vector.load %arg13[%c0_27, %c0_28, %c0_29] : memref<1x256x4xf32, #tpu.memory_space<vmem>>, vector<1x256x4xf32>
    tpu.vector_store %arg13[%c0_27, %c0_28, %c0_29], %90 {strides = array<i32>} : memref<1x256x4xf32, #tpu.memory_space<vmem>>, vector<1x256x4xf32>,
    %c0_30 = arith.constant 0 : index
    %c0_31 = arith.constant 0 : index
    %c0_32 = arith.constant 0 : index
    %92 = vector.load %arg14[%c0_30, %c0_31, %c0_32] : memref<1x256x4xf32, #tpu.memory_space<vmem>>, vector<1x256x4xf32>
    %93 = vector.shape_cast %87 : vector<256x4xf32> to vector<1x256x4xf32>
    %94 = arith.addf %92, %93 : vector<1x256x4xf32>
    %c0_33 = arith.constant 0 : index
    %c0_34 = arith.constant 0 : index
    %c0_35 = arith.constant 0 : index
    %95 = vector.load %arg14[%c0_33, %c0_34, %c0_35] : memref<1x256x4xf32, #tpu.memory_space<vmem>>, vector<1x256x4xf32>
    tpu.vector_store %arg14[%c0_33, %c0_34, %c0_35], %94 {strides = array<i32>} : memref<1x256x4xf32, #tpu.memory_space<vmem>>, vector<1x256x4xf32>,
    return
  }
  func.func @transform_0(%arg0: i32, %arg1: i32) -> (i32, i32, i32) {
    %c0_i32 = arith.constant 0 : i32
    %c0_i32_0 = arith.constant 0 : i32
    %c0_i32_1 = arith.constant 0 : i32
    return %arg0, %c0_i32, %c0_i32_0 : i32, i32, i32
  }
  func.func @transform_1(%arg0: i32, %arg1: i32) -> (i32, i32, i32) {
    %c0_i32 = arith.constant 0 : i32
    %c0_i32_0 = arith.constant 0 : i32
    %c0_i32_1 = arith.constant 0 : i32
    return %arg0, %c0_i32, %c0_i32_0 : i32, i32, i32
  }
  func.func @transform_2(%arg0: i32, %arg1: i32) -> (i32, i32) {
    %c0_i32 = arith.constant 0 : i32
    %c0_i32_0 = arith.constant 0 : i32
    %c0_i32_1 = arith.constant 0 : i32
    return %c0_i32, %c0_i32_0 : i32, i32
  }
  func.func @transform_3(%arg0: i32, %arg1: i32) -> (i32, i32) {
    %c0_i32 = arith.constant 0 : i32
    %c0_i32_0 = arith.constant 0 : i32
    %c0_i32_1 = arith.constant 0 : i32
    return %c0_i32, %c0_i32_0 : i32, i32
  }
  func.func @transform_4(%arg0: i32, %arg1: i32) -> (i32, i32) {
    %c0_i32 = arith.constant 0 : i32
    %c0_i32_0 = arith.constant 0 : i32
    %c0_i32_1 = arith.constant 0 : i32
    return %c0_i32, %c0_i32_0 : i32, i32
  }
  func.func @transform_5(%arg0: i32, %arg1: i32) -> (i32, i32) {
    %c0_i32 = arith.constant 0 : i32
    %c0_i32_0 = arith.constant 0 : i32
    %c0_i32_1 = arith.constant 0 : i32
    return %c0_i32, %c0_i32_0 : i32, i32
  }
  func.func @transform_6(%arg0: i32, %arg1: i32) -> (i32, i32) {
    %c0_i32 = arith.constant 0 : i32
    %c0_i32_0 = arith.constant 0 : i32
    %c0_i32_1 = arith.constant 0 : i32
    return %c0_i32, %c0_i32_0 : i32, i32
  }
  func.func @transform_7(%arg0: i32, %arg1: i32) -> (i32, i32) {
    %c0_i32 = arith.constant 0 : i32
    %c0_i32_0 = arith.constant 0 : i32
    %c0_i32_1 = arith.constant 0 : i32
    return %c0_i32, %c0_i32_0 : i32, i32
  }
  func.func @transform_8(%arg0: i32, %arg1: i32) -> (i32, i32) {
    %c0_i32 = arith.constant 0 : i32
    %c0_i32_0 = arith.constant 0 : i32
    %c0_i32_1 = arith.constant 0 : i32
    return %c0_i32, %c0_i32_0 : i32, i32
  }
  func.func @transform_9(%arg0: i32, %arg1: i32) -> (i32, i32) {
    %c0_i32 = arith.constant 0 : i32
    %c0_i32_0 = arith.constant 0 : i32
    %c0_i32_1 = arith.constant 0 : i32
    return %c0_i32, %c0_i32_0 : i32, i32
  }
  func.func @transform_10(%arg0: i32, %arg1: i32) -> (i32, i32) {
    %c0_i32 = arith.constant 0 : i32
    %c0_i32_0 = arith.constant 0 : i32
    %c0_i32_1 = arith.constant 0 : i32
    return %c0_i32, %c0_i32_0 : i32, i32
  }
  func.func @transform_11(%arg0: i32, %arg1: i32) -> (i32, i32, i32) {
    %c0_i32 = arith.constant 0 : i32
    %c0_i32_0 = arith.constant 0 : i32
    %c0_i32_1 = arith.constant 0 : i32
    return %arg0, %c0_i32, %c0_i32_0 : i32, i32, i32
  }
  func.func @transform_12(%arg0: i32, %arg1: i32) -> (i32, i32, i32) {
    %c0_i32 = arith.constant 0 : i32
    %c0_i32_0 = arith.constant 0 : i32
    %c0_i32_1 = arith.constant 0 : i32
    return %arg0, %c0_i32, %c0_i32_0 : i32, i32, i32
  }
}

module attributes {stable_mosaic.version = 11 : i64} {
  func.func @_rtb_fuse_kernel(%arg0: i32, %arg1: i32, %arg2: memref<1x4x256xf32, #tpu.memory_space<vmem>>, %arg3: memref<1x4x256xf32, #tpu.memory_space<vmem>>, %arg4: memref<1x4x256xf32, #tpu.memory_space<vmem>>, %arg5: memref<1x4x256xf32, #tpu.memory_space<vmem>>, %arg6: memref<4x4xf32, #tpu.memory_space<vmem>>, %arg7: memref<4x1xf32, #tpu.memory_space<vmem>>, %arg8: memref<4x4xf32, #tpu.memory_space<vmem>>, %arg9: memref<4x4xf32, #tpu.memory_space<vmem>>, %arg10: memref<4x1xf32, #tpu.memory_space<vmem>>, %arg11: memref<1x4x256xf32, #tpu.memory_space<vmem>>) attributes {dimension_semantics = [#tpu.dimension_semantics<parallel>, #tpu.dimension_semantics<parallel>], iteration_bounds = array<i64: 2, 1>, scalar_prefetch = 0 : i64, scratch_operands = 0 : i64, tpu.core_type = #tpu.core_type<tc>, window_params = [{transform_indices = @transform_0, window_bounds = array<i64: 1, 4, 256>}, {transform_indices = @transform_1, window_bounds = array<i64: 1, 4, 256>}, {transform_indices = @transform_2, window_bounds = array<i64: 1, 4, 256>}, {transform_indices = @transform_3, window_bounds = array<i64: 1, 4, 256>}, {pipeline_mode = #tpu.pipeline_mode<synchronous>, transform_indices = @transform_4, window_bounds = array<i64: 4, 4>}, {pipeline_mode = #tpu.pipeline_mode<synchronous>, transform_indices = @transform_5, window_bounds = array<i64: 4, 1>}, {pipeline_mode = #tpu.pipeline_mode<synchronous>, transform_indices = @transform_6, window_bounds = array<i64: 4, 4>}, {pipeline_mode = #tpu.pipeline_mode<synchronous>, transform_indices = @transform_7, window_bounds = array<i64: 4, 4>}, {pipeline_mode = #tpu.pipeline_mode<synchronous>, transform_indices = @transform_8, window_bounds = array<i64: 4, 1>}, {transform_indices = @transform_9, window_bounds = array<i64: 1, 4, 256>}]} {
    %c0 = arith.constant 0 : index
    %c0_0 = arith.constant 0 : index
    %0 = vector.load %arg6[%c0, %c0_0] : memref<4x4xf32, #tpu.memory_space<vmem>>, vector<4x4xf32>
    %c0_1 = arith.constant 0 : index
    %c0_2 = arith.constant 0 : index
    %1 = vector.load %arg7[%c0_1, %c0_2] : memref<4x1xf32, #tpu.memory_space<vmem>>, vector<4x1xf32>
    %c0_3 = arith.constant 0 : index
    %c0_4 = arith.constant 0 : index
    %c0_5 = arith.constant 0 : index
    %2 = vector.load %arg2[%c0_3, %c0_4, %c0_5] : memref<1x4x256xf32, #tpu.memory_space<vmem>>, vector<1x4x256xf32>
    %3 = vector.shape_cast %2 : vector<1x4x256xf32> to vector<4x256xf32>
    %cst = arith.constant dense<0.000000e+00> : vector<4x256xf32>
    %4 = tpu.matmul %0, %3, %cst {dimension_numbers = #tpu.dot_dimension_numbers<[1], [0], [0], [1], [0, 0, 1, 1], [], []>} : vector<4x4xf32>, vector<4x256xf32>, vector<4x256xf32> -> vector<4x256xf32>
    %5 = vector.broadcast %1 : vector<4x1xf32> to vector<4x256xf32>
    %6 = arith.addf %4, %5 : vector<4x256xf32>
    %c0_6 = arith.constant 0 : index
    %c0_7 = arith.constant 0 : index
    %c0_8 = arith.constant 0 : index
    %7 = vector.load %arg4[%c0_6, %c0_7, %c0_8] : memref<1x4x256xf32, #tpu.memory_space<vmem>>, vector<1x4x256xf32>
    %8 = vector.shape_cast %7 : vector<1x4x256xf32> to vector<4x256xf32>
    %9 = arith.addf %6, %8 : vector<4x256xf32>
    %c0_9 = arith.constant 0 : index
    %c0_10 = arith.constant 0 : index
    %c0_11 = arith.constant 0 : index
    %10 = vector.load %arg3[%c0_9, %c0_10, %c0_11] : memref<1x4x256xf32, #tpu.memory_space<vmem>>, vector<1x4x256xf32>
    %11 = vector.shape_cast %10 : vector<1x4x256xf32> to vector<4x256xf32>
    %cst_12 = arith.constant dense<0.000000e+00> : vector<4x256xf32>
    %12 = tpu.matmul %0, %11, %cst_12 {dimension_numbers = #tpu.dot_dimension_numbers<[1], [0], [0], [1], [0, 0, 1, 1], [], []>} : vector<4x4xf32>, vector<4x256xf32>, vector<4x256xf32> -> vector<4x256xf32>
    %13 = vector.broadcast %1 : vector<4x1xf32> to vector<4x256xf32>
    %14 = arith.addf %12, %13 : vector<4x256xf32>
    %c0_13 = arith.constant 0 : index
    %c0_14 = arith.constant 0 : index
    %c0_15 = arith.constant 0 : index
    %15 = vector.load %arg5[%c0_13, %c0_14, %c0_15] : memref<1x4x256xf32, #tpu.memory_space<vmem>>, vector<1x4x256xf32>
    %16 = vector.shape_cast %15 : vector<1x4x256xf32> to vector<4x256xf32>
    %17 = arith.addf %14, %16 : vector<4x256xf32>
    %c0_16 = arith.constant 0 : index
    %c0_17 = arith.constant 0 : index
    %18 = vector.load %arg8[%c0_16, %c0_17] : memref<4x4xf32, #tpu.memory_space<vmem>>, vector<4x4xf32>
    %cst_18 = arith.constant dense<0.000000e+00> : vector<4x256xf32>
    %19 = tpu.matmul %18, %9, %cst_18 {dimension_numbers = #tpu.dot_dimension_numbers<[1], [0], [0], [1], [0, 0, 1, 1], [], []>} : vector<4x4xf32>, vector<4x256xf32>, vector<4x256xf32> -> vector<4x256xf32>
    %c0_19 = arith.constant 0 : index
    %c0_20 = arith.constant 0 : index
    %20 = vector.load %arg9[%c0_19, %c0_20] : memref<4x4xf32, #tpu.memory_space<vmem>>, vector<4x4xf32>
    %cst_21 = arith.constant dense<0.000000e+00> : vector<4x256xf32>
    %21 = tpu.matmul %20, %17, %cst_21 {dimension_numbers = #tpu.dot_dimension_numbers<[1], [0], [0], [1], [0, 0, 1, 1], [], []>} : vector<4x4xf32>, vector<4x256xf32>, vector<4x256xf32> -> vector<4x256xf32>
    %22 = arith.addf %19, %21 : vector<4x256xf32>
    %c0_22 = arith.constant 0 : index
    %c0_23 = arith.constant 0 : index
    %23 = vector.load %arg10[%c0_22, %c0_23] : memref<4x1xf32, #tpu.memory_space<vmem>>, vector<4x1xf32>
    %24 = vector.broadcast %23 : vector<4x1xf32> to vector<4x256xf32>
    %25 = arith.addf %22, %24 : vector<4x256xf32>
    %26 = vector.shape_cast %25 : vector<4x256xf32> to vector<1x4x256xf32>
    %c0_24 = arith.constant 0 : index
    %c0_25 = arith.constant 0 : index
    %c0_26 = arith.constant 0 : index
    %27 = vector.load %arg11[%c0_24, %c0_25, %c0_26] : memref<1x4x256xf32, #tpu.memory_space<vmem>>, vector<1x4x256xf32>
    tpu.vector_store %arg11[%c0_24, %c0_25, %c0_26], %26 {strides = array<i32>} : memref<1x4x256xf32, #tpu.memory_space<vmem>>, vector<1x4x256xf32>,
    return
  }
  func.func @transform_0(%arg0: i32, %arg1: i32) -> (i32, i32, i32) {
    %c0_i32 = arith.constant 0 : i32
    %c0_i32_0 = arith.constant 0 : i32
    return %arg0, %c0_i32, %arg1 : i32, i32, i32
  }
  func.func @transform_1(%arg0: i32, %arg1: i32) -> (i32, i32, i32) {
    %c0_i32 = arith.constant 0 : i32
    %c0_i32_0 = arith.constant 0 : i32
    return %arg0, %c0_i32, %arg1 : i32, i32, i32
  }
  func.func @transform_2(%arg0: i32, %arg1: i32) -> (i32, i32, i32) {
    %c0_i32 = arith.constant 0 : i32
    %c0_i32_0 = arith.constant 0 : i32
    return %arg0, %c0_i32, %arg1 : i32, i32, i32
  }
  func.func @transform_3(%arg0: i32, %arg1: i32) -> (i32, i32, i32) {
    %c0_i32 = arith.constant 0 : i32
    %c0_i32_0 = arith.constant 0 : i32
    return %arg0, %c0_i32, %arg1 : i32, i32, i32
  }
  func.func @transform_4(%arg0: i32, %arg1: i32) -> (i32, i32) {
    %c0_i32 = arith.constant 0 : i32
    %c0_i32_0 = arith.constant 0 : i32
    %c0_i32_1 = arith.constant 0 : i32
    return %c0_i32, %c0_i32_0 : i32, i32
  }
  func.func @transform_5(%arg0: i32, %arg1: i32) -> (i32, i32) {
    %c0_i32 = arith.constant 0 : i32
    %c0_i32_0 = arith.constant 0 : i32
    %c0_i32_1 = arith.constant 0 : i32
    return %c0_i32, %c0_i32_0 : i32, i32
  }
  func.func @transform_6(%arg0: i32, %arg1: i32) -> (i32, i32) {
    %c0_i32 = arith.constant 0 : i32
    %c0_i32_0 = arith.constant 0 : i32
    %c0_i32_1 = arith.constant 0 : i32
    return %c0_i32, %c0_i32_0 : i32, i32
  }
  func.func @transform_7(%arg0: i32, %arg1: i32) -> (i32, i32) {
    %c0_i32 = arith.constant 0 : i32
    %c0_i32_0 = arith.constant 0 : i32
    %c0_i32_1 = arith.constant 0 : i32
    return %c0_i32, %c0_i32_0 : i32, i32
  }
  func.func @transform_8(%arg0: i32, %arg1: i32) -> (i32, i32) {
    %c0_i32 = arith.constant 0 : i32
    %c0_i32_0 = arith.constant 0 : i32
    %c0_i32_1 = arith.constant 0 : i32
    return %c0_i32, %c0_i32_0 : i32, i32
  }
  func.func @transform_9(%arg0: i32, %arg1: i32) -> (i32, i32, i32) {
    %c0_i32 = arith.constant 0 : i32
    %c0_i32_0 = arith.constant 0 : i32
    return %arg0, %c0_i32, %arg1 : i32, i32, i32
  }
}

</mosaic_0001>

<bundles_post_ra>
// kernel: rtb_forward.3
= control target key start
LH: loop header
LB: loop body
LE: loop exit
PB: predicated region body
PF: predicated region fallthrough
CT: control target
= control target key end

     0   :  { %s1119_s30 = smov 0   ;;  %s1121_s10 = smov 0   ;;  %s1195_s0 = inlined_call_operand.vmem [shape: f32[2,4,256], index: 0, kind: input, shape index: {}]   ;;  %s1196_s1 = inlined_call_operand.vmem [shape: f32[2,4,256], index: 1, kind: input, shape index: {}]   ;;  %s1197_s2 = inlined_call_operand.vmem [shape: f32[2,4,256], index: 2, kind: input, shape index: {}]   ;;  %s1198_s3 = inlined_call_operand.vmem [shape: f32[2,4,256], index: 3, kind: input, shape index: {}]   ;;  %s1199_s4 = inlined_call_operand.vmem [shape: f32[4,4], index: 4, kind: input, shape index: {}]   ;;  %s1200_s5 = inlined_call_operand.vmem [shape: f32[4,1], index: 5, kind: input, shape index: {}]   ;;  %s1201_s6 = inlined_call_operand.vmem [shape: f32[4,4], index: 6, kind: input, shape index: {}]   ;;  %s1202_s7 = inlined_call_operand.vmem [shape: f32[4,4], index: 7, kind: input, shape index: {}]   ;;  %s1203_s8 = inlined_call_operand.vmem [shape: f32[4,1], index: 8, kind: input, shape index: {}]   ;;  %s1204_s9 = inlined_call_operand.vmem [shape: f32[2,4,256], index: 9, kind: output, shape index: {}]  }
   0x1   :  { %s1123_s11 = smov 0  }
   0x2 LB: > { %s31_s12 = sadd.s32 1, %s1061_s10  ;;  %p980_p0 = scmp.ge.s32.totalorder %s1065_s11, 1  ;;  %s1065_s11 = sphi %s1123_s11, %s19_s11   ;;  %s1061_s10 = sphi %s1121_s10, %s1206_s10   ;;  %s1057_s30 = sphi %s1119_s30, %s1205_s30  }
   0x3   : > { %p33_p1 = scmp.ge.s32.totalorder %s31_s12, 2  ;;  %p359_p2 = scmp.lt.s32.totalorder %s1065_s11, 3 }
   0x5   : > { %s1208_s12 = smov (%p33_p1, %s31_s12), 0  ;;  %p360_p3 = pnand %p980_p0, %p359_p2 }
   0x6   : > { %p431_p4 = scmp.lt.s32.totalorder (!%p360_p3), %s1057_s30, 1  ;;  %v1067_v0 = vmov (!%p360_p3), 0.0   ;;  %v481_v1 = vld [vmem:[%s1200_s5] sm:$0xf] (!%p360_p3)  ;;  %v1068_v2 = vmov (!%p360_p3), 0   ;;  %vm494_vm0 = vcmask (!%p360_p3), 1043456  }
   0x7   : > { %363 = sbr.rel (%p360_p3) target bundleno = 471 (0x1d7), region = 56  ;;  %563 = vmatprep.mubr.f32.mxu1 (!%p360_p3), %v1067_v0  ;;  %735 = vmatprep.mubr.f32.mxu0 (!%p360_p3), %v1067_v0  ;;  %v822_v3 = vld [vmem:[%s1203_s8] sm:$0xf] (!%p360_p3)  ;;  %vm490_vm1 = vcmask (!%p360_p3), 31744  }
   0x8   : > { %1038 = vset.pattern.permute.xlu0 (!%p360_p3), %v1068_v2  ;;  %v480_v8 = vld [vmem:[%s1199_s4] sm:$0xf] (!%p360_p3) }
   0x9   : > { %485 = vperm.xlu0 (!%p360_p3), %1038, %v481_v1   ;;  %v661_v24 = vld [vmem:[%s1202_s7] sm:$0xf] (!%p360_p3) }
   0xa   : > { %v660_v27 = vld [vmem:[%s1201_s6] sm:$0xf] (!%p360_p3) }
   0xd   : > { %825 = vperm.xlu0 (!%p360_p3), %1038, %v822_v3  }
   0xe   : > { %s1210_s30 = smov (!%p431_p4, %s1057_s30), 1 }
   0xf   : > { %s1140_s15 = sshll.u32 %s1210_s30, 3 }
  0x10   : > { %s438_s20 = scalar_lea.vmem %s1195_s0, %s1140_s15  ;;  %s448_s23 = scalar_lea.vmem %s1196_s1, %s1140_s15 }
  0x11   : > { %v482_v4 = vld [vmem:[%s438_s20] sm:$0xff]  ;;  %s468_s28 = scalar_lea.vmem %s1198_s3, %s1140_s15  ;;  %s458_s13 = scalar_lea.vmem %s1197_s2, %s1140_s15 }
  0x12   : > { %v576_v5 = vld [vmem:[%s448_s23] sm:$0xff]  ;;  %v489_v6 = vcombine.high %v482_v4, %v482_v4  ;;  %s478_s21 = scalar_lea.vmem %s1204_s9, %s1140_s15 }
  0x13   : > { %v578_v7 = vcombine.high %v576_v5, %v576_v5  ;;  %v654_v11 = vld [vmem:[%s468_s28] sm:$0xff] }
  0x14   : > { %991 = vmatprep.subr.msk.mxu1 %vm494_vm0, %v489_v6  ;;  %v570_v13 = vld [vmem:[%s458_s13] sm:$0xff]  ;;  %v656_v15 = vcombine.high %v654_v11, %v654_v11 }
  0x15   : > { %992 = vmatpush1.msk.msra.mxu1 %vm494_vm0, %v482_v4  ;;  %v572_v19 = vcombine.high %v570_v13, %v570_v13 }
  0x16   : > { %993 = vmatmul.mubr.msk.f32.vlgmr.msra.gmra.mrb[0].mxu1 %vm490_vm1, %v480_v8  ;;  %994 = vmatprep.subr.msk.mxu1 %vm494_vm0, %v578_v7 }
  0x17   : > { %995 = vmatpush1.msk.msra.mxu1 %vm494_vm0, %v576_v5  ;;  %647 = vmatprep.mubr.f32.mxu1 %v1067_v0 }
  0x1a   : > { %996 = vmatmul.mubr.msk.f32.vlgmr.msra.gmra.mrb[2].mxu1 %vm490_vm1, %v480_v8 }
  0x88   : > { %v486_v12 = vpop.permute.xlu0 %485 }
  0x8c   : > { %v826_v28 = vpop.permute.xlu0 %825 }
  0xe9   : > { %v565_v9 = vpop.f32.mrb[0].mxu1 }
  0xea   : > { %v567_v10 = vpop.f32.mrb[1].mxu1  ;;  %v566_v21 = vadd.f32 %v565_v9, %v486_v12 }
  0xeb   : > { %v568_v18 = vadd.f32 %v567_v10, %v486_v12 }
  0xec   : > { %v574_v26 = vadd.f32 %v570_v13, %v566_v21 }
  0xed   : > { %v649_v14 = vpop.f32.mrb[2].mxu1  ;;  %v575_v25 = vadd.f32 %v572_v19, %v568_v18 }
  0xee   : > { %v650_v16 = vadd.f32 %v649_v14, %v486_v12  ;;  %v651_v17 = vpop.f32.mrb[3].mxu1 }
  0xef   : > { %v652_v20 = vadd.f32 %v651_v17, %v486_v12 }
  0xf0   : > { %v658_v23 = vadd.f32 %v654_v11, %v650_v16 }
  0xf1   : > { %v659_v22 = vadd.f32 %v656_v15, %v652_v20 }
  0xf3   : > { %997 = vmatprep.subr.msk.mxu0 %vm494_vm0, %v659_v22 }
  0xf4   : > { %998 = vmatpush1.msk.msra.mxu0 %vm494_vm0, %v658_v23 }
  0xf5   : > { %999 = vmatmul.mubr.msk.f32.vlgmr.msra.gmra.mrb[0].mxu0 %vm490_vm1, %v661_v24  ;;  %1000 = vmatprep.subr.msk.mxu0 %vm494_vm0, %v575_v25 }
  0xf6   : > { %1001 = vmatpush1.msk.msra.mxu0 %vm494_vm0, %v574_v26  ;;  %815 = vmatprep.mubr.f32.mxu0 %v1067_v0 }
  0xfd   : > { %1002 = vmatmul.mubr.msk.f32.vlgmr.msra.gmra.mrb[0].mxu0 %vm490_vm1, %v660_v27 }
 0x1d0   : > { %v817_v29 = vpop.f32.mrb[0].mxu0 }
 0x1d1   : > { %v828_v30 = vadd.f32 %v826_v28, %v817_v29  ;;  %v819_v31 = vpop.f32.mrb[1].mxu0 }
 0x1d2   : > { %v829_v32 = vadd.f32 %v826_v28, %v819_v31 }
 0x1d4   : > { %v832_v33 = vcombine.low %v828_v30, %v829_v32 }
 0x1d6   : > { %834 = vst [vmem:[%s478_s21] sm:$0xff] %v832_v33 }
 0x1d7 PF: > { %s19_s11 = sadd.s32 1, %s1065_s11   ;;  %s1205_s30 = smov %s1061_s10 }
 0x1d8   : > { %p16_p5 = scmp.ge.s32.totalorder %s19_s11, 4   ;;  %s1206_s10 = smov %s1208_s12 }
 0x1da   :  { %18 = sbr.rel (!%p16_p5) target bundleno = 2 (0x2), region = 95 }

// kernel: rtb_forward.2
= control target key start
LH: loop header
LB: loop body
LE: loop exit
PB: predicated region body
PF: predicated region fallthrough
CT: control target
= control target key end

     0   :  { %s5456_s21 = smov 0   ;;  %s5458_s22 = smov 0   ;;  %s8253_s0 = inlined_call_operand.vmem [shape: f32[2,4,256], index: 0, kind: input, shape index: {}]   ;;  %s8254_s1 = inlined_call_operand.vmem [shape: f32[2,4,256], index: 1, kind: input, shape index: {}]   ;;  %s8255_s2 = inlined_call_operand.vmem [shape: f32[9,256], index: 2, kind: input, shape index: {}]   ;;  %s8256_s3 = inlined_call_operand.vmem [shape: bf16[8,36], index: 3, kind: input, shape index: {}]   ;;  %s8257_s4 = inlined_call_operand.vmem [shape: f32[8,1], index: 4, kind: input, shape index: {}]   ;;  %s8258_s5 = inlined_call_operand.vmem [shape: bf16[8,36], index: 5, kind: input, shape index: {}]   ;;  %s8259_s6 = inlined_call_operand.vmem [shape: f32[8,1], index: 6, kind: input, shape index: {}]   ;;  %s8260_s7 = inlined_call_operand.vmem [shape: f32[36,4], index: 7, kind: input, shape index: {}]   ;;  %s8261_s8 = inlined_call_operand.vmem [shape: f32[1,4], index: 8, kind: input, shape index: {}]   ;;  %s8262_s9 = inlined_call_operand.vmem [shape: f32[36,4], index: 9, kind: input, shape index: {}]   ;;  %s8263_s10 = inlined_call_operand.vmem [shape: f32[1,4], index: 10, kind: input, shape index: {}]   ;;  %s8264_s11 = inlined_call_operand.vmem [shape: f32[2,256,4], index: 11, kind: output, shape index: {0}]   ;;  %s8265_s12 = inlined_call_operand.vmem [shape: f32[2,256,4], index: 12, kind: output, shape index: {1}]  }
   0x1   :  { %s5460_s23 = smov 0  }
   0x2 LB: > { %s35_s24 = sadd.s32 1, %s5375_s22  ;;  %p4210_p0 = scmp.ge.s32.totalorder %s5379_s23, 1  ;;  %s5379_s23 = sphi %s5460_s23, %s23_s23   ;;  %s5375_s22 = sphi %s5458_s22, %s8859_s22   ;;  %s5371_s21 = sphi %s5456_s21, %s8858_s21  }
   0x3   : > { %p37_p1 = scmp.ge.s32.totalorder %s35_s24, 2  ;;  %p387_p2 = scmp.lt.s32.totalorder %s5379_s23, 3 }
   0x5   : > { %s8861_s24 = smov (%p37_p1, %s35_s24), 0  ;;  %p388_p3 = pnand %p4210_p0, %p387_p2 }
   0x7   : > { %391 = sbr.rel (%p388_p3) target bundleno = 1510 (0x5e6), region = 64 }
   0xe   : > { %p439_p4 = scmp.lt.s32.totalorder %s5371_s21, 1  ;;  %s5381_s29 = smov 17   ;;  %v493_v2 = vlaneseq  ;;  %v5519_v9 = vld [vmem:[%s8255_s2] sm:$0xff]  ;;  %v5524_v10 = vld [vmem:[%s8255_s2 + $0x8] sm:$0xff]  ;;  %vm667_vm4 = vcmask 1043456   ;;  %v5389_v50 = vmov 0  }
   0xf   : > { %s5382_s30 = smov 16   ;;  %s5383_s13 = smov 1   ;;  %839 = vmatprep.mubr.bf16.mxu0 %v5389_v50  ;;  %903 = vmatprep.mubr.bf16.mxu1 %v5389_v50  ;;  %vm800_vm9 = vcmask 1041408   ;;  %vm796_vm10 = vcmask 293888   ;;  %vm1331_vm11 = vcmask 31744  }
  0x10   : > { %s8863_s21 = smov (!%p439_p4, %s5371_s21), 1  ;;  %s5384_s14 = smov 15   ;;  %v5510_v3 = vshrl.u32 %v493_v2, 7  ;;  %v5513_v7 = vand.u32 127, %v493_v2 }
  0x11   : > { %s4363_s25 = sshll.u32 %s8863_s21, 3  ;;  %s5385_s15 = smov 127  }
  0x12   : > { %s443_s28 = scalar_lea.vmem %s8253_s0, %s4363_s25  ;;  %s5386_s16 = smov 112   ;;  %v561_v4 = vsub.s32 4, %v5510_v3  ;;  %v500_v8 = vsub.s32 0, %v5510_v3  ;;  %v551_v11 = vsub.s32 3, %v5510_v3  ;;  %v517_v12 = vsub.s32 1, %v5510_v3 }
  0x13   : > { %v5482_v0 = vld [vmem:[%s443_s28] sm:$0xff]  ;;  %s8268_s17 = smov 113   ;;  %s8266_s18 = smov 111   ;;  %v534_v13 = vsub.s32 2, %v5510_v3  ;;  %vm495_vm0 = vcmp.lt.s32.totalorder %v5513_v7, 17  ;;  %vm546_vm1 = vcmp.lt.s32.totalorder %v5513_v7, 1 }
  0x14   : > { %489 = vrot.lane.b32.xlu1 %v5482_v0, %s5381_s29  ;;  %508 = vrot.lane.b32.xlu0 %v5482_v0, %s5382_s30  ;;  %v487_v1 = vcombine.high %v5482_v0, %v5482_v0  ;;  %v562_v14 = vrot.slane %v5519_v9, %v561_v4  ;;  %v566_v15 = vrot.slane %v5524_v10, %v561_v4  ;;  %v581_v18 = vsub.s32 5, %v5510_v3  ;;  %s448_s19 = scalar_lea.vmem %s8254_s1, %s4363_s25  ;;  %s8440_s25 = smov 113  }
  0x15   : > { %v5535_v19 = vrot.slane %v5519_v9, %v500_v8  ;;  %v5538_v20 = vrot.slane %v5524_v10, %v500_v8  ;;  %vm512_vm2 = vcmp.lt.s32.totalorder %v5513_v7, 16  ;;  %vm529_vm3 = vcmp.lt.s32.totalorder %v5513_v7, 15 }
  0x16   : > { %v5543_v21 = vrot.slane %v5519_v9, %v551_v11  ;;  %v5546_v22 = vrot.slane %v5524_v10, %v551_v11  ;;  %v5549_v23 = vrot.slane %v5519_v9, %v517_v12  ;;  %v5552_v24 = vrot.slane %v5524_v10, %v517_v12 }
  0x17   : > { %v5555_v25 = vrot.slane %v5519_v9, %v534_v13  ;;  %v5558_v26 = vrot.slane %v5524_v10, %v534_v13  ;;  %v5560_v27 = vcombine.low %v562_v14, %v566_v15  ;;  %vm576_vm5 = vcmp.lt.s32.totalorder %v5513_v7, 127 }
  0x18   : > { %542 = vrot.lane.b32.xlu0 %v5482_v0, %s5383_s13  ;;  %491 = vrot.lane.b32.xlu1 %v487_v1, %s5381_s29  ;;  %v5568_v32 = vrot.slane %v5519_v9, %v581_v18  ;;  %v5583_v41 = vrot.slane %v5524_v10, %v581_v18  ;;  %v615_v42 = vsub.s32 7, %v5510_v3  ;;  %vm610_vm6 = vcmp.lt.s32.totalorder %v5513_v7, 112 }
  0x19   : > { %v571_v43 = vmul.f32 %v5560_v27, %v5482_v0  ;;  %vm593_vm7 = vcmp.lt.s32.totalorder %v5513_v7, 113  ;;  %vm627_vm8 = vcmp.lt.s32.totalorder %v5513_v7, 111 }
  0x1a   : > { %v5604_v63 = vrot.slane %v5519_v9, %v615_v42  ;;  %v5614_v11 = vrot.slane %v5524_v10, %v615_v42 }
  0x1b   : > { %v653_v12 = vcombine.high %v571_v43, %v571_v43 }
  0x1c   : > { %544 = vrot.lane.b32.xlu1 %v487_v1, %s5383_s13  ;;  %510 = vrot.lane.b32.xlu0 %v487_v1, %s5382_s30 }
  0x20   : > { %527 = vrot.lane.b32.xlu1 %v487_v1, %s5384_s14  ;;  %525 = vrot.lane.b32.xlu0 %v5482_v0, %s5384_s14 }
  0x24   : > { %574 = vrot.lane.b32.xlu1 %v487_v1, %s5385_s15  ;;  %572 = vrot.lane.b32.xlu0 %v5482_v0, %s5385_s15 }
  0x28   : > { %608 = vrot.lane.b32.xlu1 %v487_v1, %s5386_s16  ;;  %606 = vrot.lane.b32.xlu0 %v5482_v0, %s5386_s16 }
  0x2c   : > { %591 = vrot.lane.b32.xlu1 %v487_v1, %s8268_s17  ;;  %589 = vrot.lane.b32.xlu0 %v5482_v0, %s8268_s17 }
  0x30   : > { %625 = vrot.lane.b32.xlu1 %v487_v1, %s8266_s18  ;;  %623 = vrot.lane.b32.xlu0 %v5482_v0, %s8266_s18  ;;  %v598_v0 = vsub.s32 6, %v5510_v3 }
  0x32   : > { %v5622_v18 = vrot.slane %v5519_v9, %v598_v0 }
  0x86   : > { %v490_v5 = vpop.permute.xlu1 %489  ;;  %v509_v6 = vpop.permute.xlu0 %508 }
  0x8a   : > { %v543_v16 = vpop.permute.xlu0 %542  ;;  %v492_v17 = vpop.permute.xlu1 %491 }
  0x8b   : > { %v496_v28 = vsel %vm495_vm0, %v490_v5, %v492_v17  ;;  %v497_v29 = vsel %vm495_vm0, %v492_v17, %v490_v5 }
  0x8c   : > { %v506_v44 = vmul.f32 %v5535_v19, %v497_v29  ;;  %v507_v45 = vmul.f32 %v5538_v20, %v496_v28  ;;  %v5625_v28 = vrot.slane %v5524_v10, %v598_v0 }
  0x8e   : > { %v545_v30 = vpop.permute.xlu1 %544  ;;  %v511_v31 = vpop.permute.xlu0 %510 }
  0x8f   : > { %v547_v33 = vsel %vm546_vm1, %v543_v16, %v545_v30  ;;  %v548_v34 = vsel %vm546_vm1, %v545_v30, %v543_v16  ;;  %v513_v35 = vsel %vm512_vm2, %v509_v6, %v511_v31  ;;  %v514_v36 = vsel %vm512_vm2, %v511_v31, %v509_v6 }
  0x90   : > { %v557_v37 = vmul.f32 %v5543_v21, %v548_v34  ;;  %v558_v38 = vmul.f32 %v5546_v22, %v547_v33  ;;  %v523_v39 = vmul.f32 %v5549_v23, %v514_v36  ;;  %v524_v40 = vmul.f32 %v5552_v24, %v513_v35 }
  0x92   : > { %v642_v46 = vrot.slane %v523_v39, 4  ;;  %v643_v47 = vrot.slane %v524_v40, 4  ;;  %v528_v48 = vpop.permute.xlu1 %527  ;;  %v526_v49 = vpop.permute.xlu0 %525  ;;  %v648_v51 = vrot.slane %v557_v37, 4  ;;  %v649_v52 = vrot.slane %v558_v38, 4  ;;  %v5641_v40 = vld [vmem:[%s8255_s2 + $0x10] ss:$0 sm:$0xff] }
  0x93   : > { %v530_v53 = vsel %vm529_vm3, %v526_v49, %v528_v48  ;;  %v531_v54 = vsel %vm529_vm3, %v528_v48, %v526_v49 }
  0x94   : > { %v540_v55 = vmul.f32 %v5555_v25, %v531_v54  ;;  %v541_v56 = vmul.f32 %v5558_v26, %v530_v53  ;;  %v668_v57 = vsel %vm667_vm4, %v506_v44, %v642_v46  ;;  %v669_v58 = vsel %vm667_vm4, %v507_v45, %v643_v47  ;;  %v5648_v45 = vld [vmem:[%s8255_s2 + $0x18] ss:$0 sm:$0xff]  ;;  %v472_v53 = vld [vmem:[%s8260_s7] sm:$0xff]  ;;  %v473_v54 = vld [vmem:[%s8260_s7 + $0x8] sm:$0xff] }
  0x95   : > { %927 = vxpose.xlu0.b32.start [1/5] (short) %v668_v57, 128  ;;  %959 = vxpose.xlu1.b32.start [1/5] (short) %v669_v58, 128 }
  0x96   : > { %v575_v59 = vpop.permute.xlu1 %574  ;;  %v573_v60 = vpop.permute.xlu0 %572  ;;  %v670_v61 = vsel %vm667_vm4, %v540_v55, %v648_v51  ;;  %v671_v62 = vsel %vm667_vm4, %v541_v56, %v649_v52 }
  0x97   : > { %v577_v1 = vsel %vm576_vm5, %v573_v60, %v575_v59  ;;  %v578_v2 = vsel %vm576_vm5, %v575_v59, %v573_v60  ;;  %v780_v4 = vpack.c.bf16 %v671_v62, %v669_v58  ;;  %v779_v5 = vpack.c.bf16 %v670_v61, %v668_v57  ;;  %v474_v60 = vld [vmem:[%s8260_s7 + $0x10] sm:$0xff] }
  0x98   : > { %v587_v6 = vmul.f32 %v5568_v32, %v577_v1  ;;  %v588_v8 = vmul.f32 %v5583_v41, %v578_v2  ;;  %v4967_v58 = vpack.c.bf16 %v473_v54, %v472_v53  ;;  %v476_v1 = vld [vmem:[%s8260_s7 + $0x20] sm:$0xf] }
  0x99   : > { %928 = vxpose.xlu0.b32.cont [2/5] (short) %v670_v61, 128  ;;  %960 = vxpose.xlu1.b32.cont [2/5] (short) %v671_v62, 128  ;;  %v475_v61 = vld [vmem:[%s8260_s7 + $0x18] sm:$0xff]  ;;  %v470_v62 = vld [vmem:[%s8256_s3] sm:$0xf] }
  0x9a   : > { %v657_v13 = vrot.slane %v587_v6, 4  ;;  %v658_v3 = vrot.slane %v588_v8, 4  ;;  %807 = vmatprep.subr.bf16.mxu0 %v780_v4  ;;  %v609_v14 = vpop.permute.xlu1 %608  ;;  %v607_v15 = vpop.permute.xlu0 %606  ;;  %v4971_v0 = vpack.c.bf16 %v475_v61, %v474_v60  ;;  %v5686_v2 = vld [vmem:[%s448_s19] sm:$0xff] }
  0x9b   : > { %808 = vmatpush1.bf16.msra.mxu0 %v779_v5  ;;  %v611_v16 = vsel %vm610_vm6, %v607_v15, %v609_v14  ;;  %v612_v17 = vsel %vm610_vm6, %v609_v14, %v607_v15  ;;  %v477_v4 = vld [vmem:[%s8262_s9] sm:$0xff]  ;;  %v478_v5 = vld [vmem:[%s8262_s9 + $0x8] sm:$0xff]  ;;  %v677_v6 = vcombine.high %v5686_v2, %v5686_v2 }
  0x9c   : > { %v621_v29 = vmul.f32 %v5604_v63, %v611_v16  ;;  %v622_v30 = vmul.f32 %v5614_v11, %v612_v17  ;;  %v673_v31 = vsel %vm667_vm4, %v653_v12, %v658_v3  ;;  %v672_v33 = vsel %vm667_vm4, %v571_v43, %v657_v13  ;;  %v479_v13 = vld [vmem:[%s8262_s9 + $0x10] sm:$0xff]  ;;  %v480_v3 = vld [vmem:[%s8262_s9 + $0x18] sm:$0xff]  ;;  %v482_v14 = vld [vmem:[%s8257_s4] sm:$0xff] }
  0x9d   : > { %961 = vxpose.xlu1.b32.cont [3/5] (short) %v673_v31, 128  ;;  %929 = vxpose.xlu0.b32.cont [3/5] (short) %v672_v33, 128  ;;  %v4975_v8 = vpack.c.bf16 %v478_v5, %v477_v4  ;;  %v4979_v15 = vpack.c.bf16 %v480_v3, %v479_v13 }
  0x9e   : > { %v592_v34 = vpop.permute.xlu1 %591  ;;  %v590_v35 = vpop.permute.xlu0 %589  ;;  %v663_v10 = vrot.slane %v621_v29, 4  ;;  %v664_v37 = vrot.slane %v622_v30, 4 }
  0x9f   : > { %v594_v36 = vsel %vm593_vm7, %v590_v35, %v592_v34  ;;  %v595_v9 = vsel %vm593_vm7, %v592_v34, %v590_v35 }
  0xa0   : > { %v604_v38 = vmul.f32 %v5622_v18, %v594_v36  ;;  %v605_v39 = vmul.f32 %v5625_v28, %v595_v9 }
  0xa2   : > { %v626_v42 = vpop.permute.xlu1 %625  ;;  %v675_v43 = vsel %vm667_vm4, %v605_v39, %v664_v37  ;;  %v674_v44 = vsel %vm667_vm4, %v604_v38, %v663_v10  ;;  %v624_v46 = vpop.permute.xlu0 %623 }
  0xa3   : > { %962 = vxpose.xlu1.b32.cont [4/5] (short) %v675_v43, 128  ;;  %v782_v47 = vpack.c.bf16 %v675_v43, %v673_v31  ;;  %930 = vxpose.xlu0.b32.cont [4/5] (short) %v674_v44, 128  ;;  %v781_v48 = vpack.c.bf16 %v674_v44, %v672_v33  ;;  %v628_v49 = vsel %vm627_vm8, %v624_v46, %v626_v42  ;;  %v481_v31 = vld [vmem:[%s8262_s9 + $0x20] sm:$0xf] }
  0xa4   : > { %v629_v51 = vsel %vm627_vm8, %v626_v42, %v624_v46  ;;  %v638_v52 = vmul.f32 %v5641_v40, %v628_v49  ;;  %v483_v43 = vld [vmem:[%s8259_s6] sm:$0xff] }
  0xa5   : > { %v639_v55 = vmul.f32 %v5648_v45, %v629_v51  ;;  %809 = vmatprep.subr.bf16.mxu0 %v782_v47 }
  0xa6   : > { %810 = vmatpush1.bf16.msra.mxu0 %v781_v48  ;;  %v783_v56 = vpack.c.bf16 %v638_v52, %v638_v52 }
  0xa7   : > { %v784_v57 = vpack.c.bf16 %v639_v55, %v639_v55  ;;  %963 = vxpose.xlu1.b32.end [5/5] (short) %v639_v55, 128  ;;  %931 = vxpose.xlu0.b32.end [5/5] (short) %v638_v52, 128 }
  0xa8   : > { %v802_v59 = vsel %vm800_vm9, %v783_v56, 0 }
  0xa9   : > { %4221 = vmatprep.subr.msk.bf16.mxu0 %vm800_vm9, %v784_v57 }
  0xaa   : > { %812 = vmatpush1.bf16.msra.mxu0 %v802_v59 }
  0xab   : > { %4968 = vmatprep.subr.bf16.mxu0 %v4967_v58 }
  0xad   : > { %4222 = vmatmul.mubr.msk.bf16.vlgmr.msra.gmra.mrb[0].mxu0 %vm796_vm10, %v470_v62 }
  0xae   : > { %4970 = vmatpush3.bf16.msra.mxu0 %v4967_v58 }
  0xaf   : > { %4972 = vmatprep.subr.bf16.mxu0 %v4971_v0 }
  0xb2   : > { %4974 = vmatpush3.bf16.msra.mxu0 %v4971_v0 }
  0xb3   : > { %4587 = vmatprep.subr.msk.mxu0 %vm667_vm4, %v476_v1 }
  0xb6   : > { %4588 = vmatpush3.msk.msra.mxu0 %vm667_vm4, %v476_v1 }
  0xb7   : > { %4976 = vmatprep.subr.bf16.mxu0 %v4975_v8 }
  0xc5   : > { %5086 = vset.pattern.permute.xlu1 %v5389_v50 }
  0xd0   : > { %5085 = vset.pattern.permute.xlu0 %v5389_v50 }
  0xf1   : > { %689 = vrot.lane.b32.xlu1 %v677_v6, %s5382_s30 }
  0xf5   : > { %705 = vrot.lane.b32.xlu1 %v677_v6, %s5383_s13 }
  0xf9   : > { %681 = vrot.lane.b32.xlu1 %v677_v6, %s5381_s29 }
  0xfc   : > { %687 = vrot.lane.b32.xlu0 %v5686_v2, %s5382_s30  ;;  %s8441_s30 = smov 111  }
  0xfd   : > { %697 = vrot.lane.b32.xlu1 %v677_v6, %s5384_s14 }
 0x100   : > { %703 = vrot.lane.b32.xlu0 %v5686_v2, %s5383_s13 }
 0x101   : > { %714 = vrot.lane.b32.xlu1 %v677_v6, %s5385_s15 }
 0x104   : > { %679 = vrot.lane.b32.xlu0 %v5686_v2, %s5381_s29 }
 0x105   : > { %730 = vrot.lane.b32.xlu1 %v677_v6, %s5386_s16 }
 0x108   : > { %695 = vrot.lane.b32.xlu0 %v5686_v2, %s5384_s14  ;;  %s4365_s14 = sshll.u32 %s8863_s21, 8 }
 0x109   : > { %722 = vrot.lane.b32.xlu1 %v677_v6, %s8440_s25  ;;  %s7758_s21 = scalar_lea.vmem %s8265_s12, %s4365_s14 }
 0x10c   : > { %712 = vrot.lane.b32.xlu0 %v5686_v2, %s5385_s15 }
 0x10d   : > { %738 = vrot.lane.b32.xlu1 %v677_v6, %s8441_s30 }
 0x110   : > { %728 = vrot.lane.b32.xlu0 %v5686_v2, %s5386_s16  ;;  %s7753_s16 = scalar_lea.vmem %s8264_s11, %s4365_s14 }
 0x111   : > { %859 = vperm.xlu1 %5086, %v483_v43  }
 0x114   : > { %720 = vrot.lane.b32.xlu0 %v5686_v2, %s8440_s25 }
 0x117   : > { %v5718_v50 = vpop.trf.xlu0  ;;  %v5720_v12 = vpop.trf.xlu1 }
 0x118   : > { %4589 = vmatprep.mubr.msk.f32.mxu0 %vm796_vm10, %v5718_v50  ;;  %736 = vrot.lane.b32.xlu0 %v5686_v2, %s8441_s30 }
 0x11b   : > { %v5735_v16 = vpop.trf.xlu0  ;;  %v5737_v17 = vpop.trf.xlu1 }
 0x11c   : > { %4590 = vmatmul.mubr.msk.f32.vlgmr.msra.gmra.mrb[4].mxu0 %vm796_vm10, %v5735_v16  ;;  %793 = vperm.xlu0 %5085, %v482_v14  }
 0x11d   : > { %4978 = vmatpush3.bf16.msra.mxu0 %v4975_v8 }
 0x11e   : > { %4980 = vmatprep.subr.bf16.mxu0 %v4979_v15 }
 0x11f   : > { %v5741_v29 = vpop.trf.xlu0  ;;  %v5743_v30 = vpop.trf.xlu1 }
 0x120   : > { %4592 = vmatprep.mubr.msk.f32.mxu0 %vm796_vm10, %v5741_v29 }
 0x121   : > { %4982 = vmatpush3.bf16.msra.mxu0 %v4979_v15 }
 0x122   : > { %4645 = vmatprep.subr.msk.mxu0 %vm667_vm4, %v481_v31 }
 0x123   : > { %v5751_v33 = vpop.trf.xlu0  ;;  %v5753_v34 = vpop.trf.xlu1 }
 0x124   : > { %4593 = vmatmul.mubr.msk.f32.gmra.mrb[6].mxu0 %vm796_vm10, %v5751_v33 }
 0x125   : > { %4646 = vmatpush3.msk.msra.mxu0 %vm667_vm4, %v481_v31 }
 0x127   : > { %v5758_v35 = vpop.trf.xlu0  ;;  %v5760_v36 = vpop.trf.xlu1 }
 0x128   : > { %4595 = vmatprep.mubr.msk.f32.mxu0 %vm796_vm10, %v5758_v35 }
 0x12b   : > { %v5764_v9 = vpop.trf.xlu0  ;;  %v5766_v10 = vpop.trf.xlu1 }
 0x12c   : > { %4596 = vmatmul.mubr.msk.f32.gmra.mrb[8].mxu0 %vm796_vm10, %v5764_v9 }
 0x12f   : > { %v5770_v37 = vpop.trf.xlu0  ;;  %v5772_v38 = vpop.trf.xlu1 }
 0x130   : > { %4598 = vmatprep.mubr.msk.f32.mxu0 %vm796_vm10, %v5770_v37 }
 0x133   : > { %v5776_v39 = vpop.trf.xlu0  ;;  %v5778_v42 = vpop.trf.xlu1 }
 0x134   : > { %4599 = vmatmul.mubr.msk.f32.gmra.mrb[10].mxu0 %vm796_vm10, %v5776_v39 }
 0x137   : > { %v5785_v44 = vpop.trf.xlu0  ;;  %v5787_v46 = vpop.trf.xlu1 }
 0x138   : > { %4601 = vmatprep.mubr.msk.f32.mxu0 %vm796_vm10, %v5785_v44 }
 0x13b   : > { %v5791_v47 = vpop.trf.xlu0  ;;  %v5793_v48 = vpop.trf.xlu1 }
 0x13c   : > { %4602 = vmatmul.mubr.msk.f32.gmra.mrb[12].mxu0 %vm796_vm10, %v5791_v47 }
 0x13f   : > { %v5797_v49 = vpop.trf.xlu0  ;;  %v5799_v51 = vpop.trf.xlu1 }
 0x140   : > { %4604 = vmatprep.mubr.msk.f32.mxu0 %vm796_vm10, %v5797_v49 }
 0x143   : > { %v5803_v52 = vpop.trf.xlu0  ;;  %v5807_v53 = vpop.trf.xlu1 }
 0x144   : > { %4605 = vmatmul.mubr.msk.f32.gmra.mrb[14].mxu0 %vm796_vm10, %v5803_v52 }
 0x147   : > { %v5809_v54 = vpop.trf.xlu0  ;;  %v5815_v56 = vpop.trf.xlu1 }
 0x148   : > { %4607 = vmatprep.mubr.msk.f32.mxu0 %vm796_vm10, %v5809_v54 }
 0x14b   : > { %v5813_v55 = vpop.trf.xlu0  ;;  %v5823_v58 = vpop.trf.xlu1 }
 0x14c   : > { %4608 = vmatmul.mubr.msk.f32.gmra.mrb[16].mxu0 %vm796_vm10, %v5813_v55  ;;  %8442 = vst [vmem:[#allocation6_spill] sm:$0xff] %v5823_v58 }
 0x14f   : > { %v5819_v57 = vpop.trf.xlu0  ;;  %v5831_v60 = vpop.trf.xlu1 }
 0x150   : > { %4610 = vmatprep.mubr.msk.f32.mxu0 %vm796_vm10, %v5819_v57  ;;  %8443 = vst [vmem:[#allocation7_spill] sm:$0xff] %v5831_v60 }
 0x153   : > { %v5825_v59 = vpop.trf.xlu0  ;;  %v5841_v61 = vpop.trf.xlu1 }
 0x154   : > { %4611 = vmatmul.mubr.msk.f32.gmra.mrb[18].mxu0 %vm796_vm10, %v5825_v59 }
 0x155   : > { %4613 = vmatprep.mubr.msk.f32.mxu0 %vm796_vm10, %v5720_v12 }
 0x158   : > { %4614 = vmatmul.mubr.msk.f32.gmra.mrb[20].mxu0 %vm796_vm10, %v5737_v17 }
 0x159   : > { %4616 = vmatprep.mubr.msk.f32.mxu0 %vm796_vm10, %v5743_v30 }
 0x15c   : > { %4617 = vmatmul.mubr.msk.f32.gmra.mrb[22].mxu0 %vm796_vm10, %v5753_v34 }
 0x15d   : > { %4619 = vmatprep.mubr.msk.f32.mxu0 %vm796_vm10, %v5760_v36 }
 0x160   : > { %4620 = vmatmul.mubr.msk.f32.gmra.mrb[24].mxu0 %vm796_vm10, %v5766_v10 }
 0x161   : > { %4622 = vmatprep.mubr.msk.f32.mxu0 %vm796_vm10, %v5772_v38 }
 0x163   : > { %v690_v62 = vpop.permute.xlu1 %689 }
 0x164   : > { %4623 = vmatmul.mubr.msk.f32.gmra.mrb[26].mxu0 %vm796_vm10, %v5778_v42 }
 0x165   : > { %4625 = vmatprep.mubr.msk.f32.mxu0 %vm796_vm10, %v5787_v46 }
 0x167   : > { %v706_v0 = vpop.permute.xlu1 %705 }
 0x168   : > { %4626 = vmatmul.mubr.msk.f32.gmra.mrb[28].mxu0 %vm796_vm10, %v5793_v48 }
 0x169   : > { %4628 = vmatprep.mubr.msk.f32.mxu0 %vm796_vm10, %v5799_v51 }
 0x16b   : > { %v682_v1 = vpop.permute.xlu1 %681 }
 0x16c   : > { %4629 = vmatmul.mubr.msk.f32.gmra.mrb[30].mxu0 %vm796_vm10, %v5807_v53 }
 0x16d   : > { %4631 = vmatprep.mubr.msk.f32.mxu0 %vm796_vm10, %v5815_v56 }
 0x16e   : > { %v688_v4 = vpop.permute.xlu0 %687 }
 0x16f   : > { %v698_v5 = vpop.permute.xlu1 %697  ;;  %v691_v6 = vsel %vm512_vm2, %v688_v4, %v690_v62  ;;  %v692_v8 = vsel %vm512_vm2, %v690_v62, %v688_v4 }
 0x170   : > { %4632 = vmatmul.mubr.msk.f32.gmra.mrb[32].mxu0 %vm796_vm10, %v5823_v58  ;;  %v693_v15 = vmul.f32 %v692_v8, %v5549_v23  ;;  %v694_v31 = vmul.f32 %v691_v6, %v5552_v24 }
 0x171   : > { %4634 = vmatprep.mubr.msk.f32.mxu0 %vm796_vm10, %v5831_v60 }
 0x172   : > { %v704_v13 = vpop.permute.xlu0 %703  ;;  %v747_v24 = vrot.slane %v694_v31, 4 }
 0x173   : > { %v707_v3 = vsel %vm546_vm1, %v704_v13, %v706_v0  ;;  %v708_v14 = vsel %vm546_vm1, %v706_v0, %v704_v13  ;;  %v715_v43 = vpop.permute.xlu1 %714  ;;  %v746_v0 = vrot.slane %v693_v15, 4 }
 0x174   : > { %4635 = vmatmul.mubr.msk.f32.gmra.mrb[34].mxu0 %vm796_vm10, %v5841_v61  ;;  %v709_v62 = vmul.f32 %v708_v14, %v5543_v21  ;;  %v710_v4 = vmul.f32 %v707_v3, %v5546_v22 }
 0x175   : > { %4647 = vmatprep.mubr.msk.f32.mxu0 %vm796_vm10, %v5718_v50 }
 0x176   : > { %v680_v60 = vpop.permute.xlu0 %679  ;;  %v752_v21 = vrot.slane %v709_v62, 4  ;;  %v753_v22 = vrot.slane %v710_v4, 4 }
 0x177   : > { %v683_v58 = vsel %vm495_vm0, %v680_v60, %v682_v1  ;;  %v684_v23 = vsel %vm495_vm0, %v682_v1, %v680_v60  ;;  %v731_v1 = vpop.permute.xlu1 %730 }
 0x178   : > { %v685_v6 = vmul.f32 %v684_v23, %v5535_v19  ;;  %v686_v8 = vmul.f32 %v683_v58, %v5538_v20  ;;  %4648 = vmatmul.mubr.msk.f32.vlgmr.msra.gmra.mrb[36].mxu0 %vm796_vm10, %v5735_v16 }
 0x179   : > { %4650 = vmatprep.mubr.msk.f32.mxu0 %vm796_vm10, %v5741_v29 }
 0x17a   : > { %v696_v50 = vpop.permute.xlu0 %695  ;;  %v772_v16 = vsel %vm667_vm4, %v686_v8, %v747_v24  ;;  %v771_v29 = vsel %vm667_vm4, %v685_v6, %v746_v0 }
 0x17b   : > { %v699_v13 = vsel %vm529_vm3, %v696_v50, %v698_v5  ;;  %v700_v60 = vsel %vm529_vm3, %v698_v5, %v696_v50 }
 0x17c   : > { %v701_v19 = vmul.f32 %v700_v60, %v5555_v25  ;;  %v702_v20 = vmul.f32 %v699_v13, %v5558_v26  ;;  %4651 = vmatmul.mubr.msk.f32.gmra.mrb[38].mxu0 %vm796_vm10, %v5751_v33  ;;  %v711_v25 = vmul.f32 %v5560_v27, %v5686_v2  ;;  %v723_v27 = vpop.permute.xlu1 %722 }
 0x17d   : > { %4653 = vmatprep.mubr.msk.f32.mxu0 %vm796_vm10, %v5758_v35 }
 0x17e   : > { %v713_v58 = vpop.permute.xlu0 %712  ;;  %v774_v3 = vsel %vm667_vm4, %v702_v20, %v753_v22  ;;  %v773_v5 = vsel %vm667_vm4, %v701_v19, %v752_v21 }
 0x17f   : > { %v716_v26 = vsel %vm576_vm5, %v713_v58, %v715_v43  ;;  %v717_v33 = vsel %vm576_vm5, %v715_v43, %v713_v58  ;;  %v786_v14 = vpack.c.bf16 %v774_v3, %v772_v16  ;;  %v785_v15 = vpack.c.bf16 %v773_v5, %v771_v29 }
 0x180   : > { %v718_v31 = vmul.f32 %v716_v26, %v5568_v32  ;;  %v719_v35 = vmul.f32 %v717_v33, %v5583_v41  ;;  %4654 = vmatmul.mubr.msk.f32.gmra.mrb[40].mxu0 %vm796_vm10, %v5764_v9  ;;  %v841_v62 = vpop.f32.mrb[0].mxu0  ;;  %v757_v41 = vcombine.high %v711_v25, %v711_v25 }
 0x181   : > { %4656 = vmatprep.mubr.msk.f32.mxu0 %vm796_vm10, %v5770_v37  ;;  %871 = vmatprep.subr.bf16.mxu1 %v786_v14  ;;  %v843_v2 = vpop.f32.mrb[1].mxu0 }
 0x182   : > { %v729_v4 = vpop.permute.xlu0 %728  ;;  %872 = vmatpush1.bf16.msra.mxu1 %v785_v15  ;;  %v845_v23 = vpop.f32.mrb[2].mxu0  ;;  %v761_v24 = vrot.slane %v718_v31, 4  ;;  %v762_v9 = vrot.slane %v719_v35, 4 }
 0x183   : > { %v732_v43 = vsel %vm610_vm6, %v729_v4, %v731_v1  ;;  %v733_v32 = vsel %vm610_vm6, %v731_v1, %v729_v4  ;;  %v846_v0 = vpop.f32.mrb[3].mxu0 }
 0x184   : > { %v734_v6 = vmul.f32 %v732_v43, %v5604_v63  ;;  %v735_v37 = vmul.f32 %v733_v32, %v5614_v11  ;;  %4657 = vmatmul.mubr.msk.f32.gmra.mrb[42].mxu0 %vm796_vm10, %v5776_v39  ;;  %v739_v11 = vpop.permute.xlu1 %738  ;;  %v776_v39 = vsel %vm667_vm4, %v757_v41, %v762_v9 }
 0x185   : > { %4659 = vmatprep.mubr.msk.f32.mxu0 %vm796_vm10, %v5785_v44  ;;  %v775_v44 = vsel %vm667_vm4, %v711_v25, %v761_v24 }
 0x186   : > { %v767_v8 = vrot.slane %v734_v6, 4  ;;  %v768_v21 = vrot.slane %v735_v37, 4  ;;  %v721_v22 = vpop.permute.xlu0 %720 }
 0x187   : > { %v724_v50 = vsel %vm593_vm7, %v721_v22, %v723_v27  ;;  %v725_v13 = vsel %vm593_vm7, %v723_v27, %v721_v22 }
 0x188   : > { %v726_v60 = vmul.f32 %v724_v50, %v5622_v18  ;;  %v727_v63 = vmul.f32 %v725_v13, %v5625_v28  ;;  %4660 = vmatmul.mubr.msk.f32.gmra.mrb[44].mxu0 %vm796_vm10, %v5791_v47 }
 0x189   : > { %4662 = vmatprep.mubr.msk.f32.mxu0 %vm796_vm10, %v5797_v49 }
 0x18a   : > { %v737_v1 = vpop.permute.xlu0 %736  ;;  %v778_v19 = vsel %vm667_vm4, %v727_v63, %v768_v21  ;;  %v777_v20 = vsel %vm667_vm4, %v726_v60, %v767_v8 }
 0x18b   : > { %v740_v18 = vsel %vm627_vm8, %v737_v1, %v739_v11  ;;  %v741_v28 = vsel %vm627_vm8, %v739_v11, %v737_v1  ;;  %v788_v47 = vpack.c.bf16 %v778_v19, %v776_v39  ;;  %v787_v16 = vpack.c.bf16 %v777_v20, %v775_v44 }
 0x18c   : > { %v742_v29 = vmul.f32 %v5641_v40, %v740_v18  ;;  %v743_v58 = vmul.f32 %v5648_v45, %v741_v28  ;;  %4663 = vmatmul.mubr.msk.f32.gmra.mrb[46].mxu0 %vm796_vm10, %v5803_v52  ;;  %v471_v40 = vld [vmem:[%s8258_s5] sm:$0xf] }
 0x18d   : > { %873 = vmatprep.subr.bf16.mxu1 %v788_v47  ;;  %4665 = vmatprep.mubr.msk.f32.mxu0 %vm796_vm10, %v5809_v54 }
 0x18e   : > { %v789_v49 = vpack.c.bf16 %v742_v29, %v742_v29  ;;  %v790_v3 = vpack.c.bf16 %v743_v58, %v743_v58  ;;  %874 = vmatpush1.bf16.msra.mxu1 %v787_v16 }
 0x190   : > { %4666 = vmatmul.mubr.msk.f32.gmra.mrb[48].mxu0 %vm796_vm10, %v5813_v55  ;;  %4224 = vmatprep.subr.msk.bf16.mxu1 %vm800_vm9, %v790_v3  ;;  %v866_v7 = vsel %vm800_vm9, %v789_v49, 0 }
 0x191   : > { %4668 = vmatprep.mubr.msk.f32.mxu0 %vm796_vm10, %v5819_v57 }
 0x192   : > { %876 = vmatpush1.bf16.msra.mxu1 %v866_v7 }
 0x194   : > { %4669 = vmatmul.mubr.msk.f32.gmra.mrb[50].mxu0 %vm796_vm10, %v5825_v59 }
 0x195   : > { %4225 = vmatmul.mubr.msk.bf16.vlgmr.msra.gmra.mrb[0].mxu1 %vm796_vm10, %v471_v40  ;;  %4671 = vmatprep.mubr.msk.f32.mxu0 %vm796_vm10, %v5720_v12 }
 0x198   : > { %4672 = vmatmul.mubr.msk.f32.gmra.mrb[52].mxu0 %vm796_vm10, %v5737_v17 }
 0x199   : > { %4674 = vmatprep.mubr.msk.f32.mxu0 %vm796_vm10, %v5743_v30 }
 0x19b   : > { %v794_v45 = vpop.permute.xlu0 %793 }
 0x19c   : > { %4675 = vmatmul.mubr.msk.f32.gmra.mrb[54].mxu0 %vm796_vm10, %v5753_v34  ;;  %v842_v52 = vadd.f32 %v841_v62, %v794_v45  ;;  %v844_v54 = vadd.f32 %v843_v2, %v794_v45  ;;  %v8444_v34 = vld [vmem:[#allocation6_spill] sm:$0xff] }
 0x19d   : > { %4677 = vmatprep.mubr.msk.f32.mxu0 %vm796_vm10, %v5760_v36  ;;  %v8445_v36 = vld [vmem:[#allocation7_spill] sm:$0xff] }
 0x19e   : > { %v4367_v55 = vpack.c.bf16 %v844_v54, %v842_v52 }
 0x1a0   : > { %4678 = vmatmul.mubr.msk.f32.gmra.mrb[56].mxu0 %vm796_vm10, %v5766_v10  ;;  %856 = vst [vmem:[#allocation2] sm:$0xff] %v4367_v55  ;;  %v5999_v10 = vld [vmem:[%s8261_s8] ss:$0 sm:$0xff] }
 0x1a1   : > { %4680 = vmatprep.mubr.msk.f32.mxu0 %vm796_vm10, %v5772_v38 }
 0x1a4   : > { %4681 = vmatmul.mubr.msk.f32.gmra.mrb[58].mxu0 %vm796_vm10, %v5778_v42 }
 0x1a5   : > { %4683 = vmatprep.mubr.msk.f32.mxu0 %vm796_vm10, %v5787_v46 }
 0x1a7   : > { %v1715_v12 = vld [vmem:[#allocation2] sm:$0xf]  ;;  %v4327_v17 = vld [vmem:[#allocation2 + $0x4] sm:$0xf] }
 0x1a8   : > { %4684 = vmatmul.mubr.msk.f32.gmra.mrb[60].mxu0 %vm796_vm10, %v5793_v48  ;;  %5047 = vmatprep.subr.msk.bf16.mxu0 %vm800_vm9, %v1715_v12  ;;  %v1767_v30 = vsel %vm800_vm9, %v1715_v12, 0  ;;  %v2532_v31 = vsel %vm800_vm9, %v4327_v17, 0 }
 0x1a9   : > { %4686 = vmatprep.mubr.msk.f32.mxu0 %vm796_vm10, %v5799_v51  ;;  %4696 = vmatpush3.bf16.msra.mxu0 %v1767_v30 }
 0x1aa   : > { %5049 = vmatprep.subr.msk.bf16.mxu0 %vm800_vm9, %v4327_v17 }
 0x1ac   : > { %4687 = vmatmul.mubr.msk.f32.gmra.mrb[62].mxu0 %vm796_vm10, %v5807_v53 }
 0x1ad   : > { %4689 = vmatprep.mubr.msk.f32.mxu0 %vm796_vm10, %v5815_v56 }
 0x1b0   : > { %4690 = vmatmul.mubr.msk.f32.gmra.mrb[64].mxu0 %vm796_vm10, %v8444_v34 }
 0x1b1   : > { %4692 = vmatprep.mubr.msk.f32.mxu0 %vm796_vm10, %v8445_v36 }
 0x1b4   : > { %4693 = vmatmul.mubr.msk.f32.gmra.mrb[66].mxu0 %vm796_vm10, %v5841_v61 }
 0x1ef   : > { %v4591_v38 = vpop.f32.mrb[4].mxu0 }
 0x1f0   : > { %v1162_v42 = vadd.f32 %v4591_v38, %v5999_v10  ;;  %v1156_v46 = vpop.f32.mrb[5].mxu0 }
 0x1f1   : > { %v1157_v48 = vadd.f32 %v5999_v10, %v1156_v46 }
 0x1f3   : > { %v1315_v51 = vpack.c.bf16 %v1162_v42, %v1157_v48 }
 0x1f5   : > { %1332 = vst.msk [vmem:[#allocation4] sm:$0xff] %vm1331_vm11, %v1315_v51 }
 0x1f7   : > { %v4594_v53 = vpop.f32.mrb[6].mxu0 }
 0x1f8   : > { %v1172_v56 = vadd.f32 %v4594_v53, %v5999_v10  ;;  %v1166_v57 = vpop.f32.mrb[7].mxu0 }
 0x1f9   : > { %v1167_v59 = vadd.f32 %v5999_v10, %v1166_v57 }
 0x1fb   : > { %v1316_v61 = vpack.c.bf16 %v1172_v56, %v1167_v59 }
 0x1fc   : > { %v6006_v5 = vld [vmem:[#allocation4] sm:$0xff] }
 0x1fd   : > { %1333 = vst.msk [vmem:[#allocation4 + $0x8] sm:$0xff] %vm1331_vm11, %v1316_v61  ;;  %4697 = vmatprep.mubr.msk.bf16.mxu0 %vm1331_vm11, %v6006_v5 }
 0x1ff   : > { %v4597_v25 = vpop.f32.mrb[8].mxu0 }
 0x200   : > { %v1182_v26 = vadd.f32 %v4597_v25, %v5999_v10  ;;  %v1176_v33 = vpop.f32.mrb[9].mxu0 }
 0x201   : > { %v1177_v14 = vadd.f32 %v5999_v10, %v1176_v33 }
 0x203   : > { %v1317_v15 = vpack.c.bf16 %v1182_v26, %v1177_v14 }
 0x204   : > { %v6014_v35 = vld [vmem:[#allocation4 + $0x8] sm:$0xff] }
 0x205   : > { %1334 = vst.msk [vmem:[#allocation4 + $0x10] sm:$0xff] %vm1331_vm11, %v1317_v15  ;;  %4698 = vmatmul.mubr.msk.bf16.vlgmr.msra.gmra.mrb[68].mxu0 %vm1331_vm11, %v6014_v35 }
 0x206   : > { %4764 = vmatpush3.bf16.msra.mxu0 %v2532_v31 }
 0x207   : > { %v4600_v62 = vpop.f32.mrb[10].mxu0 }
 0x208   : > { %v1192_v27 = vadd.f32 %v4600_v62, %v5999_v10  ;;  %v1186_v2 = vpop.f32.mrb[11].mxu0 }
 0x209   : > { %v1187_v4 = vadd.f32 %v5999_v10, %v1186_v2 }
 0x20b   : > { %v1318_v23 = vpack.c.bf16 %v1192_v27, %v1187_v4 }
 0x20c   : > { %v6021_v43 = vld [vmem:[#allocation4 + $0x10] sm:$0xff] }
 0x20d   : > { %1335 = vst.msk [vmem:[#allocation4 + $0x18] sm:$0xff] %vm1331_vm11, %v1318_v23  ;;  %4701 = vmatprep.mubr.msk.bf16.mxu0 %vm1331_vm11, %v6021_v43 }
 0x20f   : > { %v4603_v32 = vpop.f32.mrb[12].mxu0 }
 0x210   : > { %v1202_v41 = vadd.f32 %v4603_v32, %v5999_v10  ;;  %v1196_v0 = vpop.f32.mrb[13].mxu0 }
 0x211   : > { %v1197_v24 = vadd.f32 %v5999_v10, %v1196_v0 }
 0x213   : > { %v1319_v9 = vpack.c.bf16 %v1202_v41, %v1197_v24 }
 0x214   : > { %v6028_v6 = vld [vmem:[#allocation4 + $0x18] sm:$0xff] }
 0x215   : > { %1336 = vst.msk [vmem:[#allocation4 + $0x20] sm:$0xff] %vm1331_vm11, %v1319_v9  ;;  %4702 = vmatmul.mubr.msk.bf16.gmra.mrb[72].mxu0 %vm1331_vm11, %v6028_v6 }
 0x217   : > { %v4606_v37 = vpop.f32.mrb[14].mxu0 }
 0x218   : > { %v1212_v8 = vadd.f32 %v4606_v37, %v5999_v10  ;;  %v1206_v21 = vpop.f32.mrb[15].mxu0 }
 0x219   : > { %v1207_v22 = vadd.f32 %v5999_v10, %v1206_v21 }
 0x21b   : > { %v1320_v50 = vpack.c.bf16 %v1212_v8, %v1207_v22 }
 0x21c   : > { %v6035_v13 = vld [vmem:[#allocation4 + $0x20] sm:$0xff] }
 0x21d   : > { %1337 = vst.msk [vmem:[#allocation4 + $0x28] sm:$0xff] %vm1331_vm11, %v1320_v50  ;;  %4705 = vmatprep.mubr.msk.bf16.mxu0 %vm1331_vm11, %v6035_v13  ;;  %v6104_v50 = vld [vmem:[%s8263_s10] ss:$0 sm:$0xff] }
 0x21f   : > { %v4609_v60 = vpop.f32.mrb[16].mxu0 }
 0x220   : > { %v1222_v63 = vadd.f32 %v4609_v60, %v5999_v10  ;;  %v1216_v11 = vpop.f32.mrb[17].mxu0 }
 0x221   : > { %v1217_v39 = vadd.f32 %v5999_v10, %v1216_v11 }
 0x223   : > { %v1321_v44 = vpack.c.bf16 %v1222_v63, %v1217_v39 }
 0x224   : > { %v6042_v1 = vld [vmem:[#allocation4 + $0x28] sm:$0xff] }
 0x225   : > { %1338 = vst.msk [vmem:[#allocation4 + $0x30] sm:$0xff] %vm1331_vm11, %v1321_v44  ;;  %4706 = vmatmul.mubr.msk.bf16.gmra.mrb[76].mxu0 %vm1331_vm11, %v6042_v1 }
 0x227   : > { %v4612_v19 = vpop.f32.mrb[18].mxu0 }
 0x228   : > { %v1232_v20 = vadd.f32 %v4612_v19, %v5999_v10  ;;  %v1226_v18 = vpop.f32.mrb[19].mxu0 }
 0x229   : > { %v1227_v28 = vadd.f32 %v5999_v10, %v1226_v18 }
 0x22b   : > { %v1322_v47 = vpack.c.bf16 %v1232_v20, %v1227_v28  ;;  %v4615_v16 = vpop.f32.mrb[20].mxu0 }
 0x22c   : > { %v1242_v29 = vadd.f32 %v4615_v16, %v5999_v10  ;;  %v1236_v58 = vpop.f32.mrb[21].mxu0  ;;  %v6050_v49 = vld [vmem:[#allocation4 + $0x30] sm:$0xff] }
 0x22d   : > { %1339 = vst.msk [vmem:[#allocation4 + $0x38] sm:$0xff] %vm1331_vm11, %v1322_v47  ;;  %v1237_v3 = vadd.f32 %v5999_v10, %v1236_v58  ;;  %4709 = vmatprep.mubr.msk.bf16.mxu0 %vm1331_vm11, %v6050_v49 }
 0x22f   : > { %v1323_v7 = vpack.c.bf16 %v1242_v29, %v1237_v3  ;;  %v4618_v40 = vpop.f32.mrb[22].mxu0 }
 0x230   : > { %v1252_v45 = vadd.f32 %v4618_v40, %v5999_v10  ;;  %v1246_v52 = vpop.f32.mrb[23].mxu0 }
 0x231   : > { %1340 = vst.msk [vmem:[#allocation4 + $0x40] sm:$0xff] %vm1331_vm11, %v1323_v7  ;;  %v1247_v54 = vadd.f32 %v5999_v10, %v1246_v52 }
 0x233   : > { %v1324_v55 = vpack.c.bf16 %v1252_v45, %v1247_v54  ;;  %v4621_v12 = vpop.f32.mrb[24].mxu0 }
 0x234   : > { %v1262_v17 = vadd.f32 %v4621_v12, %v5999_v10  ;;  %v1256_v30 = vpop.f32.mrb[25].mxu0  ;;  %v6060_v34 = vld [vmem:[#allocation4 + $0x38] sm:$0xff] }
 0x235   : > { %1341 = vst.msk [vmem:[#allocation4 + $0x48] sm:$0xff] %vm1331_vm11, %v1324_v55  ;;  %v1257_v36 = vadd.f32 %v5999_v10, %v1256_v30  ;;  %4710 = vmatmul.mubr.msk.bf16.gmra.mrb[80].mxu0 %vm1331_vm11, %v6060_v34 }
 0x237   : > { %v1325_v38 = vpack.c.bf16 %v1262_v17, %v1257_v36  ;;  %v4624_v42 = vpop.f32.mrb[26].mxu0 }
 0x238   : > { %v1272_v46 = vadd.f32 %v4624_v42, %v5999_v10  ;;  %v1266_v48 = vpop.f32.mrb[27].mxu0  ;;  %v6067_v51 = vld [vmem:[#allocation4 + $0x40] sm:$0xff] }
 0x239   : > { %1342 = vst.msk [vmem:[#allocation4 + $0x50] sm:$0xff] %vm1331_vm11, %v1325_v38  ;;  %v1267_v53 = vadd.f32 %v5999_v10, %v1266_v48  ;;  %4713 = vmatprep.mubr.msk.bf16.mxu0 %vm1331_vm11, %v6067_v51 }
 0x23b   : > { %v1326_v56 = vpack.c.bf16 %v1272_v46, %v1267_v53  ;;  %v4627_v57 = vpop.f32.mrb[28].mxu0 }
 0x23c   : > { %v1282_v59 = vadd.f32 %v4627_v57, %v5999_v10  ;;  %v1276_v61 = vpop.f32.mrb[29].mxu0  ;;  %v6074_v25 = vld [vmem:[#allocation4 + $0x48] sm:$0xff] }
 0x23d   : > { %1343 = vst.msk [vmem:[#allocation4 + $0x58] sm:$0xff] %vm1331_vm11, %v1326_v56  ;;  %v1277_v26 = vadd.f32 %v5999_v10, %v1276_v61  ;;  %4714 = vmatmul.mubr.msk.bf16.gmra.mrb[84].mxu0 %vm1331_vm11, %v6074_v25 }
 0x23f   : > { %v1327_v33 = vpack.c.bf16 %v1282_v59, %v1277_v26  ;;  %v4630_v14 = vpop.f32.mrb[30].mxu0 }
 0x240   : > { %v1292_v15 = vadd.f32 %v4630_v14, %v5999_v10  ;;  %v1286_v31 = vpop.f32.mrb[31].mxu0  ;;  %v6081_v62 = vld [vmem:[#allocation4 + $0x50] sm:$0xff] }
 0x241   : > { %1344 = vst.msk [vmem:[#allocation4 + $0x60] sm:$0xff] %vm1331_vm11, %v1327_v33  ;;  %v1287_v27 = vadd.f32 %v5999_v10, %v1286_v31  ;;  %4717 = vmatprep.mubr.msk.bf16.mxu0 %vm1331_vm11, %v6081_v62 }
 0x243   : > { %v1328_v2 = vpack.c.bf16 %v1292_v15, %v1287_v27  ;;  %v4633_v4 = vpop.f32.mrb[32].mxu0 }
 0x244   : > { %v1302_v23 = vadd.f32 %v4633_v4, %v5999_v10  ;;  %v1296_v32 = vpop.f32.mrb[33].mxu0  ;;  %v6088_v41 = vld [vmem:[#allocation4 + $0x58] sm:$0xff] }
 0x245   : > { %1345 = vst.msk [vmem:[#allocation4 + $0x68] sm:$0xff] %vm1331_vm11, %v1328_v2  ;;  %v1297_v0 = vadd.f32 %v5999_v10, %v1296_v32  ;;  %4718 = vmatmul.mubr.msk.bf16.gmra.mrb[88].mxu0 %vm1331_vm11, %v6088_v41 }
 0x247   : > { %v1329_v24 = vpack.c.bf16 %v1302_v23, %v1297_v0  ;;  %v4636_v9 = vpop.f32.mrb[34].mxu0 }
 0x248   : > { %v1312_v37 = vadd.f32 %v4636_v9, %v5999_v10  ;;  %v1306_v8 = vpop.f32.mrb[35].mxu0  ;;  %v6095_v21 = vld [vmem:[#allocation4 + $0x60] sm:$0xff] }
 0x249   : > { %1346 = vst.msk [vmem:[#allocation4 + $0x70] sm:$0xff] %vm1331_vm11, %v1329_v24  ;;  %v1307_v22 = vadd.f32 %v5999_v10, %v1306_v8  ;;  %4721 = vmatprep.mubr.msk.bf16.mxu0 %vm1331_vm11, %v6095_v21 }
 0x24b   : > { %v1330_v60 = vpack.c.bf16 %v1312_v37, %v1307_v22  ;;  %v4649_v63 = vpop.f32.mrb[36].mxu0 }
 0x24c   : > { %v1429_v11 = vadd.f32 %v4649_v63, %v6104_v50  ;;  %v1423_v39 = vpop.f32.mrb[37].mxu0  ;;  %v6107_v44 = vld [vmem:[#allocation4 + $0x68] sm:$0xff] }
 0x24d   : > { %1347 = vst.msk [vmem:[#allocation4 + $0x78] sm:$0xff] %vm1331_vm11, %v1330_v60  ;;  %v1424_v19 = vadd.f32 %v6104_v50, %v1423_v39  ;;  %4722 = vmatmul.mubr.msk.bf16.gmra.mrb[92].mxu0 %vm1331_vm11, %v6107_v44 }
 0x24f   : > { %v1582_v10 = vpack.c.bf16 %v1429_v11, %v1424_v19  ;;  %v4652_v20 = vpop.f32.mrb[38].mxu0 }
 0x250   : > { %v1439_v18 = vadd.f32 %v4652_v20, %v6104_v50  ;;  %v1433_v28 = vpop.f32.mrb[39].mxu0  ;;  %v6114_v47 = vld [vmem:[#allocation4 + $0x70] sm:$0xff] }
 0x251   : > { %1598 = vst.msk [vmem:[#allocation5] sm:$0xff] %vm1331_vm11, %v1582_v10  ;;  %v1434_v16 = vadd.f32 %v6104_v50, %v1433_v28  ;;  %4725 = vmatprep.mubr.msk.bf16.mxu0 %vm1331_vm11, %v6114_v47 }
 0x253   : > { %v1583_v29 = vpack.c.bf16 %v1439_v18, %v1434_v16  ;;  %v4655_v58 = vpop.f32.mrb[40].mxu0 }
 0x254   : > { %v1449_v3 = vadd.f32 %v4655_v58, %v6104_v50  ;;  %v1443_v7 = vpop.f32.mrb[41].mxu0  ;;  %v6121_v40 = vld [vmem:[#allocation4 + $0x78] sm:$0xff] }
 0x255   : > { %1599 = vst.msk [vmem:[#allocation5 + $0x8] sm:$0xff] %vm1331_vm11, %v1583_v29  ;;  %v1444_v45 = vadd.f32 %v6104_v50, %v1443_v7  ;;  %4726 = vmatmul.mubr.msk.bf16.gmra.mrb[96].mxu0 %vm1331_vm11, %v6121_v40 }
 0x256   : > { %4765 = vmatprep.mubr.msk.bf16.mxu0 %vm1331_vm11, %v6006_v5 }
 0x257   : > { %v1584_v52 = vpack.c.bf16 %v1449_v3, %v1444_v45  ;;  %v4658_v54 = vpop.f32.mrb[42].mxu0 }
 0x258   : > { %v1459_v55 = vadd.f32 %v4658_v54, %v6104_v50  ;;  %v1453_v12 = vpop.f32.mrb[43].mxu0  ;;  %v6130_v17 = vld [vmem:[#allocation5] sm:$0xff] }
 0x259   : > { %1600 = vst.msk [vmem:[#allocation5 + $0x10] sm:$0xff] %vm1331_vm11, %v1584_v52  ;;  %v1454_v30 = vadd.f32 %v6104_v50, %v1453_v12  ;;  %4731 = vmatprep.mubr.msk.bf16.mxu1 %vm1331_vm11, %v6130_v17 }
 0x25b   : > { %v1585_v36 = vpack.c.bf16 %v1459_v55, %v1454_v30  ;;  %v4661_v38 = vpop.f32.mrb[44].mxu0 }
 0x25c   : > { %v1469_v42 = vadd.f32 %v4661_v38, %v6104_v50  ;;  %v1463_v46 = vpop.f32.mrb[45].mxu0  ;;  %v1696_v12 = vld [vmem:[#allocation5 + $0x8] sm:$0xff] }
 0x25d   : > { %1601 = vst.msk [vmem:[#allocation5 + $0x18] sm:$0xff] %vm1331_vm11, %v1585_v36  ;;  %v1464_v5 = vadd.f32 %v6104_v50, %v1463_v46  ;;  %4766 = vmatmul.mubr.msk.bf16.vlgmr.msra.gmra.mrb[100].mxu0 %vm1331_vm11, %v6014_v35 }
 0x25e   : > { %4769 = vmatprep.mubr.msk.bf16.mxu0 %vm1331_vm11, %v6021_v43  ;;  %v860_v43 = vpop.permute.xlu1 %859 }
 0x25f   : > { %v1586_v48 = vpack.c.bf16 %v1469_v42, %v1464_v5  ;;  %v4664_v53 = vpop.f32.mrb[46].mxu0 }
 0x260   : > { %v1479_v56 = vadd.f32 %v4664_v53, %v6104_v50  ;;  %v1473_v57 = vpop.f32.mrb[47].mxu0 }
 0x261   : > { %1602 = vst.msk [vmem:[#allocation5 + $0x20] sm:$0xff] %vm1331_vm11, %v1586_v48  ;;  %v1474_v59 = vadd.f32 %v6104_v50, %v1473_v57 }
 0x263   : > { %v1587_v61 = vpack.c.bf16 %v1479_v56, %v1474_v59  ;;  %v4667_v26 = vpop.f32.mrb[48].mxu0 }
 0x264   : > { %v1489_v33 = vadd.f32 %v4667_v26, %v6104_v50  ;;  %v1483_v14 = vpop.f32.mrb[49].mxu0  ;;  %v1698_v59 = vld [vmem:[#allocation5 + $0x18] sm:$0xff] }
 0x265   : > { %1603 = vst.msk [vmem:[#allocation5 + $0x28] sm:$0xff] %vm1331_vm11, %v1587_v61  ;;  %v1484_v35 = vadd.f32 %v6104_v50, %v1483_v14  ;;  %4770 = vmatmul.mubr.msk.bf16.gmra.mrb[104].mxu0 %vm1331_vm11, %v6028_v6 }
 0x266   : > { %4773 = vmatprep.mubr.msk.bf16.mxu0 %vm1331_vm11, %v6035_v13 }
 0x267   : > { %v1588_v15 = vpack.c.bf16 %v1489_v33, %v1484_v35  ;;  %v4670_v31 = vpop.f32.mrb[50].mxu0 }
 0x268   : > { %v1499_v27 = vadd.f32 %v4670_v31, %v6104_v50  ;;  %v905_v2 = vpop.f32.mrb[0].mxu1  ;;  %v1493_v4 = vpop.f32.mrb[51].mxu0  ;;  %v1699_v61 = vld [vmem:[#allocation5 + $0x20] sm:$0xff] }
 0x269   : > { %1604 = vst.msk [vmem:[#allocation5 + $0x30] sm:$0xff] %vm1331_vm11, %v1588_v15  ;;  %v1494_v23 = vadd.f32 %v6104_v50, %v1493_v4  ;;  %v906_v32 = vadd.f32 %v905_v2, %v860_v43  ;;  %v907_v0 = vpop.f32.mrb[1].mxu1 }
 0x26a   : > { %v908_v24 = vadd.f32 %v907_v0, %v860_v43  ;;  %v909_v9 = vpop.f32.mrb[2].mxu1 }
 0x26b   : > { %v1589_v37 = vpack.c.bf16 %v1499_v27, %v1494_v23  ;;  %v4673_v6 = vpop.f32.mrb[52].mxu0  ;;  %v910_v8 = vpop.f32.mrb[3].mxu1 }
 0x26c   : > { %v4368_v22 = vpack.c.bf16 %v908_v24, %v906_v32  ;;  %v1509_v13 = vadd.f32 %v4673_v6, %v6104_v50  ;;  %v1503_v60 = vpop.f32.mrb[53].mxu0  ;;  %v1700_v2 = vld [vmem:[#allocation5 + $0x28] sm:$0xff] }
 0x26d   : > { %1605 = vst.msk [vmem:[#allocation5 + $0x38] sm:$0xff] %vm1331_vm11, %v1589_v37  ;;  %v1504_v63 = vadd.f32 %v6104_v50, %v1503_v60  ;;  %4774 = vmatmul.mubr.msk.bf16.gmra.mrb[108].mxu0 %vm1331_vm11, %v6042_v1 }
 0x26e   : > { %920 = vst [vmem:[#allocation3] sm:$0xff] %v4368_v22  ;;  %4777 = vmatprep.mubr.msk.bf16.mxu0 %vm1331_vm11, %v6050_v49 }
 0x26f   : > { %v1590_v11 = vpack.c.bf16 %v1509_v13, %v1504_v63  ;;  %v4676_v39 = vpop.f32.mrb[54].mxu0 }
 0x270   : > { %v1519_v19 = vadd.f32 %v4676_v39, %v6104_v50  ;;  %v1513_v10 = vpop.f32.mrb[55].mxu0  ;;  %v1701_v4 = vld [vmem:[#allocation5 + $0x30] sm:$0xff] }
 0x271   : > { %1606 = vst.msk [vmem:[#allocation5 + $0x40] sm:$0xff] %vm1331_vm11, %v1590_v11  ;;  %v1514_v20 = vadd.f32 %v6104_v50, %v1513_v10 }
 0x273   : > { %v1591_v18 = vpack.c.bf16 %v1519_v19, %v1514_v20  ;;  %v4679_v28 = vpop.f32.mrb[56].mxu0 }
 0x274   : > { %v1529_v16 = vadd.f32 %v4679_v28, %v6104_v50  ;;  %v1523_v29 = vpop.f32.mrb[57].mxu0 }
 0x275   : > { %1607 = vst.msk [vmem:[#allocation5 + $0x48] sm:$0xff] %vm1331_vm11, %v1591_v18  ;;  %v1524_v1 = vadd.f32 %v6104_v50, %v1523_v29  ;;  %4778 = vmatmul.mubr.msk.bf16.gmra.mrb[112].mxu0 %vm1331_vm11, %v6060_v34  ;;  %v2122_v49 = vld [vmem:[#allocation3] sm:$0xf]  ;;  %v4344_v58 = vld [vmem:[#allocation3 + $0x4] sm:$0xf] }
 0x276   : > { %5048 = vmatprep.subr.msk.bf16.mxu1 %vm800_vm9, %v2122_v49  ;;  %4781 = vmatprep.mubr.msk.bf16.mxu0 %vm1331_vm11, %v6067_v51  ;;  %v2172_v3 = vsel %vm800_vm9, %v2122_v49, 0  ;;  %v3053_v7 = vsel %vm800_vm9, %v4344_v58, 0  ;;  %v1697_v51 = vld [vmem:[#allocation5 + $0x10] sm:$0xff] }
 0x277   : > { %v1592_v45 = vpack.c.bf16 %v1529_v16, %v1524_v1  ;;  %v4682_v52 = vpop.f32.mrb[58].mxu0  ;;  %4730 = vmatpush3.bf16.msra.mxu1 %v2172_v3  ;;  %5050 = vmatprep.subr.msk.bf16.mxu0 %vm800_vm9, %v4344_v58 }
 0x278   : > { %v1539_v54 = vadd.f32 %v4682_v52, %v6104_v50  ;;  %v1533_v55 = vpop.f32.mrb[59].mxu0  ;;  %4832 = vmatpush3.bf16.msra.mxu0 %v3053_v7 }
 0x279   : > { %1608 = vst.msk [vmem:[#allocation5 + $0x50] sm:$0xff] %vm1331_vm11, %v1592_v45  ;;  %v1534_v34 = vadd.f32 %v6104_v50, %v1533_v55 }
 0x27a   : > { %4732 = vmatmul.mubr.msk.bf16.vlgmr.msra.gmra.mrb[4].mxu1 %vm1331_vm11, %v1696_v12 }
 0x27b   : > { %v1593_v30 = vpack.c.bf16 %v1539_v54, %v1534_v34  ;;  %v4685_v36 = vpop.f32.mrb[60].mxu0  ;;  %4735 = vmatprep.mubr.msk.bf16.mxu1 %vm1331_vm11, %v1697_v51 }
 0x27c   : > { %v1549_v38 = vadd.f32 %v4685_v36, %v6104_v50  ;;  %v1543_v42 = vpop.f32.mrb[61].mxu0 }
 0x27d   : > { %1609 = vst.msk [vmem:[#allocation5 + $0x58] sm:$0xff] %vm1331_vm11, %v1593_v30  ;;  %v1544_v46 = vadd.f32 %v6104_v50, %v1543_v42  ;;  %4782 = vmatmul.mubr.msk.bf16.gmra.mrb[116].mxu0 %vm1331_vm11, %v6074_v25 }
 0x27e   : > { %4785 = vmatprep.mubr.msk.bf16.mxu0 %vm1331_vm11, %v6081_v62 }
 0x27f   : > { %v1594_v5 = vpack.c.bf16 %v1549_v38, %v1544_v46  ;;  %v4688_v48 = vpop.f32.mrb[62].mxu0 }
 0x280   : > { %v1559_v53 = vadd.f32 %v4688_v48, %v6104_v50  ;;  %v1553_v56 = vpop.f32.mrb[63].mxu0  ;;  %v1705_v32 = vld [vmem:[#allocation5 + $0x50] sm:$0xff] }
 0x281   : > { %1610 = vst.msk [vmem:[#allocation5 + $0x60] sm:$0xff] %vm1331_vm11, %v1594_v5  ;;  %v1554_v57 = vadd.f32 %v6104_v50, %v1553_v56 }
 0x282   : > { %4736 = vmatmul.mubr.msk.bf16.gmra.mrb[8].mxu1 %vm1331_vm11, %v1698_v59 }
 0x283   : > { %v1595_v26 = vpack.c.bf16 %v1559_v53, %v1554_v57  ;;  %v4691_v33 = vpop.f32.mrb[64].mxu0  ;;  %4739 = vmatprep.mubr.msk.bf16.mxu1 %vm1331_vm11, %v1699_v61 }
 0x284   : > { %v1569_v25 = vadd.f32 %v4691_v33, %v6104_v50  ;;  %v1563_v62 = vpop.f32.mrb[65].mxu0 }
 0x285   : > { %1611 = vst.msk [vmem:[#allocation5 + $0x68] sm:$0xff] %vm1331_vm11, %v1595_v26  ;;  %v1564_v14 = vadd.f32 %v6104_v50, %v1563_v62  ;;  %4786 = vmatmul.mubr.msk.bf16.gmra.mrb[120].mxu0 %vm1331_vm11, %v6088_v41  ;;  %v1702_v41 = vld [vmem:[#allocation5 + $0x38] sm:$0xff] }
 0x286   : > { %4789 = vmatprep.mubr.msk.bf16.mxu0 %vm1331_vm11, %v6095_v21  ;;  %v1703_v21 = vld [vmem:[#allocation5 + $0x40] sm:$0xff] }
 0x287   : > { %v1596_v35 = vpack.c.bf16 %v1569_v25, %v1564_v14  ;;  %v4694_v43 = vpop.f32.mrb[66].mxu0 }
 0x288   : > { %v1579_v15 = vadd.f32 %v4694_v43, %v6104_v50  ;;  %v1573_v31 = vpop.f32.mrb[67].mxu0 }
 0x289   : > { %1612 = vst.msk [vmem:[#allocation5 + $0x70] sm:$0xff] %vm1331_vm11, %v1596_v35  ;;  %v1574_v27 = vadd.f32 %v6104_v50, %v1573_v31  ;;  %v1704_v50 = vld [vmem:[#allocation5 + $0x48] sm:$0xff] }
 0x28a   : > { %4740 = vmatmul.mubr.msk.bf16.gmra.mrb[12].mxu1 %vm1331_vm11, %v1700_v2 }
 0x28b   : > { %v1597_v23 = vpack.c.bf16 %v1579_v15, %v1574_v27  ;;  %4743 = vmatprep.mubr.msk.bf16.mxu1 %vm1331_vm11, %v1701_v4 }
 0x28d   : > { %1613 = vst.msk [vmem:[#allocation5 + $0x78] sm:$0xff] %vm1331_vm11, %v1597_v23  ;;  %4790 = vmatmul.mubr.msk.bf16.gmra.mrb[124].mxu0 %vm1331_vm11, %v6107_v44  ;;  %v1706_v44 = vld [vmem:[#allocation5 + $0x58] sm:$0xff] }
 0x28e   : > { %4793 = vmatprep.mubr.msk.bf16.mxu0 %vm1331_vm11, %v6114_v47  ;;  %v1707_v47 = vld [vmem:[#allocation5 + $0x60] sm:$0xff] }
 0x292   : > { %4744 = vmatmul.mubr.msk.bf16.gmra.mrb[16].mxu1 %vm1331_vm11, %v1702_v41 }
 0x293   : > { %4747 = vmatprep.mubr.msk.bf16.mxu1 %vm1331_vm11, %v1703_v21 }
 0x294   : > { %v1710_v0 = vld [vmem:[#allocation5 + $0x78] sm:$0xff] }
 0x295   : > { %4794 = vmatmul.mubr.msk.bf16.gmra.mrb[128].mxu0 %vm1331_vm11, %v6121_v40  ;;  %v1708_v40 = vld [vmem:[#allocation5 + $0x68] sm:$0xff] }
 0x296   : > { %4833 = vmatprep.mubr.msk.bf16.mxu0 %vm1331_vm11, %v6130_v17  ;;  %v1709_v17 = vld [vmem:[#allocation5 + $0x70] sm:$0xff] }
 0x29a   : > { %4748 = vmatmul.mubr.msk.bf16.gmra.mrb[20].mxu1 %vm1331_vm11, %v1704_v50 }
 0x29b   : > { %4751 = vmatprep.mubr.msk.bf16.mxu1 %vm1331_vm11, %v1705_v32 }
 0x29d   : > { %4834 = vmatmul.mubr.msk.bf16.vlgmr.msra.gmra.mrb[132].mxu0 %vm1331_vm11, %v1696_v12 }
 0x29e   : > { %4837 = vmatprep.mubr.msk.bf16.mxu0 %vm1331_vm11, %v1697_v51 }
 0x2a2   : > { %4752 = vmatmul.mubr.msk.bf16.gmra.mrb[24].mxu1 %vm1331_vm11, %v1706_v44 }
 0x2a3   : > { %4755 = vmatprep.mubr.msk.bf16.mxu1 %vm1331_vm11, %v1707_v47 }
 0x2a5   : > { %4838 = vmatmul.mubr.msk.bf16.gmra.mrb[136].mxu0 %vm1331_vm11, %v1698_v59 }
 0x2a6   : > { %4841 = vmatprep.mubr.msk.bf16.mxu0 %vm1331_vm11, %v1699_v61 }
 0x2aa   : > { %4756 = vmatmul.mubr.msk.bf16.gmra.mrb[28].mxu1 %vm1331_vm11, %v1708_v40 }
 0x2ab   : > { %4759 = vmatprep.mubr.msk.bf16.mxu1 %vm1331_vm11, %v1709_v17 }
 0x2ad   : > { %4842 = vmatmul.mubr.msk.bf16.gmra.mrb[140].mxu0 %vm1331_vm11, %v1700_v2 }
 0x2ae   : > { %4845 = vmatprep.mubr.msk.bf16.mxu0 %vm1331_vm11, %v1701_v4 }
 0x2b2   : > { %4760 = vmatmul.mubr.msk.bf16.gmra.mrb[32].mxu1 %vm1331_vm11, %v1710_v0 }
 0x2b5   : > { %4846 = vmatmul.mubr.msk.bf16.gmra.mrb[144].mxu0 %vm1331_vm11, %v1702_v41 }
 0x2b6   : > { %4849 = vmatprep.mubr.msk.bf16.mxu0 %vm1331_vm11, %v1703_v21 }
 0x2bd   : > { %4850 = vmatmul.mubr.msk.bf16.gmra.mrb[148].mxu0 %vm1331_vm11, %v1704_v50 }
 0x2be   : > { %4853 = vmatprep.mubr.msk.bf16.mxu0 %vm1331_vm11, %v1705_v32 }
 0x2c5   : > { %4854 = vmatmul.mubr.msk.bf16.gmra.mrb[152].mxu0 %vm1331_vm11, %v1706_v44 }
 0x2c6   : > { %4857 = vmatprep.mubr.msk.bf16.mxu0 %vm1331_vm11, %v1707_v47 }
 0x2cd   : > { %4858 = vmatmul.mubr.msk.bf16.gmra.mrb[156].mxu0 %vm1331_vm11, %v1708_v40 }
 0x2ce   : > { %4861 = vmatprep.mubr.msk.bf16.mxu0 %vm1331_vm11, %v1709_v17 }
 0x2d5   : > { %4862 = vmatmul.mubr.msk.bf16.gmra.mrb[160].mxu0 %vm1331_vm11, %v1710_v0 }
 0x2d8   : > { %v6239_v24 = vpop.f32.mrb[68].mxu0 }
 0x2d9   : > { %v6241_v9 = vpop.f32.mrb[69].mxu0 }
 0x2da   : > { %v6243_v37 = vpop.f32.mrb[70].mxu0 }
 0x2db   : > { %v6245_v6 = vpop.f32.mrb[71].mxu0 }
 0x2e8   : > { %v6247_v8 = vpop.f32.mrb[72].mxu0 }
 0x2e9   : > { %v1932_v22 = vmax.f32 %v6239_v24, %v6247_v8  ;;  %v6251_v13 = vpop.f32.mrb[73].mxu0 }
 0x2ea   : > { %v1930_v60 = vmax.f32 %v6241_v9, %v6251_v13  ;;  %v6255_v63 = vpop.f32.mrb[74].mxu0 }
 0x2eb   : > { %v1933_v11 = vmax.f32 %v6243_v37, %v6255_v63  ;;  %v6259_v39 = vpop.f32.mrb[75].mxu0 }
 0x2ec   : > { %v1931_v19 = vmax.f32 %v6245_v6, %v6259_v39 }
 0x2f8   : > { %v6263_v10 = vpop.f32.mrb[76].mxu0 }
 0x2f9   : > { %v1936_v20 = vmax.f32 %v1932_v22, %v6263_v10  ;;  %v6266_v18 = vpop.f32.mrb[77].mxu0 }
 0x2fa   : > { %v1934_v28 = vmax.f32 %v1930_v60, %v6266_v18  ;;  %v6269_v16 = vpop.f32.mrb[78].mxu0 }
 0x2fb   : > { %v1937_v29 = vmax.f32 %v1933_v11, %v6269_v16  ;;  %v6272_v1 = vpop.f32.mrb[79].mxu0 }
 0x2fc   : > { %v1935_v49 = vmax.f32 %v1931_v19, %v6272_v1 }
 0x308   : > { %v6275_v58 = vpop.f32.mrb[80].mxu0 }
 0x309   : > { %v1940_v3 = vmax.f32 %v1936_v20, %v6275_v58  ;;  %v6278_v7 = vpop.f32.mrb[81].mxu0 }
 0x30a   : > { %v1938_v45 = vmax.f32 %v1934_v28, %v6278_v7  ;;  %v6281_v52 = vpop.f32.mrb[82].mxu0 }
 0x30b   : > { %v1941_v54 = vmax.f32 %v1937_v29, %v6281_v52  ;;  %v6284_v55 = vpop.f32.mrb[83].mxu0 }
 0x30c   : > { %v1939_v34 = vmax.f32 %v1935_v49, %v6284_v55 }
 0x310   : > { %v6287_v12 = vpop.f32.mrb[84].mxu0 }
 0x311   : > { %v1944_v51 = vmax.f32 %v1940_v3, %v6287_v12  ;;  %v6290_v30 = vpop.f32.mrb[85].mxu0 }
 0x312   : > { %v1942_v36 = vmax.f32 %v1938_v45, %v6290_v30  ;;  %v6293_v38 = vpop.f32.mrb[86].mxu0 }
 0x313   : > { %v1945_v42 = vmax.f32 %v1941_v54, %v6293_v38  ;;  %v6296_v46 = vpop.f32.mrb[87].mxu0 }
 0x314   : > { %v1943_v5 = vmax.f32 %v1939_v34, %v6296_v46 }
 0x318   : > { %v6299_v48 = vpop.f32.mrb[88].mxu0 }
 0x319   : > { %v1948_v53 = vmax.f32 %v1944_v51, %v6299_v48  ;;  %v6302_v56 = vpop.f32.mrb[89].mxu0 }
 0x31a   : > { %v1946_v57 = vmax.f32 %v1942_v36, %v6302_v56  ;;  %v6305_v59 = vpop.f32.mrb[90].mxu0 }
 0x31b   : > { %v1949_v61 = vmax.f32 %v1945_v42, %v6305_v59  ;;  %v6308_v26 = vpop.f32.mrb[91].mxu0 }
 0x31c   : > { %v1947_v33 = vmax.f32 %v1943_v5, %v6308_v26 }
 0x320   : > { %v6311_v25 = vpop.f32.mrb[92].mxu0 }
 0x321   : > { %v1952_v62 = vmax.f32 %v1948_v53, %v6311_v25  ;;  %v6314_v14 = vpop.f32.mrb[93].mxu0 }
 0x322   : > { %v1950_v35 = vmax.f32 %v1946_v57, %v6314_v14  ;;  %v6317_v43 = vpop.f32.mrb[94].mxu0 }
 0x323   : > { %v1953_v15 = vmax.f32 %v1949_v61, %v6317_v43  ;;  %v6320_v31 = vpop.f32.mrb[95].mxu0 }
 0x324   : > { %v1951_v27 = vmax.f32 %v1947_v33, %v6320_v31 }
 0x328   : > { %v6323_v2 = vpop.f32.mrb[96].mxu0 }
 0x329   : > { %v1956_v4 = vmax.f32 %v1952_v62, %v6323_v2  ;;  %v6326_v23 = vpop.f32.mrb[97].mxu0 }
 0x32a   : > { %v1954_v41 = vmax.f32 %v1950_v35, %v6326_v23  ;;  %v6329_v21 = vpop.f32.mrb[98].mxu0 }
 0x32b   : > { %v1957_v50 = vmax.f32 %v1953_v15, %v6329_v21  ;;  %v6332_v32 = vpop.f32.mrb[99].mxu0 }
 0x32c   : > { %v1955_v44 = vmax.f32 %v1951_v27, %v6332_v32 }
 0x32d   : > { %v1959_v47 = vmax.f32 %v1956_v4, %v1957_v50 }
 0x32e   : > { %v1958_v40 = vmax.f32 %v1954_v41, %v1955_v44 }
 0x330   : > { %v1960_v17 = vmax.f32 %v1958_v40, %v1959_v47  ;;  %v6335_v0 = vpop.f32.mrb[100].mxu0 }
 0x331   : > { %v6337_v22 = vpop.f32.mrb[101].mxu0 }
 0x332   : > { %v1961_v60 = vrot.slane %v1960_v17, 4  ;;  %v6339_v11 = vpop.f32.mrb[102].mxu0 }
 0x333   : > { %v6341_v19 = vpop.f32.mrb[103].mxu0 }
 0x334   : > { %v1962_v20 = vmax.f32 %v1960_v17, %v1961_v60 }
 0x336   : > { %v1963_v28 = vrot.slane %v1962_v20, 2 }
 0x338   : > { %v1964_v29 = vmax.f32 %v1962_v20, %v1963_v28  ;;  %v6343_v49 = vpop.f32.mrb[104].mxu0 }
 0x339   : > { %v2697_v3 = vmax.f32 %v6335_v0, %v6343_v49  ;;  %v6347_v45 = vpop.f32.mrb[105].mxu0 }
 0x33a   : > { %v1965_v54 = vrot.slane %v1964_v29, 1  ;;  %v2695_v34 = vmax.f32 %v6337_v22, %v6347_v45  ;;  %v6351_v51 = vpop.f32.mrb[106].mxu0 }
 0x33b   : > { %v2698_v36 = vmax.f32 %v6339_v11, %v6351_v51  ;;  %v6355_v42 = vpop.f32.mrb[107].mxu0 }
 0x33c   : > { %v6357_v5 = vmax.f32 %v1964_v29, %v1965_v54  ;;  %v2696_v53 = vmax.f32 %v6341_v19, %v6355_v42 }
 0x33e   : > { %v1967_v57 = vsub.f32 %v6241_v9, %v6357_v5  ;;  %v1968_v61 = vsub.f32 %v6245_v6, %v6357_v5  ;;  %v1969_v33 = vsub.f32 %v6239_v24, %v6357_v5  ;;  %v1970_v62 = vsub.f32 %v6243_v37, %v6357_v5 }
 0x33f   : > { %v1971_v35 = vsub.f32 %v6251_v13, %v6357_v5  ;;  %v1972_v15 = vsub.f32 %v6259_v39, %v6357_v5  ;;  %v1973_v27 = vsub.f32 %v6247_v8, %v6357_v5  ;;  %v1974_v9 = vsub.f32 %v6255_v63, %v6357_v5 }
 0x340   : > { %v1975_v6 = vsub.f32 %v6266_v18, %v6357_v5  ;;  %v1976_v24 = vsub.f32 %v6272_v1, %v6357_v5  ;;  %v1977_v37 = vsub.f32 %v6263_v10, %v6357_v5  ;;  %v1978_v13 = vsub.f32 %v6269_v16, %v6357_v5  ;;  %v6385_v4 = vpop.f32.mrb[108].mxu0 }
 0x341   : > { %v1979_v8 = vsub.f32 %v6278_v7, %v6357_v5  ;;  %v1980_v63 = vsub.f32 %v6284_v55, %v6357_v5  ;;  %v1981_v39 = vsub.f32 %v6275_v58, %v6357_v5  ;;  %v1982_v18 = vsub.f32 %v6281_v52, %v6357_v5  ;;  %v6395_v1 = vpop.f32.mrb[109].mxu0 }
 0x342   : > { %v1983_v10 = vsub.f32 %v6290_v30, %v6357_v5  ;;  %v1984_v16 = vsub.f32 %v6296_v46, %v6357_v5  ;;  %v1985_v7 = vsub.f32 %v6287_v12, %v6357_v5  ;;  %v1986_v55 = vsub.f32 %v6293_v38, %v6357_v5  ;;  %v6405_v41 = vpop.f32.mrb[110].mxu0 }
 0x343   : > { %v1987_v58 = vsub.f32 %v6302_v56, %v6357_v5  ;;  %v1988_v52 = vsub.f32 %v6308_v26, %v6357_v5  ;;  %v1989_v30 = vsub.f32 %v6299_v48, %v6357_v5  ;;  %v1990_v46 = vsub.f32 %v6305_v59, %v6357_v5  ;;  %v6415_v50 = vpop.f32.mrb[111].mxu0 }
 0x344   : > { %v1999_v60 = vmul.f32 1.442695, %v1967_v57  ;;  %v2001_v20 = vmul.f32 1.442695, %v1968_v61  ;;  %v2003_v28 = vmul.f32 1.442695, %v1969_v33  ;;  %v2701_v29 = vmax.f32 %v2697_v3, %v6385_v4 }
 0x345   : > { %v2005_v54 = vmul.f32 1.442695, %v1970_v62  ;;  %v6435_v26 = vmax.f32 %v2695_v34, %v6395_v1  ;;  %v2007_v44 = vmul.f32 1.442695, %v1971_v35  ;;  %v2009_v56 = vmul.f32 1.442695, %v1972_v15 }
 0x346   : > { %5089 = vpow2.f32 %v1999_v60  ;;  %v2011_v47 = vmul.f32 1.442695, %v1973_v27  ;;  %v2013_v40 = vmul.f32 1.442695, %v1974_v9  ;;  %v2015_v38 = vmul.f32 1.442695, %v1975_v6 }
 0x347   : > { %5091 = vpow2.f32 %v2001_v20  ;;  %v2017_v57 = vmul.f32 1.442695, %v1976_v24  ;;  %v2019_v61 = vmul.f32 1.442695, %v1977_v37  ;;  %v2021_v33 = vmul.f32 1.442695, %v1978_v13 }
 0x348   : > { %5093 = vpow2.f32 %v2003_v28  ;;  %v2023_v3 = vmul.f32 1.442695, %v1979_v8  ;;  %v2025_v62 = vmul.f32 1.442695, %v1980_v63  ;;  %v2027_v34 = vmul.f32 1.442695, %v1981_v39 }
 0x349   : > { %5095 = vpow2.f32 %v2005_v54  ;;  %v2029_v60 = vmul.f32 1.442695, %v1982_v18  ;;  %v2031_v35 = vmul.f32 1.442695, %v1983_v10  ;;  %v2702_v15 = vmax.f32 %v2698_v36, %v6405_v41  ;;  %v6441_v27 = vpop.f32.mrb[112].mxu0 }
 0x34a   : > { %5097 = vpow2.f32 %v2007_v44  ;;  %v2033_v6 = vmul.f32 1.442695, %v1984_v16  ;;  %v2700_v24 = vmax.f32 %v2696_v53, %v6415_v50  ;;  %v2705_v37 = vmax.f32 %v2701_v29, %v6441_v27  ;;  %v6450_v13 = vpop.f32.mrb[113].mxu0 }
 0x34b   : > { %5099 = vpow2.f32 %v2009_v56  ;;  %v2035_v36 = vmul.f32 1.442695, %v1985_v7  ;;  %v2037_v39 = vmul.f32 1.442695, %v1986_v55  ;;  %v2703_v18 = vmax.f32 %v6435_v26, %v6450_v13  ;;  %v6458_v10 = vpop.f32.mrb[114].mxu0 }
 0x34c   : > { %5101 = vpow2.f32 %v2011_v47  ;;  %v2039_v53 = vmul.f32 1.442695, %v1987_v58  ;;  %v2041_v56 = vmul.f32 1.442695, %v1988_v52  ;;  %v2706_v44 = vmax.f32 %v2702_v15, %v6458_v10  ;;  %v6465_v47 = vpop.f32.mrb[115].mxu0 }
 0x34d   : > { %5103 = vpow2.f32 %v2013_v40  ;;  %v6443_v9 = vpop.f32.mrb[4].mxu1  ;;  %v2704_v26 = vmax.f32 %v2700_v24, %v6465_v47  ;;  %v2043_v28 = vmul.f32 1.442695, %v1989_v30  ;;  %v2045_v29 = vmul.f32 1.442695, %v1990_v46 }
 0x34e   : > { %5105 = vpow2.f32 %v2015_v38  ;;  %8446 = vst [vmem:[#allocation6_spill] sm:$0xff] %v6443_v9  ;;  %v6452_v8 = vpop.f32.mrb[5].mxu1 }
 0x34f   : > { %5107 = vpow2.f32 %v2017_v57  ;;  %8447 = vst [vmem:[#allocation7_spill] sm:$0xff] %v6452_v8  ;;  %v6460_v16 = vpop.f32.mrb[6].mxu1 }
 0x350   : > { %v6454_v63 = vpop.eup %5089  ;;  %5109 = vpow2.f32 %v2019_v61  ;;  %8449 = vst [vmem:[#allocation9_spill] sm:$0xff] %v6460_v16  ;;  %v6467_v40 = vpop.f32.mrb[7].mxu1 }
 0x351   : > { %8448 = vst [vmem:[#allocation8_spill] sm:$0xff] %v6454_v63  ;;  %v6462_v38 = vpop.eup %5091  ;;  %5111 = vpow2.f32 %v2021_v33  ;;  %8451 = vst [vmem:[#allocation11_spill] sm:$0xff] %v6467_v40  ;;  %v6474_v20 = vpop.f32.mrb[116].mxu0 }
 0x352   : > { %8450 = vst [vmem:[#allocation10_spill] sm:$0xff] %v6462_v38  ;;  %v6469_v7 = vpop.eup %5093  ;;  %5113 = vpow2.f32 %v2023_v3  ;;  %v2063_v55 = vadd.f32 %v6462_v38, %v6454_v63  ;;  %v6487_v54 = vmax.f32 %v2705_v37, %v6474_v20  ;;  %v6489_v57 = vpop.f32.mrb[117].mxu0 }
 0x353   : > { %8452 = vst [vmem:[#allocation12_spill] sm:$0xff] %v6469_v7  ;;  %v6478_v52 = vpop.eup %5095  ;;  %5115 = vpow2.f32 %v2025_v62  ;;  %v6497_v62 = vmax.f32 %v2703_v18, %v6489_v57  ;;  %v6499_v48 = vpop.f32.mrb[118].mxu0 }
 0x354   : > { %8453 = vst [vmem:[#allocation13_spill] sm:$0xff] %v6478_v52  ;;  %v6493_v33 = vpop.eup %5097  ;;  %5117 = vpow2.f32 %v2027_v34  ;;  %v2064_v3 = vadd.f32 %v6469_v7, %v2063_v55  ;;  %v6508_v15 = vmax.f32 %v2706_v44, %v6499_v48  ;;  %v6510_v24 = vpop.f32.mrb[119].mxu0 }
 0x355   : > { %v6491_v61 = vpop.f32.mrb[8].mxu1  ;;  %8455 = vst [vmem:[#allocation15_spill] sm:$0xff] %v6493_v33  ;;  %v6505_v46 = vpop.eup %5099  ;;  %5119 = vpow2.f32 %v2029_v60  ;;  %v6522_v60 = vmax.f32 %v2704_v26, %v6510_v24 }
 0x356   : > { %8454 = vst [vmem:[#allocation14_spill] sm:$0xff] %v6491_v61  ;;  %v2337_v59 = vmax.f32 %v6443_v9, %v6491_v61  ;;  %v6503_v30 = vpop.f32.mrb[9].mxu1  ;;  %8457 = vst [vmem:[#allocation17_spill] sm:$0xff] %v6505_v46  ;;  %v6518_v55 = vpop.eup %5101  ;;  %5121 = vpow2.f32 %v2031_v35  ;;  %v2065_v58 = vadd.f32 %v6478_v52, %v2064_v3 }
 0x357   : > { %8456 = vst [vmem:[#allocation16_spill] sm:$0xff] %v6503_v30  ;;  %v2335_v34 = vmax.f32 %v6452_v8, %v6503_v30  ;;  %v6514_v37 = vpop.f32.mrb[10].mxu1  ;;  %8459 = vst [vmem:[#allocation19_spill] sm:$0xff] %v6518_v55  ;;  %v6530_v63 = vpop.eup %5103  ;;  %5123 = vpow2.f32 %v2033_v6 }
 0x358   : > { %8458 = vst [vmem:[#allocation18_spill] sm:$0xff] %v6514_v37  ;;  %v2338_v44 = vmax.f32 %v6460_v16, %v6514_v37  ;;  %v6526_v17 = vpop.f32.mrb[11].mxu1  ;;  %v6528_v12 = vpop.f32.mrb[120].mxu0  ;;  %8461 = vst [vmem:[#allocation21_spill] sm:$0xff] %v6530_v63  ;;  %5125 = vpow2.f32 %v2035_v36  ;;  %v2066_v52 = vadd.f32 %v6493_v33, %v2065_v58  ;;  %v8465_v36 = vsub.f32 %v6320_v31, %v6357_v5 }
 0x359   : > { %8460 = vst [vmem:[#allocation20_spill] sm:$0xff] %v6526_v17  ;;  %v2336_v18 = vmax.f32 %v6467_v40, %v6526_v17  ;;  %v2713_v35 = vmax.f32 %v6487_v54, %v6528_v12  ;;  %v6536_v3 = vpop.f32.mrb[121].mxu0  ;;  %v6540_v7 = vpop.eup %5105  ;;  %5127 = vpow2.f32 %v2037_v39  ;;  %v8464_v54 = vsub.f32 %v6314_v14, %v6357_v5 }
 0x35a   : > { %8462 = vst [vmem:[#allocation22_spill] sm:$0xff] %v6540_v7  ;;  %v2711_v38 = vmax.f32 %v6497_v62, %v6536_v3  ;;  %v6545_v6 = vpop.f32.mrb[122].mxu0  ;;  %v6549_v61 = vpop.eup %5107  ;;  %v2049_v17 = vmul.f32 1.442695, %v8465_v36  ;;  %5129 = vpow2.f32 %v2039_v53  ;;  %v2067_v37 = vadd.f32 %v6505_v46, %v2066_v52 }
 0x35b   : > { %8463 = vst [vmem:[#allocation23_spill] sm:$0xff] %v6549_v61  ;;  %v2047_v26 = vmul.f32 1.442695, %v8464_v54  ;;  %v2714_v58 = vmax.f32 %v6508_v15, %v6545_v6  ;;  %v6559_v62 = vpop.f32.mrb[123].mxu0  ;;  %v6561_v33 = vpop.eup %5109  ;;  %5131 = vpow2.f32 %v2041_v56  ;;  %v8468_v31 = vsub.f32 %v6311_v25, %v6357_v5 }
 0x35c   : > { %8466 = vst [vmem:[#allocation24_spill] sm:$0xff] %v6561_v33  ;;  %v2712_v39 = vmax.f32 %v6522_v60, %v6559_v62  ;;  %v6568_v54 = vpop.eup %5111  ;;  %v8469_v36 = vsub.f32 %v6317_v43, %v6357_v5  ;;  %5133 = vpow2.f32 %v2043_v28  ;;  %v2068_v60 = vadd.f32 %v6518_v55, %v2067_v37 }
 0x35d   : > { %8467 = vst [vmem:[#allocation25_spill] sm:$0xff] %v6568_v54  ;;  %v2051_v15 = vmul.f32 1.442695, %v8468_v31  ;;  %v6576_v53 = vpop.f32.mrb[12].mxu1  ;;  %v6578_v52 = vpop.eup %5113  ;;  %5135 = vpow2.f32 %v2045_v29  ;;  %v8474_v43 = vsub.f32 %v6326_v23, %v6357_v5  ;;  %v8475_v28 = vsub.f32 %v6332_v32, %v6357_v5 }
 0x35e   : > { %v2053_v30 = vmul.f32 1.442695, %v8469_v36  ;;  %8470 = vst [vmem:[#allocation26_spill] sm:$0xff] %v6576_v53  ;;  %8471 = vst [vmem:[#allocation27_spill] sm:$0xff] %v6578_v52  ;;  %v6582_v14 = vmax.f32 %v2337_v59, %v6576_v53  ;;  %v6584_v46 = vpop.f32.mrb[13].mxu1  ;;  %v6588_v56 = vpop.eup %5115  ;;  %5137 = vpow2.f32 %v2047_v26  ;;  %v2069_v25 = vadd.f32 %v6530_v63, %v2068_v60 }
 0x35f   : > { %8472 = vst [vmem:[#allocation28_spill] sm:$0xff] %v6584_v46  ;;  %8473 = vst [vmem:[#allocation29_spill] sm:$0xff] %v6588_v56  ;;  %v2055_v31 = vmul.f32 1.442695, %v8474_v43  ;;  %v2057_v36 = vmul.f32 1.442695, %v8475_v28  ;;  %v6597_v37 = vmax.f32 %v2335_v34, %v6584_v46  ;;  %v6601_v55 = vpop.eup %5117  ;;  %5139 = vpow2.f32 %v2049_v17 }
 0x360   : > { %v6599_v59 = vpop.f32.mrb[14].mxu1  ;;  %8477 = vst [vmem:[#allocation31_spill] sm:$0xff] %v6601_v55  ;;  %v6609_v23 = vpop.f32.mrb[124].mxu0  ;;  %v8480_v34 = vsub.f32 %v6323_v2, %v6357_v5  ;;  %5141 = vpow2.f32 %v2051_v15 }
 0x361   : > { %8476 = vst [vmem:[#allocation30_spill] sm:$0xff] %v6599_v59  ;;  %v6605_v29 = vmax.f32 %v2338_v44, %v6599_v59  ;;  %v6607_v53 = vpop.f32.mrb[15].mxu1  ;;  %v6613_v43 = vpop.eup %5119  ;;  %v2717_v44 = vmax.f32 %v2713_v35, %v6609_v23  ;;  %v2070_v59 = vadd.f32 %v6540_v7, %v2069_v25  ;;  %5143 = vpow2.f32 %v2053_v30 }
 0x362   : > { %8478 = vst [vmem:[#allocation32_spill] sm:$0xff] %v6607_v53  ;;  %8479 = vst [vmem:[#allocation33_spill] sm:$0xff] %v6613_v43  ;;  %v2059_v28 = vmul.f32 1.442695, %v8480_v34  ;;  %v6619_v26 = vmax.f32 %v2336_v18, %v6607_v53  ;;  %v6622_v60 = vpop.f32.mrb[125].mxu0  ;;  %v6624_v63 = vpop.eup %5121  ;;  %v8484_v18 = vsub.f32 %v6329_v21, %v6357_v5  ;;  %5145 = vpow2.f32 %v2055_v31 }
 0x363   : > { %8481 = vst [vmem:[#allocation34_spill] sm:$0xff] %v6624_v63  ;;  %v2715_v32 = vmax.f32 %v2711_v38, %v6622_v60  ;;  %v6628_v46 = vpop.f32.mrb[126].mxu0  ;;  %v6632_v17 = vpop.eup %5123  ;;  %v2071_v38 = vadd.f32 %v6549_v61, %v2070_v59  ;;  %5147 = vpow2.f32 %v2057_v36 }
 0x364   : > { %8482 = vst [vmem:[#allocation35_spill] sm:$0xff] %v6628_v46  ;;  %8483 = vst [vmem:[#allocation36_spill] sm:$0xff] %v6632_v17  ;;  %v2061_v35 = vmul.f32 1.442695, %v8484_v18  ;;  %v2718_v34 = vmax.f32 %v2714_v58, %v6628_v46  ;;  %v6638_v53 = vpop.f32.mrb[127].mxu0  ;;  %v6640_v15 = vpop.eup %5125  ;;  %5149 = vpow2.f32 %v2059_v28 }
 0x365   : > { %8485 = vst [vmem:[#allocation37_spill] sm:$0xff] %v6640_v15  ;;  %v2716_v25 = vmax.f32 %v2712_v39, %v6638_v53  ;;  %v6646_v7 = vpop.eup %5127  ;;  %v6648_v30 = vpop.f32.mrb[16].mxu1  ;;  %v2072_v5 = vadd.f32 %v6561_v33, %v2071_v38 }
 0x366   : > { %8486 = vst [vmem:[#allocation38_spill] sm:$0xff] %v6646_v7  ;;  %8487 = vst [vmem:[#allocation39_spill] sm:$0xff] %v6648_v30  ;;  %v6650_v21 = vpop.eup %5129  ;;  %v2345_v58 = vmax.f32 %v6582_v14, %v6648_v30  ;;  %v6655_v31 = vpop.f32.mrb[17].mxu1  ;;  %5151 = vpow2.f32 %v2061_v35 }
 0x367   : > { %8488 = vst [vmem:[#allocation40_spill] sm:$0xff] %v6650_v21  ;;  %8489 = vst [vmem:[#allocation41_spill] sm:$0xff] %v6655_v31  ;;  %v6659_v59 = vpop.eup %5131  ;;  %v2343_v36 = vmax.f32 %v6597_v37, %v6655_v31  ;;  %v6663_v18 = vpop.f32.mrb[18].mxu1  ;;  %v2073_v28 = vadd.f32 %v6568_v54, %v2072_v5 }
 0x368   : > { %8490 = vst [vmem:[#allocation42_spill] sm:$0xff] %v6659_v59  ;;  %8491 = vst [vmem:[#allocation43_spill] sm:$0xff] %v6663_v18  ;;  %v6665_v2 = vpop.eup %5133  ;;  %v2346_v14 = vmax.f32 %v6605_v29, %v6663_v18  ;;  %v6670_v38 = vpop.f32.mrb[19].mxu1 }
 0x369   : > { %8492 = vst [vmem:[#allocation44_spill] sm:$0xff] %v6665_v2  ;;  %8493 = vst [vmem:[#allocation45_spill] sm:$0xff] %v6670_v38  ;;  %v6672_v33 = vpop.f32.mrb[128].mxu0  ;;  %v6676_v35 = vpop.eup %5135  ;;  %v2344_v37 = vmax.f32 %v6619_v26, %v6670_v38  ;;  %v2074_v29 = vadd.f32 %v6578_v52, %v2073_v28 }
 0x36a   : > { %8494 = vst [vmem:[#allocation46_spill] sm:$0xff] %v6672_v33  ;;  %8495 = vst [vmem:[#allocation47_spill] sm:$0xff] %v6676_v35  ;;  %v2721_v61 = vmax.f32 %v2717_v44, %v6672_v33  ;;  %v6681_v30 = vpop.f32.mrb[129].mxu0  ;;  %v6683_v5 = vpop.eup %5137 }
 0x36b   : > { %8496 = vst [vmem:[#allocation48_spill] sm:$0xff] %v6681_v30  ;;  %8497 = vst [vmem:[#allocation49_spill] sm:$0xff] %v6683_v5  ;;  %v2719_v54 = vmax.f32 %v2715_v32, %v6681_v30  ;;  %v6687_v18 = vpop.f32.mrb[130].mxu0  ;;  %v6691_v31 = vpop.eup %5139  ;;  %v2075_v38 = vadd.f32 %v6588_v56, %v2074_v29 }
 0x36c   : > { %8498 = vst [vmem:[#allocation50_spill] sm:$0xff] %v6687_v18  ;;  %8499 = vst [vmem:[#allocation51_spill] sm:$0xff] %v6691_v31  ;;  %v2722_v16 = vmax.f32 %v2718_v34, %v6687_v18  ;;  %v6694_v26 = vpop.f32.mrb[131].mxu0  ;;  %v6696_v44 = vpop.eup %5141 }
 0x36d   : > { %8500 = vst [vmem:[#allocation52_spill] sm:$0xff] %v6694_v26  ;;  %8501 = vst [vmem:[#allocation53_spill] sm:$0xff] %v6696_v44  ;;  %v2720_v9 = vmax.f32 %v2716_v25, %v6694_v26  ;;  %v6702_v28 = vpop.eup %5143  ;;  %v6704_v40 = vpop.f32.mrb[20].mxu1  ;;  %v2076_v34 = vadd.f32 %v6601_v55, %v2075_v38 }
 0x36e   : > { %8502 = vst [vmem:[#allocation54_spill] sm:$0xff] %v6702_v28  ;;  %v2724_v52 = vmax.f32 %v2721_v61, %v2722_v16  ;;  %8503 = vst [vmem:[#allocation55_spill] sm:$0xff] %v6704_v40  ;;  %v6706_v39 = vpop.eup %5145  ;;  %v6710_v18 = vmax.f32 %v2345_v58, %v6704_v40  ;;  %v6712_v33 = vpop.f32.mrb[21].mxu1 }
 0x36f   : > { %8504 = vst [vmem:[#allocation56_spill] sm:$0xff] %v6706_v39  ;;  %v2723_v8 = vmax.f32 %v2719_v54, %v2720_v9  ;;  %8505 = vst [vmem:[#allocation57_spill] sm:$0xff] %v6712_v33  ;;  %v6716_v29 = vpop.eup %5147  ;;  %v6719_v32 = vmax.f32 %v2343_v36, %v6712_v33  ;;  %v6721_v16 = vpop.f32.mrb[22].mxu1  ;;  %v2077_v38 = vadd.f32 %v6613_v43, %v2076_v34 }
 0x370   : > { %8506 = vst [vmem:[#allocation58_spill] sm:$0xff] %v6716_v29  ;;  %8507 = vst [vmem:[#allocation59_spill] sm:$0xff] %v6721_v16  ;;  %v6723_v61 = vpop.eup %5149  ;;  %v6727_v54 = vmax.f32 %v2346_v14, %v6721_v16  ;;  %v6729_v58 = vpop.f32.mrb[23].mxu1 }
 0x371   : > { %8508 = vst [vmem:[#allocation60_spill] sm:$0xff] %v6723_v61  ;;  %v2725_v9 = vmax.f32 %v2723_v8, %v2724_v52  ;;  %8509 = vst [vmem:[#allocation61_spill] sm:$0xff] %v6729_v58  ;;  %v6731_v55 = vpop.f32.mrb[132].mxu0  ;;  %v6735_v56 = vpop.eup %5151  ;;  %v6738_v36 = vmax.f32 %v2344_v37, %v6729_v58  ;;  %v2078_v34 = vadd.f32 %v6624_v63, %v2077_v38 }
 0x372   : > { %8510 = vst [vmem:[#allocation62_spill] sm:$0xff] %v6731_v55  ;;  %8511 = vst [vmem:[#allocation63_spill] sm:$0xff] %v6735_v56  ;;  %v6740_v40 = vpop.f32.mrb[133].mxu0 }
 0x373   : > { %8512 = vst [vmem:[#allocation64_spill] sm:$0xff] %v6740_v40  ;;  %v2726_v8 = vrot.slane %v2725_v9, 4  ;;  %v6743_v52 = vpop.f32.mrb[134].mxu0  ;;  %v2079_v16 = vadd.f32 %v6632_v17, %v2078_v34 }
 0x374   : > { %8513 = vst [vmem:[#allocation65_spill] sm:$0xff] %v6743_v52  ;;  %v6747_v43 = vpop.f32.mrb[135].mxu0 }
 0x375   : > { %8514 = vst [vmem:[#allocation66_spill] sm:$0xff] %v6747_v43  ;;  %v2727_v25 = vmax.f32 %v2725_v9, %v2726_v8  ;;  %v6750_v33 = vpop.f32.mrb[24].mxu1  ;;  %v2080_v37 = vadd.f32 %v6640_v15, %v2079_v16 }
 0x376   : > { %v6755_v38 = vpop.f32.mrb[25].mxu1 }
 0x377   : > { %v2728_v58 = vrot.slane %v2727_v25, 2  ;;  %v6759_v39 = vpop.f32.mrb[26].mxu1  ;;  %v2081_v14 = vadd.f32 %v6646_v7, %v2080_v37 }
 0x378   : > { %v6764_v34 = vpop.f32.mrb[27].mxu1  ;;  %v6766_v16 = vpop.f32.mrb[136].mxu0 }
 0x379   : > { %v2729_v56 = vmax.f32 %v2727_v25, %v2728_v58  ;;  %8515 = vst [vmem:[#allocation67_spill] sm:$0xff] %v6766_v16  ;;  %v6772_v15 = vpop.f32.mrb[137].mxu0  ;;  %v2082_v63 = vadd.f32 %v6650_v21, %v2081_v14 }
 0x37a   : > { %8516 = vst [vmem:[#allocation68_spill] sm:$0xff] %v6772_v15  ;;  %v6777_v58 = vpop.f32.mrb[138].mxu0 }
 0x37b   : > { %v2730_v17 = vrot.slane %v2729_v56, 1  ;;  %8517 = vst [vmem:[#allocation69_spill] sm:$0xff] %v6777_v58  ;;  %v6781_v9 = vpop.f32.mrb[139].mxu0  ;;  %v2083_v8 = vadd.f32 %v6659_v59, %v2082_v63 }
 0x37c   : > { %8518 = vst [vmem:[#allocation70_spill] sm:$0xff] %v6781_v9 }
 0x37d   : > { %v6784_v7 = vmax.f32 %v2729_v56, %v2730_v17  ;;  %v6788_v16 = vpop.f32.mrb[28].mxu1  ;;  %v2084_v14 = vadd.f32 %v6665_v2, %v2083_v8 }
 0x37e   : > { %8519 = vst [vmem:[#allocation71_spill] sm:$0xff] %v6788_v16  ;;  %v6797_v58 = vpop.f32.mrb[29].mxu1 }
 0x37f   : > { %v2732_v25 = vsub.f32 %v6337_v22, %v6784_v7  ;;  %v2733_v21 = vsub.f32 %v6341_v19, %v6784_v7  ;;  %v2734_v37 = vsub.f32 %v6335_v0, %v6784_v7  ;;  %v2735_v63 = vsub.f32 %v6339_v11, %v6784_v7  ;;  %v6807_v8 = vpop.f32.mrb[30].mxu1 }
 0x380   : > { %v2736_v56 = vsub.f32 %v6347_v45, %v6784_v7  ;;  %v2737_v17 = vsub.f32 %v6355_v42, %v6784_v7  ;;  %v2738_v22 = vsub.f32 %v6343_v49, %v6784_v7  ;;  %8520 = vst [vmem:[#allocation72_spill] sm:$0xff] %v6807_v8  ;;  %v2085_v19 = vadd.f32 %v6676_v35, %v2084_v14  ;;  %v6816_v45 = vpop.f32.mrb[31].mxu1  ;;  %v6818_v2 = vpop.f32.mrb[140].mxu0 }
 0x381   : > { %v2739_v0 = vsub.f32 %v6351_v51, %v6784_v7  ;;  %v2740_v29 = vsub.f32 %v6395_v1, %v6784_v7  ;;  %v2741_v11 = vsub.f32 %v6415_v50, %v6784_v7  ;;  %8521 = vst [vmem:[#allocation73_spill] sm:$0xff] %v6816_v45  ;;  %8522 = vst [vmem:[#allocation74_spill] sm:$0xff] %v6818_v2  ;;  %v6828_v1 = vpop.f32.mrb[141].mxu0  ;;  %v2764_v52 = vmul.f32 1.442695, %v2732_v25 }
 0x382   : > { %v2742_v49 = vsub.f32 %v6385_v4, %v6784_v7  ;;  %v2743_v42 = vsub.f32 %v6405_v41, %v6784_v7  ;;  %v2744_v14 = vsub.f32 %v6450_v13, %v6784_v7  ;;  %v2745_v51 = vsub.f32 %v6465_v47, %v6784_v7  ;;  %8523 = vst [vmem:[#allocation75_spill] sm:$0xff] %v6828_v1  ;;  %v6837_v41 = vpop.f32.mrb[142].mxu0 }
 0x383   : > { %v2086_v50 = vadd.f32 %v6683_v5, %v2085_v19  ;;  %v2746_v35 = vsub.f32 %v6441_v27, %v6784_v7  ;;  %v2747_v59 = vsub.f32 %v6458_v10, %v6784_v7  ;;  %v2748_v4 = vsub.f32 %v6489_v57, %v6784_v7  ;;  %8524 = vst [vmem:[#allocation76_spill] sm:$0xff] %v6837_v41  ;;  %v6847_v5 = vpop.f32.mrb[143].mxu0 }
 0x384   : > { %v2749_v13 = vsub.f32 %v6510_v24, %v6784_v7  ;;  %v2750_v47 = vsub.f32 %v6474_v20, %v6784_v7  ;;  %v2751_v19 = vsub.f32 %v6499_v48, %v6784_v7  ;;  %v2752_v27 = vsub.f32 %v6536_v3, %v6784_v7  ;;  %8525 = vst [vmem:[#allocation77_spill] sm:$0xff] %v6847_v5  ;;  %v8529_v3 = vld [vmem:[#allocation50_spill] sm:$0xff] }
 0x385   : > { %v2087_v10 = vadd.f32 %v6691_v31, %v2086_v50  ;;  %v2753_v57 = vsub.f32 %v6559_v62, %v6784_v7  ;;  %v2754_v9 = vsub.f32 %v6528_v12, %v6784_v7  ;;  %v2755_v24 = vsub.f32 %v6545_v6, %v6784_v7  ;;  %v6864_v31 = vpop.f32.mrb[32].mxu1  ;;  %v8530_v12 = vld [vmem:[#allocation56_spill] sm:$0xff]  ;;  %v8533_v5 = vld [vmem:[#allocation58_spill] sm:$0xff] }
 0x386   : > { %v2756_v20 = vsub.f32 %v6622_v60, %v6784_v7  ;;  %v2757_v48 = vsub.f32 %v6638_v53, %v6784_v7  ;;  %8526 = vst [vmem:[#allocation78_spill] sm:$0xff] %v6864_v31  ;;  %v6873_v53 = vpop.f32.mrb[33].mxu1  ;;  %v2766_v50 = vmul.f32 1.442695, %v2733_v21  ;;  %v2768_v46 = vmul.f32 1.442695, %v2734_v37 }
 0x387   : > { %v2088_v62 = vadd.f32 %v6696_v44, %v2087_v10  ;;  %8528 = vst [vmem:[#allocation79_spill] sm:$0xff] %v6873_v53  ;;  %v2770_v10 = vmul.f32 1.442695, %v2735_v63  ;;  %5153 = vpow2.f32 %v2764_v52  ;;  %v2772_v44 = vmul.f32 1.442695, %v2736_v56  ;;  %v6879_v26 = vpop.f32.mrb[34].mxu1 }
 0x388   : > { %5155 = vpow2.f32 %v2766_v50  ;;  %v2774_v6 = vmul.f32 1.442695, %v2737_v17  ;;  %8531 = vst [vmem:[#allocation50_spill] sm:$0xff] %v6879_v26  ;;  %v6881_v43 = vpop.f32.mrb[144].mxu0  ;;  %v2776_v60 = vmul.f32 1.442695, %v2738_v22 }
 0x389   : > { %v2089_v31 = vadd.f32 %v6702_v28, %v2088_v62  ;;  %8532 = vst [vmem:[#allocation80_spill] sm:$0xff] %v6881_v43  ;;  %5157 = vpow2.f32 %v2768_v46  ;;  %v2778_v53 = vmul.f32 1.442695, %v2739_v0  ;;  %v2780_v21 = vmul.f32 1.442695, %v2740_v29  ;;  %v6884_v62 = vpop.f32.mrb[35].mxu1 }
 0x38a   : > { %5159 = vpow2.f32 %v2770_v10  ;;  %v2782_v37 = vmul.f32 1.442695, %v2741_v11  ;;  %8534 = vst [vmem:[#allocation81_spill] sm:$0xff] %v6884_v62  ;;  %v6886_v52 = vpop.f32.mrb[145].mxu0  ;;  %v2786_v63 = vmul.f32 1.442695, %v2743_v42 }
 0x38b   : > { %v2090_v30 = vadd.f32 %v8530_v12, %v2089_v31  ;;  %8535 = vst [vmem:[#allocation82_spill] sm:$0xff] %v6886_v52  ;;  %5161 = vpow2.f32 %v2772_v44  ;;  %v2784_v31 = vmul.f32 1.442695, %v2742_v49  ;;  %v2788_v56 = vmul.f32 1.442695, %v2744_v14  ;;  %v6889_v22 = vpop.f32.mrb[146].mxu0 }
 0x38c   : > { %5163 = vpow2.f32 %v2774_v6  ;;  %v2790_v50 = vmul.f32 1.442695, %v2745_v51  ;;  %v2792_v46 = vmul.f32 1.442695, %v2746_v35  ;;  %8536 = vst [vmem:[#allocation83_spill] sm:$0xff] %v6889_v22  ;;  %v8537_v11 = vld [vmem:[#allocation63_spill] sm:$0xff]  ;;  %v8544_v6 = vsub.f32 %v6609_v23, %v6784_v7 }
 0x38d   : > { %v2091_v25 = vadd.f32 %v8533_v5, %v2090_v30  ;;  %5165 = vpow2.f32 %v2776_v60  ;;  %v2794_v30 = vmul.f32 1.442695, %v2747_v59  ;;  %v2796_v0 = vmul.f32 1.442695, %v2748_v4  ;;  %v6894_v49 = vpop.f32.mrb[147].mxu0  ;;  %v8549_v23 = vld [vmem:[#allocation67_spill] sm:$0xff] }
 0x38e   : > { %v2798_v29 = vmul.f32 1.442695, %v2749_v13  ;;  %5167 = vpow2.f32 %v2778_v53  ;;  %v2800_v12 = vmul.f32 1.442695, %v2750_v47  ;;  %v2802_v44 = vmul.f32 1.442695, %v2751_v19 }
 0x38f   : > { %v2092_v17 = vadd.f32 %v6723_v61, %v2091_v25  ;;  %8539 = vst [vmem:[#allocation85_spill] sm:$0xff] %v6894_v49  ;;  %5169 = vpow2.f32 %v2780_v21  ;;  %v6896_v42 = vmul.f32 1.442695, %v2752_v27  ;;  %v6898_v14 = vmul.f32 1.442695, %v2753_v57  ;;  %v8558_v61 = vld [vmem:[#allocation66_spill] sm:$0xff] }
 0x390   : > { %v6900_v35 = vmul.f32 1.442695, %v2754_v9  ;;  %5171 = vpow2.f32 %v2782_v37  ;;  %v6902_v51 = vmul.f32 1.442695, %v2755_v24  ;;  %v6904_v59 = vmul.f32 1.442695, %v2756_v20 }
 0x391   : > { %v6892_v10 = vadd.f32 %v8537_v11, %v2092_v17  ;;  %v6906_v4 = vpop.f32.mrb[148].mxu0  ;;  %v5154_v13 = vpop.eup %5153  ;;  %5173 = vpow2.f32 %v2784_v31  ;;  %v6908_v47 = vmul.f32 1.442695, %v2757_v48  ;;  %v8541_v19 = vmax.f32 %v6710_v18, %v6750_v33  ;;  %v8559_v11 = vld [vmem:[#allocation70_spill] sm:$0xff] }
 0x392   : > { %8540 = vst [vmem:[#allocation86_spill] sm:$0xff] %v6906_v4  ;;  %v8542_v9 = vmax.f32 %v6719_v32, %v6755_v38  ;;  %v6918_v24 = vpop.f32.mrb[149].mxu0  ;;  %v5156_v20 = vpop.eup %5155  ;;  %5175 = vpow2.f32 %v2786_v63  ;;  %v6923_v60 = vmul.f32 1.442695, %v8544_v6  ;;  %v8545_v48 = vmax.f32 %v6727_v54, %v6759_v39  ;;  %v8555_v6 = vld [vmem:[#allocation69_spill] sm:$0xff]  ;;  %v8561_v28 = vld [vmem:[#allocation78_spill] sm:$0xff] }
 0x393   : > { %8538 = vst [vmem:[#allocation84_spill] sm:$0xff] %v6892_v10  ;;  %v2357_v27 = vmax.f32 %v8541_v19, %v6788_v16  ;;  %8543 = vst [vmem:[#allocation87_spill] sm:$0xff] %v6918_v24  ;;  %v8546_v53 = vmax.f32 %v6738_v36, %v6764_v34  ;;  %v6933_v25 = vpop.f32.mrb[150].mxu0  ;;  %v6935_v21 = vpop.eup %5157  ;;  %5177 = vpow2.f32 %v2788_v56  ;;  %v2828_v37 = vadd.f32 %v5156_v20, %v5154_v13 }
 0x394   : > { %v2355_v57 = vmax.f32 %v8542_v9, %v6797_v58  ;;  %v2358_v18 = vmax.f32 %v8545_v48, %v6807_v8  ;;  %8547 = vst [vmem:[#allocation88_spill] sm:$0xff] %v6933_v25  ;;  %8548 = vst [vmem:[#allocation89_spill] sm:$0xff] %v6935_v21  ;;  %v8550_v31 = vmax.f32 %v6731_v55, %v8549_v23  ;;  %v6945_v19 = vpop.f32.mrb[151].mxu0  ;;  %v6947_v36 = vpop.eup %5159  ;;  %5179 = vpow2.f32 %v2790_v50  ;;  %v8554_v9 = vld [vmem:[#allocation65_spill] sm:$0xff] }
 0x395   : > { %v2356_v32 = vmax.f32 %v8546_v53, %v6816_v45  ;;  %v8551_v54 = vmax.f32 %v6740_v40, %v6772_v15  ;;  %8552 = vst [vmem:[#allocation90_spill] sm:$0xff] %v6945_v19  ;;  %8553 = vst [vmem:[#allocation91_spill] sm:$0xff] %v6947_v36  ;;  %v8556_v56 = vmax.f32 %v8554_v9, %v8555_v6  ;;  %v8557_v53 = vld [vmem:[#allocation77_spill] sm:$0xff]  ;;  %v6958_v23 = vpop.eup %5161  ;;  %5181 = vpow2.f32 %v2792_v46 }
 0x396   : > { %v3222_v63 = vmax.f32 %v8550_v31, %v6818_v2  ;;  %v8560_v5 = vmax.f32 %v8558_v61, %v8559_v11  ;;  %v2361_v2 = vmax.f32 %v2357_v27, %v8561_v28  ;;  %8562 = vst [vmem:[#allocation78_spill] sm:$0xff] %v6958_v23  ;;  %v2362_v50 = vmax.f32 %v2358_v18, %v6879_v26  ;;  %v6963_v55 = vpop.eup %5163  ;;  %v8620_v61 = vld [vmem:[#allocation59_spill] sm:$0xff] }
 0x397   : > { %v3220_v17 = vmax.f32 %v8551_v54, %v6828_v1  ;;  %v3223_v48 = vmax.f32 %v8556_v56, %v6837_v41  ;;  %v2829_v54 = vadd.f32 %v6935_v21, %v2828_v37  ;;  %v8563_v1 = vld [vmem:[#allocation79_spill] sm:$0xff]  ;;  %5183 = vpow2.f32 %v2794_v30  ;;  %v6970_v27 = vpop.eup %5165 }
 0x398   : > { %v3221_v31 = vmax.f32 %v8560_v5, %v8557_v53  ;;  %v2359_v15 = vmax.f32 %v2355_v57, %v8563_v1  ;;  %8564 = vst [vmem:[#allocation79_spill] sm:$0xff] %v6963_v55  ;;  %v2360_v56 = vmax.f32 %v2356_v32, %v6884_v62  ;;  %v3226_v41 = vmax.f32 %v3222_v63, %v6881_v43  ;;  %v6968_v53 = vpop.f32.mrb[152].mxu0  ;;  %v6976_v6 = vpop.eup %5167 }
 0x399   : > { %v3224_v5 = vmax.f32 %v3220_v17, %v6886_v52  ;;  %8565 = vst [vmem:[#allocation92_spill] sm:$0xff] %v6968_v53  ;;  %8566 = vst [vmem:[#allocation93_spill] sm:$0xff] %v6970_v27  ;;  %5185 = vpow2.f32 %v2796_v0  ;;  %v2830_v46 = vadd.f32 %v6947_v36, %v2829_v54  ;;  %v2364_v37 = vmax.f32 %v2361_v2, %v2362_v50  ;;  %v6974_v18 = vpop.f32.mrb[153].mxu0  ;;  %v6981_v43 = vpop.eup %5169  ;;  %v8616_v52 = vld [vmem:[#allocation57_spill] sm:$0xff] }
 0x39a   : > { %v3227_v57 = vmax.f32 %v3223_v48, %v6889_v22  ;;  %8567 = vst [vmem:[#allocation94_spill] sm:$0xff] %v6974_v18  ;;  %8568 = vst [vmem:[#allocation95_spill] sm:$0xff] %v6976_v6  ;;  %5187 = vpow2.f32 %v2798_v29  ;;  %v2363_v30 = vmax.f32 %v2359_v15, %v2360_v56  ;;  %v3225_v32 = vmax.f32 %v3221_v31, %v6894_v49  ;;  %v6979_v17 = vpop.f32.mrb[154].mxu0  ;;  %v6988_v50 = vpop.eup %5171 }
 0x39b   : > { %v2869_v63 = vpack.c.bf16 %v5156_v20, %v5154_v13  ;;  %8569 = vst [vmem:[#allocation96_spill] sm:$0xff] %v6979_v17  ;;  %8570 = vst [vmem:[#allocation97_spill] sm:$0xff] %v6981_v43  ;;  %5189 = vpow2.f32 %v2800_v12  ;;  %v2831_v0 = vadd.f32 %v6958_v23, %v2830_v46  ;;  %v3230_v2 = vmax.f32 %v3226_v41, %v6906_v4  ;;  %v6986_v54 = vpop.f32.mrb[155].mxu0  ;;  %v6992_v20 = vpop.eup %5173  ;;  %v8611_v4 = vld [vmem:[#allocation41_spill] sm:$0xff] }
 0x39c   : > { %v3228_v48 = vmax.f32 %v3224_v5, %v6918_v24  ;;  %8571 = vst [vmem:[#allocation98_spill] sm:$0xff] %v6986_v54  ;;  %8572 = vst [vmem:[#allocation99_spill] sm:$0xff] %v6988_v50  ;;  %5191 = vpow2.f32 %v2802_v44  ;;  %v2365_v15 = vmax.f32 %v2363_v30, %v2364_v37  ;;  %v3231_v29 = vmax.f32 %v3227_v57, %v6933_v25  ;;  %v6998_v56 = vpop.eup %5175  ;;  %v8576_v57 = vld [vmem:[#allocation35_spill] sm:$0xff] }
 0x39d   : > { %4799 = vmatprep.mubr.bf16.mxu1 %v2869_v63  ;;  %v3229_v13 = vmax.f32 %v3225_v32, %v6945_v19  ;;  %8573 = vst [vmem:[#allocation100_spill] sm:$0xff] %v6992_v20  ;;  %5193 = vpow2.f32 %v6896_v42  ;;  %v2832_v12 = vadd.f32 %v6963_v55, %v2831_v0  ;;  %v3234_v41 = vmax.f32 %v3230_v2, %v6968_v53  ;;  %v7003_v37 = vpop.eup %5177  ;;  %v8579_v2 = vld [vmem:[#allocation48_spill] sm:$0xff] }
 0x39e   : > { %v3232_v31 = vmax.f32 %v3228_v48, %v6974_v18  ;;  %8574 = vst [vmem:[#allocation101_spill] sm:$0xff] %v6998_v56  ;;  %5195 = vpow2.f32 %v6898_v14  ;;  %v2366_v44 = vrot.slane %v2365_v15, 4  ;;  %v3235_v5 = vmax.f32 %v3231_v29, %v6979_v17  ;;  %8575 = vst [vmem:[#allocation102_spill] sm:$0xff] %v7003_v37  ;;  %v7013_v14 = vpop.eup %5179  ;;  %v8610_v18 = vld [vmem:[#allocation30_spill] sm:$0xff] }
 0x39f   : > { %v3233_v46 = vmax.f32 %v3229_v13, %v6986_v54  ;;  %v8577_v42 = vsub.f32 %v8576_v57, %v6784_v7  ;;  %v2833_v32 = vadd.f32 %v6970_v27, %v2832_v12  ;;  %8578 = vst [vmem:[#allocation35_spill] sm:$0xff] %v7013_v14  ;;  %v8580_v48 = vsub.f32 %v8579_v2, %v6784_v7 }
 0x3a0   : > { %v2367_v13 = vmax.f32 %v2365_v15, %v2366_v44  ;;  %v7018_v17 = vpop.f32.mrb[156].mxu0  ;;  %5197 = vpow2.f32 %v6900_v35 }
 0x3a1   : > { %v2818_v30 = vmul.f32 1.442695, %v8577_v42  ;;  %v2820_v29 = vmul.f32 1.442695, %v8580_v48  ;;  %8581 = vst [vmem:[#allocation48_spill] sm:$0xff] %v7018_v17  ;;  %v7024_v42 = vpop.eup %5181  ;;  %v2834_v0 = vadd.f32 %v6976_v6, %v2833_v32  ;;  %v7029_v63 = vmax.f32 %v3234_v41, %v7018_v17  ;;  %v7031_v2 = vpop.f32.mrb[157].mxu0 }
 0x3a2   : > { %8582 = vst [vmem:[#allocation103_spill] sm:$0xff] %v7024_v42  ;;  %8583 = vst [vmem:[#allocation104_spill] sm:$0xff] %v7031_v2  ;;  %v7035_v44 = vpop.eup %5183  ;;  %5199 = vpow2.f32 %v6902_v51  ;;  %v2368_v48 = vrot.slane %v2367_v13, 2  ;;  %v7039_v12 = vmax.f32 %v3232_v31, %v7031_v2  ;;  %v7041_v57 = vpop.f32.mrb[158].mxu0  ;;  %v8587_v6 = vld [vmem:[#allocation52_spill] sm:$0xff] }
 0x3a3   : > { %8584 = vst [vmem:[#allocation105_spill] sm:$0xff] %v7035_v44  ;;  %8585 = vst [vmem:[#allocation106_spill] sm:$0xff] %v7041_v57  ;;  %v7045_v41 = vpop.eup %5185  ;;  %5201 = vpow2.f32 %v6904_v59  ;;  %v2835_v32 = vadd.f32 %v6981_v43, %v2834_v0  ;;  %v7050_v15 = vmax.f32 %v3235_v5, %v7041_v57  ;;  %v7052_v27 = vpop.f32.mrb[159].mxu0  ;;  %v8588_v35 = vsub.f32 %v8587_v6, %v6784_v7  ;;  %v8590_v5 = vld [vmem:[#allocation46_spill] sm:$0xff]  ;;  %v8606_v2 = vld [vmem:[#allocation28_spill] sm:$0xff] }
 0x3a4   : > { %8586 = vst [vmem:[#allocation107_spill] sm:$0xff] %v7052_v27  ;;  %v7056_v31 = vpop.eup %5187  ;;  %5203 = vpow2.f32 %v6908_v47  ;;  %v2369_v55 = vmax.f32 %v2367_v13, %v2368_v48  ;;  %v7063_v59 = vmax.f32 %v3233_v46, %v7052_v27  ;;  %v8591_v43 = vsub.f32 %v8590_v5, %v6784_v7 }
 0x3a5   : > { %v2822_v23 = vmul.f32 1.442695, %v8588_v35  ;;  %v7065_v0 = vpop.eup %5189  ;;  %5205 = vpow2.f32 %v6923_v60  ;;  %v2836_v21 = vadd.f32 %v6988_v50, %v2835_v32  ;;  %v8601_v60 = vld [vmem:[#allocation16_spill] sm:$0xff] }
 0x3a6   : > { %8589 = vst [vmem:[#allocation52_spill] sm:$0xff] %v7065_v0  ;;  %v2824_v51 = vmul.f32 1.442695, %v8591_v43  ;;  %v7074_v36 = vpop.eup %5191  ;;  %5207 = vpow2.f32 %v2818_v30  ;;  %v2370_v6 = vrot.slane %v2369_v55, 1  ;;  %v8595_v43 = vsub.f32 %v8529_v3, %v6784_v7  ;;  %v8597_v7 = vld [vmem:[#allocation11_spill] sm:$0xff]  ;;  %v8598_v3 = vld [vmem:[#allocation6_spill] sm:$0xff] }
 0x3a7   : > { %8592 = vst [vmem:[#allocation46_spill] sm:$0xff] %v7074_v36  ;;  %v7076_v13 = vpop.eup %5193  ;;  %5209 = vpow2.f32 %v2820_v29  ;;  %v2837_v46 = vadd.f32 %v6992_v20, %v2836_v21 }
 0x3a8   : > { %8593 = vst [vmem:[#allocation108_spill] sm:$0xff] %v7076_v13  ;;  %v7081_v48 = vpop.eup %5195  ;;  %5211 = vpow2.f32 %v2822_v23  ;;  %v2826_v35 = vmul.f32 1.442695, %v8595_v43  ;;  %v7086_v32 = vmax.f32 %v2369_v55, %v2370_v6  ;;  %v7088_v5 = vpop.f32.mrb[160].mxu0  ;;  %v8596_v23 = vld [vmem:[#allocation7_spill] sm:$0xff] }
 0x3a9   : > { %8594 = vst [vmem:[#allocation109_spill] sm:$0xff] %v7081_v48  ;;  %5213 = vpow2.f32 %v2824_v51  ;;  %v2838_v30 = vadd.f32 %v6998_v56, %v2837_v46  ;;  %v7093_v29 = vpop.f32.mrb[161].mxu0  ;;  %v8599_v51 = vld [vmem:[#allocation9_spill] sm:$0xff] }
 0x3aa   : > { %v2372_v47 = vsub.f32 %v8596_v23, %v7086_v32  ;;  %v2373_v55 = vsub.f32 %v8597_v7, %v7086_v32  ;;  %v2374_v6 = vsub.f32 %v8598_v3, %v7086_v32  ;;  %v2375_v46 = vsub.f32 %v8599_v51, %v7086_v32  ;;  %v7105_v43 = vpop.f32.mrb[162].mxu0  ;;  %v7107_v21 = vpop.eup %5197  ;;  %v8602_v23 = vld [vmem:[#allocation20_spill] sm:$0xff]  ;;  %v8603_v7 = vld [vmem:[#allocation14_spill] sm:$0xff] }
 0x3ab   : > { %8600 = vst [vmem:[#allocation7_spill] sm:$0xff] %v7107_v21  ;;  %v2839_v20 = vadd.f32 %v7003_v37, %v2838_v30  ;;  %v2376_v56 = vsub.f32 %v8601_v60, %v7086_v32  ;;  %v2377_v50 = vsub.f32 %v8602_v23, %v7086_v32  ;;  %v2378_v57 = vsub.f32 %v8603_v7, %v7086_v32  ;;  %v7116_v17 = vpop.f32.mrb[163].mxu0  ;;  %v8605_v51 = vld [vmem:[#allocation18_spill] sm:$0xff]  ;;  %v8607_v30 = vld [vmem:[#allocation32_spill] sm:$0xff] }
 0x3ac   : > { %v7118_v3 = vpop.eup %5199  ;;  %v2379_v27 = vsub.f32 %v8605_v51, %v7086_v32  ;;  %v2380_v53 = vsub.f32 %v8606_v2, %v7086_v32  ;;  %v2381_v37 = vsub.f32 %v8607_v30, %v7086_v32  ;;  %v8608_v60 = vld [vmem:[#allocation26_spill] sm:$0xff]  ;;  %v2383_v25 = vsub.f32 %v8610_v18, %v7086_v32  ;;  %v8612_v51 = vld [vmem:[#allocation45_spill] sm:$0xff]  ;;  %v8614_v30 = vld [vmem:[#allocation39_spill] sm:$0xff] }
 0x3ad   : > { %8604 = vst [vmem:[#allocation11_spill] sm:$0xff] %v7118_v3  ;;  %v2382_v54 = vsub.f32 %v8608_v60, %v7086_v32  ;;  %v7128_v23 = vpop.eup %5201  ;;  %v2840_v7 = vadd.f32 %v7013_v14, %v2839_v20  ;;  %v2384_v19 = vsub.f32 %v8611_v4, %v7086_v32  ;;  %v2385_v24 = vsub.f32 %v8612_v51, %v7086_v32  ;;  %v8615_v60 = vld [vmem:[#allocation43_spill] sm:$0xff]  ;;  %v8617_v14 = vld [vmem:[#allocation61_spill] sm:$0xff] }
 0x3ae   : > { %8609 = vst [vmem:[#allocation6_spill] sm:$0xff] %v7128_v23  ;;  %v7137_v2 = vpop.eup %5203  ;;  %v2386_v22 = vsub.f32 %v8614_v30, %v7086_v32  ;;  %v2387_v49 = vsub.f32 %v8615_v60, %v7086_v32  ;;  %v2388_v20 = vsub.f32 %v8616_v52, %v7086_v32  ;;  %v2389_v18 = vsub.f32 %v8617_v14, %v7086_v32  ;;  %v8619_v51 = vld [vmem:[#allocation55_spill] sm:$0xff] }
 0x3af   : > { %8613 = vst [vmem:[#allocation9_spill] sm:$0xff] %v7137_v2  ;;  %v7147_v11 = vpop.eup %5205  ;;  %v2841_v4 = vadd.f32 %v7024_v42, %v2840_v7  ;;  %v2404_v16 = vmul.f32 1.442695, %v2372_v47  ;;  %v2406_v52 = vmul.f32 1.442695, %v2373_v55  ;;  %5215 = vpow2.f32 %v2826_v35 }
 0x3b0   : > { %8618 = vst [vmem:[#allocation16_spill] sm:$0xff] %v7147_v11  ;;  %v7156_v60 = vpop.eup %5207  ;;  %v2408_v8 = vmul.f32 1.442695, %v2374_v6  ;;  %v2410_v45 = vmul.f32 1.442695, %v2375_v46  ;;  %v3240_v7 = vmax.f32 %v7039_v12, %v7093_v29  ;;  %v8629_v6 = vmax.f32 %v7029_v63, %v7088_v5 }
 0x3b1   : > { %8621 = vst [vmem:[#allocation20_spill] sm:$0xff] %v7156_v60  ;;  %v7166_v42 = vpop.eup %5209  ;;  %v2842_v40 = vadd.f32 %v7035_v44, %v2841_v4  ;;  %5217 = vpow2.f32 %v2404_v16  ;;  %v2412_v62 = vmul.f32 1.442695, %v2376_v56  ;;  %v2414_v4 = vmul.f32 1.442695, %v2377_v50 }
 0x3b2   : > { %8622 = vst [vmem:[#allocation14_spill] sm:$0xff] %v7166_v42  ;;  %v7175_v14 = vpop.eup %5211  ;;  %5219 = vpow2.f32 %v2406_v52  ;;  %v2416_v26 = vmul.f32 1.442695, %v2378_v57  ;;  %v2420_v35 = vmul.f32 1.442695, %v2380_v53 }
 0x3b3   : > { %8623 = vst [vmem:[#allocation18_spill] sm:$0xff] %v7175_v14  ;;  %v7185_v44 = vpop.eup %5213  ;;  %v2843_v10 = vadd.f32 %v7045_v41, %v2842_v40  ;;  %5221 = vpow2.f32 %v2408_v8  ;;  %v2418_v40 = vmul.f32 1.442695, %v2379_v27  ;;  %v2422_v55 = vmul.f32 1.442695, %v2381_v37 }
 0x3b4   : > { %8624 = vst [vmem:[#allocation28_spill] sm:$0xff] %v7185_v44  ;;  %5223 = vpow2.f32 %v2410_v45  ;;  %v2426_v16 = vmul.f32 1.442695, %v2383_v25  ;;  %v2430_v8 = vmul.f32 1.442695, %v2385_v24  ;;  %v3243_v25 = vmax.f32 %v7050_v15, %v7105_v43 }
 0x3b5   : > { %v2844_v9 = vadd.f32 %v7056_v31, %v2843_v10  ;;  %5225 = vpow2.f32 %v2412_v62  ;;  %v2424_v10 = vmul.f32 1.442695, %v2382_v54  ;;  %v2432_v45 = vmul.f32 1.442695, %v2386_v22 }
 0x3b6   : > { %5227 = vpow2.f32 %v2414_v4  ;;  %v2434_v27 = vmul.f32 1.442695, %v2387_v49  ;;  %v2436_v62 = vmul.f32 1.442695, %v2388_v20  ;;  %v3241_v24 = vmax.f32 %v7063_v59, %v7116_v17 }
 0x3b7   : > { %v2845_v30 = vadd.f32 %v7065_v0, %v2844_v9  ;;  %5229 = vpow2.f32 %v2416_v26  ;;  %v2428_v9 = vmul.f32 1.442695, %v2384_v19  ;;  %v2438_v26 = vmul.f32 1.442695, %v2389_v18 }
 0x3b8   : > { %5231 = vpow2.f32 %v2418_v40  ;;  %v3245_v46 = vmax.f32 %v8629_v6, %v3243_v25  ;;  %v3244_v59 = vmax.f32 %v3240_v7, %v3241_v24  ;;  %v8633_v7 = vsub.f32 %v8619_v51, %v7086_v32 }
 0x3b9   : > { %v2846_v47 = vadd.f32 %v7074_v36, %v2845_v30  ;;  %5233 = vpow2.f32 %v2420_v35  ;;  %v7195_v56 = vpop.eup %5215  ;;  %v8636_v51 = vsub.f32 %v8620_v61, %v7086_v32  ;;  %v8638_v24 = vsub.f32 %v6755_v38, %v7086_v32  ;;  %v8640_v61 = vld [vmem:[#allocation84_spill] sm:$0xff] }
 0x3ba   : > { %8625 = vst [vmem:[#allocation32_spill] sm:$0xff] %v7195_v56  ;;  %5235 = vpow2.f32 %v2422_v55  ;;  %v2440_v35 = vmul.f32 1.442695, %v8633_v7  ;;  %v3246_v55 = vmax.f32 %v3244_v59, %v3245_v46  ;;  %v8641_v59 = vsub.f32 %v6764_v34, %v7086_v32 }
 0x3bb   : > { %v2847_v12 = vadd.f32 %v7076_v13, %v2846_v47  ;;  %v7197_v53 = vpop.eup %5217  ;;  %5237 = vpow2.f32 %v2424_v10  ;;  %v8645_v34 = vsub.f32 %v6759_v39, %v7086_v32  ;;  %v8649_v39 = vld [vmem:[#allocation73_spill] sm:$0xff] }
 0x3bc   : > { %8626 = vst [vmem:[#allocation26_spill] sm:$0xff] %v7197_v53  ;;  %v7202_v54 = vpop.eup %5219  ;;  %5239 = vpow2.f32 %v2426_v16 }
 0x3bd   : > { %v2848_v50 = vadd.f32 %v7081_v48, %v2847_v12  ;;  %8627 = vst [vmem:[#allocation30_spill] sm:$0xff] %v7202_v54  ;;  %v7210_v19 = vpop.eup %5221  ;;  %5241 = vpow2.f32 %v2428_v9  ;;  %v2468_v15 = vadd.f32 %v7202_v54, %v7197_v53 }
 0x3be   : > { %8628 = vst [vmem:[#allocation41_spill] sm:$0xff] %v7210_v19  ;;  %v7218_v20 = vpop.eup %5223  ;;  %5243 = vpow2.f32 %v2430_v8 }
 0x3bf   : > { %v2849_v37 = vadd.f32 %v7107_v21, %v2848_v50  ;;  %8630 = vst [vmem:[#allocation45_spill] sm:$0xff] %v7218_v20  ;;  %v7224_v52 = vpop.eup %5225  ;;  %5245 = vpow2.f32 %v2432_v45  ;;  %v2469_v40 = vadd.f32 %v7210_v19, %v2468_v15  ;;  %v2442_v45 = vmul.f32 1.442695, %v8636_v51 }
 0x3c0   : > { %8631 = vst [vmem:[#allocation39_spill] sm:$0xff] %v7224_v52  ;;  %v7230_v47 = vpop.eup %5227  ;;  %5247 = vpow2.f32 %v2434_v27  ;;  %v3247_v27 = vrot.slane %v3246_v55, 4 }
 0x3c1   : > { %v2850_v57 = vadd.f32 %v7118_v3, %v2849_v37  ;;  %8632 = vst [vmem:[#allocation43_spill] sm:$0xff] %v7230_v47  ;;  %v7237_v10 = vpop.eup %5229  ;;  %5249 = vpow2.f32 %v2436_v62  ;;  %v2470_v50 = vadd.f32 %v7218_v20, %v2469_v40  ;;  %v8642_v40 = vsub.f32 %v6750_v33, %v7086_v32  ;;  %v8680_v20 = vld [vmem:[#allocation86_spill] sm:$0xff] }
 0x3c2   : > { %8634 = vst [vmem:[#allocation57_spill] sm:$0xff] %v7237_v10  ;;  %v7243_v8 = vpop.eup %5231  ;;  %5251 = vpow2.f32 %v2438_v26  ;;  %v8646_v33 = vsub.f32 %v6797_v58, %v7086_v32  ;;  %v8651_v58 = vld [vmem:[#allocation71_spill] sm:$0xff] }
 0x3c3   : > { %v2851_v4 = vadd.f32 %v7128_v23, %v2850_v57  ;;  %8635 = vst [vmem:[#allocation61_spill] sm:$0xff] %v7243_v8  ;;  %v7250_v25 = vpop.eup %5233  ;;  %v2444_v57 = vmul.f32 1.442695, %v8638_v24  ;;  %v2471_v15 = vadd.f32 %v7224_v52, %v2470_v50  ;;  %v2448_v7 = vmul.f32 1.442695, %v8642_v40  ;;  %v8682_v52 = vld [vmem:[#allocation94_spill] sm:$0xff] }
 0x3c4   : > { %8637 = vst [vmem:[#allocation55_spill] sm:$0xff] %v7250_v25  ;;  %v7259_v6 = vpop.eup %5235  ;;  %5253 = vpow2.f32 %v2440_v35 }
 0x3c5   : > { %v2852_v16 = vadd.f32 %v7137_v2, %v2851_v4  ;;  %8639 = vst [vmem:[#allocation59_spill] sm:$0xff] %v7259_v6  ;;  %v2446_v4 = vmul.f32 1.442695, %v8641_v59  ;;  %v7268_v38 = vpop.eup %5237  ;;  %v2472_v51 = vadd.f32 %v7230_v47, %v2471_v15  ;;  %5255 = vpow2.f32 %v2442_v45  ;;  %v8684_v47 = vld [vmem:[#allocation92_spill] sm:$0xff] }
 0x3c6   : > { %8643 = vst [vmem:[#allocation84_spill] sm:$0xff] %v7268_v38  ;;  %v7274_v26 = vpop.eup %5239  ;;  %v2450_v59 = vmul.f32 1.442695, %v8645_v34  ;;  %5257 = vpow2.f32 %v2444_v57  ;;  %v8650_v34 = vsub.f32 %v8649_v39, %v7086_v32  ;;  %v8654_v39 = vld [vmem:[#allocation72_spill] sm:$0xff] }
 0x3c7   : > { %v2853_v62 = vadd.f32 %v7147_v11, %v2852_v16  ;;  %v3248_v16 = vmax.f32 %v3246_v55, %v3247_v27  ;;  %8644 = vst [vmem:[#allocation110_spill] sm:$0xff] %v7274_v26  ;;  %v2452_v55 = vmul.f32 1.442695, %v8646_v33  ;;  %v7282_v40 = vpop.eup %5241  ;;  %5259 = vpow2.f32 %v2446_v4 }
 0x3c8   : > { %8647 = vst [vmem:[#allocation111_spill] sm:$0xff] %v7282_v40  ;;  %v7288_v45 = vpop.eup %5243  ;;  %v2454_v24 = vmul.f32 1.442695, %v8650_v34  ;;  %v8652_v33 = vsub.f32 %v8651_v58, %v7086_v32  ;;  %5261 = vpow2.f32 %v2448_v7  ;;  %v8655_v34 = vsub.f32 %v8654_v39, %v7086_v32  ;;  %v8657_v39 = vld [vmem:[#allocation81_spill] sm:$0xff] }
 0x3c9   : > { %v2854_v50 = vadd.f32 %v7156_v60, %v2853_v62  ;;  %v3249_v27 = vrot.slane %v3248_v16, 2  ;;  %v2473_v62 = vadd.f32 %v7237_v10, %v2472_v51  ;;  %8648 = vst [vmem:[#allocation112_spill] sm:$0xff] %v7288_v45  ;;  %v7296_v12 = vpop.eup %5245  ;;  %5263 = vpow2.f32 %v2450_v59  ;;  %v8676_v10 = vld [vmem:[#allocation80_spill] sm:$0xff]  ;;  %v8687_v60 = vld [vmem:[#allocation107_spill] sm:$0xff] }
 0x3ca   : > { %v2456_v37 = vmul.f32 1.442695, %v8652_v33  ;;  %8653 = vst [vmem:[#allocation73_spill] sm:$0xff] %v7296_v12  ;;  %v7302_v4 = vpop.eup %5247  ;;  %v2458_v15 = vmul.f32 1.442695, %v8655_v34  ;;  %5265 = vpow2.f32 %v2452_v55  ;;  %v8658_v34 = vsub.f32 %v8657_v39, %v7086_v32 }
 0x3cb   : > { %v2855_v35 = vadd.f32 %v7166_v42, %v2854_v50  ;;  %v3250_v9 = vmax.f32 %v3248_v16, %v3249_v27  ;;  %v2474_v50 = vadd.f32 %v7243_v8, %v2473_v62  ;;  %v8656_v16 = vsub.f32 %v8563_v1, %v7086_v32  ;;  %v7310_v33 = vpop.eup %5249  ;;  %v8690_v42 = vld [vmem:[#allocation106_spill] sm:$0xff] }
 0x3cc   : > { %v7316_v59 = vpop.eup %5251  ;;  %5267 = vpow2.f32 %v2454_v24  ;;  %v2462_v51 = vmul.f32 1.442695, %v8658_v34  ;;  %v8659_v1 = vsub.f32 %v8561_v28, %v7086_v32  ;;  %v8660_v24 = vld [vmem:[#allocation64_spill] sm:$0xff]  ;;  %v8661_v34 = vld [vmem:[#allocation66_spill] sm:$0xff] }
 0x3cd   : > { %v2856_v57 = vadd.f32 %v7175_v14, %v2855_v35  ;;  %v2460_v27 = vmul.f32 1.442695, %v8656_v16  ;;  %v3251_v58 = vrot.slane %v3250_v9, 1  ;;  %v2475_v35 = vadd.f32 %v7250_v25, %v2474_v50  ;;  %v8662_v28 = vld [vmem:[#allocation62_spill] sm:$0xff] }
 0x3ce   : > { %v2464_v16 = vmul.f32 1.442695, %v8659_v1  ;;  %5269 = vpow2.f32 %v2456_v37 }
 0x3cf   : > { %v2857_v7 = vadd.f32 %v7185_v44, %v2856_v57  ;;  %v7324_v63 = vmax.f32 %v3250_v9, %v3251_v58  ;;  %v2476_v57 = vadd.f32 %v7259_v6, %v2475_v35  ;;  %5271 = vpow2.f32 %v2458_v15  ;;  %v7338_v58 = vpop.eup %5253  ;;  %v8665_v15 = vld [vmem:[#allocation65_spill] sm:$0xff]  ;;  %v8683_v44 = vld [vmem:[#allocation98_spill] sm:$0xff] }
 0x3d0   : > { %5273 = vpow2.f32 %v2460_v27  ;;  %v7346_v30 = vpop.eup %5255  ;;  %v8668_v27 = vld [vmem:[#allocation67_spill] sm:$0xff] }
 0x3d1   : > { %v7327_v55 = vadd.f32 %v7195_v56, %v2857_v7  ;;  %v3253_v39 = vsub.f32 %v8660_v24, %v7324_v63  ;;  %v3254_v62 = vsub.f32 %v8661_v34, %v7324_v63  ;;  %v3255_v9 = vsub.f32 %v8662_v28, %v7324_v63  ;;  %v8663_v7 = vld [vmem:[#allocation50_spill] sm:$0xff]  ;;  %v8666_v24 = vld [vmem:[#allocation68_spill] sm:$0xff]  ;;  %v7354_v22 = vpop.eup %5257 }
 0x3d2   : > { %v8664_v37 = vsub.f32 %v8663_v7, %v7086_v32  ;;  %v2477_v1 = vadd.f32 %v7268_v38, %v2476_v57  ;;  %v3256_v50 = vsub.f32 %v8665_v15, %v7324_v63  ;;  %5275 = vpow2.f32 %v2462_v51  ;;  %v8667_v28 = vld [vmem:[#allocation70_spill] sm:$0xff]  ;;  %v8669_v57 = vld [vmem:[#allocation69_spill] sm:$0xff]  ;;  %v7361_v15 = vpop.eup %5259 }
 0x3d3   : > { %v3257_v34 = vsub.f32 %v8666_v24, %v7324_v63  ;;  %v3258_v18 = vsub.f32 %v8667_v28, %v7324_v63  ;;  %v3259_v49 = vsub.f32 %v8668_v27, %v7324_v63  ;;  %5277 = vpow2.f32 %v2464_v16  ;;  %v8671_v24 = vld [vmem:[#allocation77_spill] sm:$0xff]  ;;  %v8672_v28 = vld [vmem:[#allocation74_spill] sm:$0xff]  ;;  %v8673_v27 = vld [vmem:[#allocation76_spill] sm:$0xff] }
 0x3d4   : > { %v2466_v35 = vmul.f32 1.442695, %v8664_v37  ;;  %v2478_v32 = vadd.f32 %v7274_v26, %v2477_v1  ;;  %v3260_v7 = vsub.f32 %v8669_v57, %v7324_v63  ;;  %v8670_v37 = vld [vmem:[#allocation75_spill] sm:$0xff]  ;;  %v3262_v46 = vsub.f32 %v8671_v24, %v7324_v63  ;;  %v8674_v16 = vld [vmem:[#allocation82_spill] sm:$0xff]  ;;  %v7371_v26 = vpop.eup %5261 }
 0x3d5   : > { %v3261_v51 = vsub.f32 %v8670_v37, %v7324_v63  ;;  %v3263_v38 = vsub.f32 %v8672_v28, %v7324_v63  ;;  %v3264_v25 = vsub.f32 %v8673_v27, %v7324_v63  ;;  %v3265_v1 = vsub.f32 %v8674_v16, %v7324_v63  ;;  %v8675_v37 = vld [vmem:[#allocation85_spill] sm:$0xff]  ;;  %v8677_v24 = vld [vmem:[#allocation83_spill] sm:$0xff]  ;;  %v7380_v28 = vpop.eup %5263  ;;  %v8679_v16 = vld [vmem:[#allocation90_spill] sm:$0xff] }
 0x3d6   : > { %v2479_v57 = vadd.f32 %v7282_v40, %v2478_v32  ;;  %v3266_v6 = vsub.f32 %v8675_v37, %v7324_v63  ;;  %v8678_v27 = vld [vmem:[#allocation87_spill] sm:$0xff]  ;;  %v8681_v40 = vld [vmem:[#allocation88_spill] sm:$0xff]  ;;  %v7390_v53 = vpop.eup %5265  ;;  %v3284_v54 = vsub.f32 %v7105_v43, %v7324_v63  ;;  %v3285_v3 = vmul.f32 1.442695, %v3253_v39 }
 0x3d7   : > { %v7399_v19 = vpop.eup %5267  ;;  %v8685_v32 = vld [vmem:[#allocation96_spill] sm:$0xff]  ;;  %v3287_v13 = vmul.f32 1.442695, %v3254_v62  ;;  %5279 = vpow2.f32 %v2466_v35  ;;  %v3291_v21 = vmul.f32 1.442695, %v3256_v50  ;;  %v8695_v62 = vrot.slane %v8640_v61, 4 }
 0x3d8   : > { %v2480_v8 = vadd.f32 %v7288_v45, %v2479_v57  ;;  %v8686_v37 = vld [vmem:[#allocation104_spill] sm:$0xff]  ;;  %v7409_v23 = vpop.eup %5269  ;;  %5281 = vpow2.f32 %v3285_v3  ;;  %v3293_v14 = vmul.f32 1.442695, %v3257_v34  ;;  %v3295_v36 = vmul.f32 1.442695, %v3258_v18 }
 0x3d9   : > { %v8688_v45 = vld [vmem:[#allocation48_spill] sm:$0xff]  ;;  %8689 = vst [vmem:[#allocation71_spill] sm:$0xff] %v7409_v23  ;;  %v7418_v11 = vpop.eup %5271  ;;  %5283 = vpow2.f32 %v3287_v13  ;;  %v3297_v39 = vmul.f32 1.442695, %v3259_v49  ;;  %v7435_v35 = vadd.f32 %v8695_v62, %v8640_v61  ;;  %v3299_v50 = vmul.f32 1.442695, %v3260_v7 }
 0x3da   : > { %v2481_v56 = vadd.f32 %v7296_v12, %v2480_v8  ;;  %8691 = vst [vmem:[#allocation72_spill] sm:$0xff] %v7418_v11  ;;  %v7424_v8 = vpop.eup %5273  ;;  %v3289_v12 = vmul.f32 1.442695, %v3255_v9  ;;  %v2859_v3 = vrot.slane %v7327_v55, 4  ;;  %v3301_v9 = vmul.f32 1.442695, %v3261_v51 }
 0x3db   : > { %8692 = vst [vmem:[#allocation81_spill] sm:$0xff] %v7424_v8  ;;  %v3303_v13 = vmul.f32 1.442695, %v3262_v46  ;;  %v3307_v18 = vmul.f32 1.442695, %v3264_v25  ;;  %v8701_v62 = vsub.f32 %v8680_v20, %v7324_v63 }
 0x3dc   : > { %v2482_v2 = vadd.f32 %v7302_v4, %v2481_v56  ;;  %v7427_v48 = vpop.eup %5275  ;;  %5285 = vpow2.f32 %v3289_v12  ;;  %v2096_v12 = vrot.slane %v7435_v35, 2  ;;  %v2860_v61 = vadd.f32 %v2859_v3, %v7327_v55 }
 0x3dd   : > { %8693 = vst [vmem:[#allocation64_spill] sm:$0xff] %v7427_v48  ;;  %v7429_v0 = vpop.eup %5277  ;;  %5287 = vpow2.f32 %v3291_v21  ;;  %v3309_v21 = vmul.f32 1.442695, %v3265_v1  ;;  %v3311_v7 = vmul.f32 1.442695, %v3266_v6  ;;  %v8699_v55 = vsub.f32 %v8678_v27, %v7324_v63 }
 0x3de   : > { %8694 = vst [vmem:[#allocation66_spill] sm:$0xff] %v7429_v0  ;;  %v2483_v57 = vadd.f32 %v7310_v33, %v2482_v2  ;;  %5289 = vpow2.f32 %v3293_v14  ;;  %v3305_v2 = vmul.f32 1.442695, %v3263_v38  ;;  %v8698_v38 = vsub.f32 %v8677_v24, %v7324_v63  ;;  %v5353_v27 = vld [vmem:[#allocation2 + $0x4] sm:$0xf] }
 0x3df   : > { %5291 = vpow2.f32 %v3295_v36  ;;  %v8697_v36 = vsub.f32 %v8676_v10, %v7324_v63  ;;  %v3317_v6 = vmul.f32 1.442695, %v8699_v55  ;;  %v8700_v1 = vsub.f32 %v8679_v16, %v7324_v63 }
 0x3e0   : > { %v2484_v56 = vadd.f32 %v7316_v59, %v2483_v57  ;;  %5293 = vpow2.f32 %v3297_v39  ;;  %v3315_v25 = vmul.f32 1.442695, %v8698_v38  ;;  %v3321_v10 = vmul.f32 1.442695, %v8701_v62 }
 0x3e1   : > { %5295 = vpow2.f32 %v3299_v50  ;;  %v7443_v57 = vpop.eup %5279  ;;  %v3313_v46 = vmul.f32 1.442695, %v8697_v36  ;;  %v3319_v39 = vmul.f32 1.442695, %v8700_v1  ;;  %v8702_v16 = vsub.f32 %v8681_v40, %v7324_v63 }
 0x3e2   : > { %v2485_v34 = vadd.f32 %v7338_v58, %v2484_v56  ;;  %5297 = vpow2.f32 %v3301_v9  ;;  %8696 = vst [vmem:[#allocation62_spill] sm:$0xff] %v7443_v57  ;;  %v7452_v51 = vpop.eup %5281  ;;  %v8703_v40 = vsub.f32 %v8682_v52, %v7324_v63 }
 0x3e3   : > { %5299 = vpow2.f32 %v3303_v13  ;;  %v7463_v56 = vpop.eup %5283  ;;  %v3323_v9 = vmul.f32 1.442695, %v8702_v16 }
 0x3e4   : > { %v2486_v49 = vadd.f32 %v7346_v30, %v2485_v34  ;;  %5301 = vpow2.f32 %v3305_v2  ;;  %v3349_v20 = vadd.f32 %v7463_v56, %v7452_v51 }
 0x3e5   : > { %5303 = vpow2.f32 %v3307_v18 }
 0x3e6   : > { %v2487_v14 = vadd.f32 %v7354_v22, %v2486_v49  ;;  %v7470_v3 = vpop.eup %5285  ;;  %5305 = vpow2.f32 %v3309_v21 }
 0x3e7   : > { %v7479_v13 = vpop.eup %5287  ;;  %5307 = vpow2.f32 %v3311_v7  ;;  %v3350_v36 = vadd.f32 %v7470_v3, %v3349_v20 }
 0x3e8   : > { %v2488_v24 = vadd.f32 %v7361_v15, %v2487_v14  ;;  %v7486_v21 = vpop.eup %5289  ;;  %5309 = vpow2.f32 %v3313_v46  ;;  %v3325_v14 = vmul.f32 1.442695, %v8703_v40 }
 0x3e9   : > { %v7494_v55 = vpop.eup %5291  ;;  %5311 = vpow2.f32 %v3315_v25  ;;  %v3351_v52 = vadd.f32 %v7479_v13, %v3350_v36  ;;  %v8704_v25 = vsub.f32 %v8683_v44, %v7324_v63 }
 0x3ea   : > { %v2489_v2 = vadd.f32 %v7371_v26, %v2488_v24  ;;  %v7501_v62 = vpop.eup %5293  ;;  %5313 = vpow2.f32 %v3317_v6  ;;  %v2861_v24 = vrot.slane %v2860_v61, 2  ;;  %v8705_v6 = vsub.f32 %v8684_v47, %v7324_v63 }
 0x3eb   : > { %v7506_v20 = vpop.eup %5295  ;;  %5315 = vpow2.f32 %v3319_v39  ;;  %v3327_v40 = vmul.f32 1.442695, %v8704_v25  ;;  %v3352_v18 = vadd.f32 %v7486_v21, %v3351_v52  ;;  %v8706_v25 = vsub.f32 %v8685_v32, %v7324_v63 }
 0x3ec   : > { %v2490_v7 = vadd.f32 %v7380_v28, %v2489_v2  ;;  %v7514_v1 = vpop.eup %5297  ;;  %5317 = vpow2.f32 %v3321_v10  ;;  %v3329_v36 = vmul.f32 1.442695, %v8705_v6  ;;  %v8707_v10 = vsub.f32 %v8686_v37, %v7324_v63 }
 0x3ed   : > { %v7522_v39 = vpop.eup %5299  ;;  %5319 = vpow2.f32 %v3323_v9  ;;  %v3331_v46 = vmul.f32 1.442695, %v8706_v25  ;;  %v3353_v52 = vadd.f32 %v7494_v55, %v3352_v18  ;;  %v2862_v6 = vadd.f32 %v2861_v24, %v2860_v61 }
 0x3ee   : > { %v2491_v2 = vadd.f32 %v7390_v53, %v2490_v7  ;;  %v3333_v49 = vmul.f32 1.442695, %v8707_v10  ;;  %v7531_v47 = vpop.eup %5301  ;;  %5321 = vpow2.f32 %v3325_v14  ;;  %v8708_v32 = vsub.f32 %v8687_v60, %v7324_v63 }
 0x3ef   : > { %v7536_v50 = vpop.eup %5303  ;;  %5323 = vpow2.f32 %v3327_v40  ;;  %v2097_v37 = vadd.f32 %v2096_v12, %v7435_v35  ;;  %v8709_v61 = vsub.f32 %v8688_v45, %v7324_v63  ;;  %v3354_v24 = vadd.f32 %v7501_v62, %v3353_v52 }
 0x3f0   : > { %v2492_v44 = vadd.f32 %v7399_v19, %v2491_v2  ;;  %v3335_v2 = vmul.f32 1.442695, %v8708_v32  ;;  %v7545_v14 = vpop.eup %5305  ;;  %5325 = vpow2.f32 %v3329_v36  ;;  %v8710_v35 = vsub.f32 %v8690_v42, %v7324_v63 }
 0x3f1   : > { %v3337_v18 = vmul.f32 1.442695, %v8709_v61  ;;  %5327 = vpow2.f32 %v3331_v46  ;;  %v8711_v36 = vsub.f32 %v7093_v29, %v7324_v63  ;;  %v3355_v10 = vadd.f32 %v7506_v20, %v3354_v24 }
 0x3f2   : > { %v2493_v9 = vadd.f32 %v7409_v23, %v2492_v44  ;;  %v7553_v44 = vpop.eup %5307  ;;  %v3339_v12 = vmul.f32 1.442695, %v8710_v35  ;;  %5329 = vpow2.f32 %v3333_v49  ;;  %v2863_v52 = vrot.slane %v2862_v6, 1 }
 0x3f3   : > { %v3341_v25 = vmul.f32 1.442695, %v8711_v36  ;;  %v7562_v45 = vpop.eup %5309  ;;  %5331 = vpow2.f32 %v3335_v2  ;;  %v8712_v42 = vsub.f32 %v7116_v17, %v7324_v63  ;;  %v2098_v29 = vrot.slane %v2097_v37, 1 }
 0x3f4   : > { %v2494_v60 = vadd.f32 %v7418_v11, %v2493_v9  ;;  %v7567_v61 = vpop.eup %5311  ;;  %5333 = vpow2.f32 %v3337_v18  ;;  %v8713_v49 = vsub.f32 %v7088_v5, %v7324_v63  ;;  %v3356_v36 = vadd.f32 %v7514_v1, %v3355_v10 }
 0x3f5   : > { %v3343_v9 = vmul.f32 1.442695, %v8712_v42  ;;  %v7573_v35 = vpop.eup %5313  ;;  %5335 = vpow2.f32 %v3339_v12  ;;  %v3347_v17 = vmul.f32 1.442695, %v3284_v54  ;;  %v2864_v18 = vadd.f32 %v2863_v52, %v2862_v6 }
 0x3f6   : > { %v2495_v46 = vadd.f32 %v7424_v8, %v2494_v60  ;;  %v3345_v24 = vmul.f32 1.442695, %v8713_v49  ;;  %v7581_v40 = vpop.eup %5315  ;;  %5337 = vpow2.f32 %v3341_v25  ;;  %v3357_v5 = vadd.f32 %v7522_v39, %v3356_v36 }
 0x3f7   : > { %v7587_v60 = vpop.eup %5317  ;;  %5339 = vpow2.f32 %v3343_v9  ;;  %v2866_v7 = vunpack.c.l.bf16 %v5353_v27 }
 0x3f8   : > { %v2496_v2 = vadd.f32 %v7427_v48, %v2495_v46  ;;  %v7592_v42 = vpop.eup %5319  ;;  %v2099_v46 = vadd.f32 %v2098_v29, %v2097_v37  ;;  %5341 = vpow2.f32 %v3345_v24  ;;  %v3358_v43 = vadd.f32 %v7531_v47, %v3357_v5 }
 0x3f9   : > { %v7595_v12 = vpop.eup %5321  ;;  %5343 = vpow2.f32 %v3347_v17 }
 0x3fa   : > { %v2497_v49 = vadd.f32 %v7429_v0, %v2496_v2  ;;  %v7600_v63 = vpop.eup %5323  ;;  %v3359_v52 = vadd.f32 %v7536_v50, %v3358_v43  ;;  %5345 = vrcp.f32 %v2864_v18 }
 0x3fb   : > { %v7603_v25 = vpop.eup %5325  ;;  %5347 = vrcp.f32 %v2099_v46 }
 0x3fc   : > { %v2498_v6 = vadd.f32 %v7443_v57, %v2497_v49  ;;  %v7608_v9 = vpop.eup %5327  ;;  %v3360_v36 = vadd.f32 %v7545_v14, %v3359_v52 }
 0x3fd   : > { %v7610_v24 = vpop.eup %5329 }
 0x3fe   : > { %v2499_v29 = vrot.slane %v2498_v6, 4  ;;  %v7615_v17 = vpop.eup %5331  ;;  %v3361_v18 = vadd.f32 %v7553_v44, %v3360_v36 }
 0x3ff   : > { %v7617_v49 = vpop.eup %5333 }
 0x400   : > { %v2500_v5 = vadd.f32 %v2499_v29, %v2498_v6  ;;  %v7622_v37 = vpop.eup %5335  ;;  %v3362_v52 = vadd.f32 %v7562_v45, %v3361_v18  ;;  %v5354_v18 = vld [vmem:[#allocation2] sm:$0xf] }
 0x401   : > { %v7624_v54 = vpop.eup %5337  ;;  %v2101_v34 = vunpack.c.l.bf16 %v5354_v18 }
 0x402   : > { %v2501_v46 = vrot.slane %v2500_v5, 2  ;;  %v7629_v10 = vpop.eup %5339  ;;  %v3363_v36 = vadd.f32 %v7567_v61, %v3362_v52 }
 0x403   : > { %v7631_v29 = vpop.eup %5341 }
 0x404   : > { %v2502_v6 = vadd.f32 %v2501_v46, %v2500_v5  ;;  %v7636_v32 = vpop.eup %5343  ;;  %v3364_v2 = vadd.f32 %v7573_v35, %v3363_v36  ;;  %v5355_v5 = vld [vmem:[#allocation3] sm:$0xf] }
 0x405   : > { %v5346_v38 = vpop.eup %5345  ;;  %v2506_v11 = vunpack.c.l.bf16 %v5355_v5 }
 0x406   : > { %v2503_v16 = vrot.slane %v2502_v6, 1  ;;  %v5348_v46 = vpop.eup %5347  ;;  %v2867_v0 = vmul.f32 %v5346_v38, %v2866_v7  ;;  %v3365_v52 = vadd.f32 %v7581_v40, %v3364_v2  ;;  %v8715_v7 = vld [vmem:[#allocation89_spill] sm:$0xff] }
 0x407   : > { %v2102_v8 = vmul.f32 %v5348_v46, %v2101_v34 }
 0x408   : > { %v2504_v57 = vadd.f32 %v2503_v16, %v2502_v6  ;;  %v2868_v43 = vpack.c.bf16 %v2867_v0, %v2867_v0  ;;  %v3366_v48 = vadd.f32 %v7587_v60, %v3365_v52  ;;  %v8718_v6 = vld [vmem:[#allocation78_spill] sm:$0xff] }
 0x40a   : > { %5349 = vrcp.f32 %v2504_v57  ;;  %v2886_v27 = vrot.slane %v2868_v43, 2  ;;  %v3367_v23 = vadd.f32 %v7592_v42, %v3366_v48  ;;  %v8714_v57 = vld [vmem:[#allocation91_spill] sm:$0xff] }
 0x40b   : > { %v8716_v2 = vpack.c.bf16 %v8714_v57, %v8715_v7  ;;  %v8717_v43 = vld [vmem:[#allocation79_spill] sm:$0xff] }
 0x40c   : > { %4797 = vmatprep.subr.bf16.mxu1 %v2886_v27  ;;  %v3368_v18 = vadd.f32 %v7595_v12, %v3367_v23  ;;  %v8719_v23 = vpack.c.bf16 %v8717_v43, %v8718_v6  ;;  %v8727_v43 = vld [vmem:[#allocation100_spill] sm:$0xff] }
 0x40d   : > { %4798 = vmatpush3.bf16.xpose.msra.mxu1 %v2886_v27  ;;  %v8720_v27 = vld [vmem:[#allocation95_spill] sm:$0xff] }
 0x40e   : > { %v3369_v36 = vadd.f32 %v7600_v63, %v3368_v18  ;;  %v8721_v18 = vld [vmem:[#allocation93_spill] sm:$0xff] }
 0x410   : > { %v3370_v38 = vadd.f32 %v7603_v25, %v3369_v36  ;;  %v8722_v36 = vpack.c.bf16 %v8720_v27, %v8721_v18 }
 0x412   : > { %v3371_v34 = vadd.f32 %v7608_v9, %v3370_v38  ;;  %v8723_v38 = vld [vmem:[#allocation99_spill] sm:$0xff] }
 0x414   : > { %v5350_v16 = vpop.eup %5349  ;;  %4800 = vmatmul.mubr.bf16.vlgmr.msra.gmra.mrb[36].mxu1 %v8716_v2  ;;  %v3372_v48 = vadd.f32 %v7610_v24, %v3371_v34 }
 0x415   : > { %v2507_v0 = vmul.f32 %v5350_v16, %v2506_v11  ;;  %4803 = vmatprep.mubr.bf16.mxu1 %v8719_v23  ;;  %v8724_v16 = vld [vmem:[#allocation97_spill] sm:$0xff] }
 0x416   : > { %v3373_v46 = vadd.f32 %v7615_v17, %v3372_v48  ;;  %v8725_v57 = vpack.c.bf16 %v8723_v38, %v8724_v16  ;;  %v8726_v48 = vld [vmem:[#allocation101_spill] sm:$0xff]  ;;  %v8733_v16 = vld [vmem:[#allocation103_spill] sm:$0xff] }
 0x417   : > { %v8728_v6 = vpack.c.bf16 %v8726_v48, %v8727_v43  ;;  %v8732_v38 = vld [vmem:[#allocation105_spill] sm:$0xff]  ;;  %v8736_v48 = vld [vmem:[#allocation46_spill] sm:$0xff]  ;;  %v8737_v43 = vld [vmem:[#allocation52_spill] sm:$0xff] }
 0x418   : > { %v3374_v5 = vadd.f32 %v7617_v49, %v3373_v46  ;;  %v8729_v46 = vld [vmem:[#allocation35_spill] sm:$0xff] }
 0x41a   : > { %v3375_v52 = vadd.f32 %v7622_v37, %v3374_v5  ;;  %v8730_v5 = vld [vmem:[#allocation102_spill] sm:$0xff] }
 0x41b   : > { %v8731_v27 = vpack.c.bf16 %v8729_v46, %v8730_v5  ;;  %v8739_v46 = vld [vmem:[#allocation109_spill] sm:$0xff]  ;;  %v8740_v5 = vld [vmem:[#allocation108_spill] sm:$0xff] }
 0x41c   : > { %4804 = vmatmul.mubr.bf16.gmra.mrb[40].mxu1 %v8722_v36  ;;  %v3376_v11 = vadd.f32 %v7624_v54, %v3375_v52 }
 0x41d   : > { %4807 = vmatprep.mubr.bf16.mxu1 %v8725_v57  ;;  %v8734_v57 = vpack.c.bf16 %v8732_v38, %v8733_v16  ;;  %v8743_v38 = vld [vmem:[#allocation7_spill] sm:$0xff] }
 0x41e   : > { %v3377_v34 = vadd.f32 %v7629_v10, %v3376_v11  ;;  %v8735_v11 = vpack.c.bf16 %v7056_v31, %v7045_v41  ;;  %v8745_v31 = vld [vmem:[#allocation9_spill] sm:$0xff] }
 0x420   : > { %v3378_v7 = vadd.f32 %v7631_v29, %v3377_v34 }
 0x422   : > { %v3379_v2 = vadd.f32 %v7636_v32, %v3378_v7 }
 0x424   : > { %4808 = vmatmul.mubr.bf16.gmra.mrb[44].mxu1 %v8728_v6  ;;  %v3380_v23 = vrot.slane %v3379_v2, 4  ;;  %v8738_v6 = vpack.c.bf16 %v8736_v48, %v8737_v43  ;;  %v8748_v43 = vld [vmem:[#allocation20_spill] sm:$0xff] }
 0x425   : > { %4811 = vmatprep.mubr.bf16.mxu1 %v8731_v27 }
 0x426   : > { %v3381_v52 = vadd.f32 %v3380_v23, %v3379_v2  ;;  %v8741_v2 = vpack.c.bf16 %v8739_v46, %v8740_v5  ;;  %v5356_v23 = vld [vmem:[#allocation3 + $0x4] sm:$0xf]  ;;  %v8751_v5 = vld [vmem:[#allocation18_spill] sm:$0xff] }
 0x427   : > { %v3387_v27 = vunpack.c.l.bf16 %v5356_v23 }
 0x428   : > { %v3382_v18 = vrot.slane %v3381_v52, 2 }
 0x42a   : > { %v3383_v36 = vadd.f32 %v3382_v18, %v3381_v52  ;;  %v8742_v18 = vld [vmem:[#allocation11_spill] sm:$0xff] }
 0x42b   : > { %v8744_v16 = vpack.c.bf16 %v8742_v18, %v8743_v38  ;;  %v2508_v38 = vpack.c.bf16 %v2507_v0, %v2507_v0  ;;  %v8792_v0 = vld [vmem:[#allocation27_spill] sm:$0xff] }
 0x42c   : > { %4812 = vmatmul.mubr.bf16.gmra.mrb[48].mxu1 %v8734_v57  ;;  %v3384_v34 = vrot.slane %v3383_v36, 1  ;;  %v8746_v57 = vld [vmem:[#allocation6_spill] sm:$0xff] }
 0x42d   : > { %4815 = vmatprep.mubr.bf16.mxu1 %v8735_v11 }
 0x42e   : > { %v3385_v7 = vadd.f32 %v3384_v34, %v3383_v36  ;;  %v8747_v36 = vpack.c.bf16 %v8745_v31, %v8746_v57  ;;  %v2103_v34 = vpack.c.bf16 %v2102_v8, %v2102_v8  ;;  %v8757_v8 = vpack.c.bf16 %v7463_v56, %v7452_v51 }
 0x42f   : > { %v8759_v31 = vpack.c.bf16 %v7494_v55, %v7486_v21  ;;  %v8760_v57 = vpack.c.bf16 %v7506_v20, %v7501_v62  ;;  %v8761_v51 = vpack.c.bf16 %v7522_v39, %v7514_v1  ;;  %v8762_v56 = vpack.c.bf16 %v7536_v50, %v7531_v47 }
 0x430   : > { %5351 = vrcp.f32 %v3385_v7  ;;  %v3571_v48 = vrot.slane %v2103_v34, 2  ;;  %v8765_v21 = vpack.c.bf16 %v7581_v40, %v7573_v35  ;;  %v8766_v55 = vpack.c.bf16 %v7592_v42, %v7587_v60  ;;  %v8774_v40 = vld [vmem:[#allocation8_spill] sm:$0xff]  ;;  %v8779_v60 = vld [vmem:[#allocation17_spill] sm:$0xff]  ;;  %v8795_v34 = vld [vmem:[#allocation31_spill] sm:$0xff] }
 0x431   : > { %v8767_v50 = vpack.c.bf16 %v7600_v63, %v7595_v12  ;;  %v8768_v1 = vpack.c.bf16 %v7608_v9, %v7603_v25  ;;  %v8769_v62 = vpack.c.bf16 %v7615_v17, %v7610_v24  ;;  %v8770_v20 = vpack.c.bf16 %v7622_v37, %v7617_v49  ;;  %v8782_v12 = vld [vmem:[#allocation21_spill] sm:$0xff]  ;;  %v8785_v25 = vld [vmem:[#allocation23_spill] sm:$0xff]  ;;  %v8786_v37 = vld [vmem:[#allocation22_spill] sm:$0xff] }
 0x432   : > { %v8771_v39 = vpack.c.bf16 %v7629_v10, %v7624_v54  ;;  %v8772_v47 = vpack.c.bf16 %v7636_v32, %v7631_v29  ;;  %v8776_v32 = vld [vmem:[#allocation13_spill] sm:$0xff]  ;;  %v8780_v10 = vld [vmem:[#allocation15_spill] sm:$0xff]  ;;  %v8787_v9 = vpack.c.bf16 %v8785_v25, %v8786_v37  ;;  %v8789_v17 = vld [vmem:[#allocation24_spill] sm:$0xff] }
 0x433   : > { %v8781_v42 = vpack.c.bf16 %v8779_v60, %v8780_v10  ;;  %v8783_v54 = vld [vmem:[#allocation19_spill] sm:$0xff]  ;;  %v8788_v24 = vld [vmem:[#allocation25_spill] sm:$0xff]  ;;  %v8839_v37 = vld [vmem:[#allocation112_spill] sm:$0xff] }
 0x434   : > { %4816 = vmatmul.mubr.bf16.gmra.mrb[52].mxu1 %v8738_v6  ;;  %v8749_v6 = vld [vmem:[#allocation16_spill] sm:$0xff]  ;;  %v8784_v63 = vpack.c.bf16 %v8782_v12, %v8783_v54  ;;  %v8790_v49 = vpack.c.bf16 %v8788_v24, %v8789_v17  ;;  %v8791_v29 = vld [vmem:[#allocation29_spill] sm:$0xff]  ;;  %v8833_v10 = vld [vmem:[#allocation59_spill] sm:$0xff] }
 0x435   : > { %4819 = vmatprep.mubr.bf16.mxu1 %v8741_v2  ;;  %v8750_v46 = vpack.c.bf16 %v8748_v43, %v8749_v6  ;;  %v8752_v2 = vld [vmem:[#allocation14_spill] sm:$0xff]  ;;  %v8842_v17 = vld [vmem:[#allocation73_spill] sm:$0xff] }
 0x436   : > { %v8753_v23 = vpack.c.bf16 %v8751_v5, %v8752_v2  ;;  %v8798_v43 = vld [vmem:[#allocation34_spill] sm:$0xff]  ;;  %v8801_v5 = vld [vmem:[#allocation37_spill] sm:$0xff] }
 0x437   : > { %v8836_v54 = vld [vmem:[#allocation110_spill] sm:$0xff] }
 0x43a   : > { %v5352_v52 = vpop.eup %5351 }
 0x43b   : > { %v3388_v41 = vmul.f32 %v5352_v52, %v3387_v27  ;;  %v8754_v27 = vld [vmem:[#allocation32_spill] sm:$0xff] }
 0x43c   : > { %4820 = vmatmul.mubr.bf16.gmra.mrb[56].mxu1 %v8744_v16  ;;  %v8755_v52 = vld [vmem:[#allocation28_spill] sm:$0xff]  ;;  %v8758_v16 = vpack.c.bf16 %v7479_v13, %v7470_v3  ;;  %v8763_v3 = vpack.c.bf16 %v7553_v44, %v7545_v14  ;;  %v8764_v13 = vpack.c.bf16 %v7567_v61, %v7562_v45  ;;  %v8773_v14 = vld [vmem:[#allocation10_spill] sm:$0xff]  ;;  %v5390_v45 = vmov 0.0  }
 0x43d   : > { %4823 = vmatprep.mubr.bf16.mxu1 %v8747_v36  ;;  %v3389_v11 = vpack.c.bf16 %v3388_v41, %v3388_v41  ;;  %v8756_v18 = vpack.c.bf16 %v8754_v27, %v8755_v52  ;;  %v7707_v41 = vrot.slane %v2508_v38, 2  ;;  %v8775_v44 = vpack.c.bf16 %v8773_v14, %v8774_v40  ;;  %1616 = vst.msk [vmem:[%s7753_s16 + $0x10] sm:$0xff] %vm1331_vm11, %v5390_v45  ;;  %v8777_v61 = vld [vmem:[#allocation12_spill] sm:$0xff]  ;;  %v8825_v14 = vld [vmem:[#allocation41_spill] sm:$0xff] }
 0x43e   : > { %1614 = vst.msk [vmem:[%s7753_s16] sm:$0xff] %vm1331_vm11, %v5390_v45  ;;  %1615 = vst.msk [vmem:[%s7753_s16 + $0x8] sm:$0xff] %vm1331_vm11, %v5390_v45  ;;  %v8778_v35 = vpack.c.bf16 %v8776_v32, %v8777_v61  ;;  %v8793_v36 = vpack.c.bf16 %v8791_v29, %v8792_v0  ;;  %v8804_v27 = vld [vmem:[#allocation40_spill] sm:$0xff]  ;;  %v8830_v61 = vld [vmem:[#allocation61_spill] sm:$0xff]  ;;  %v8844_v29 = vpack.c.bf16 %v7316_v59, %v7310_v33 }
 0x43f   : > { %v3407_v7 = vrot.slane %v3389_v11, 2  ;;  %1617 = vst.msk [vmem:[%s7753_s16 + $0x18] sm:$0xff] %vm1331_vm11, %v5390_v45  ;;  %1618 = vst.msk [vmem:[%s7753_s16 + $0x20] sm:$0xff] %vm1331_vm11, %v5390_v45  ;;  %v8794_v11 = vld [vmem:[#allocation33_spill] sm:$0xff]  ;;  %v8845_v0 = vpack.c.bf16 %v7346_v30, %v7338_v58  ;;  %v8850_v33 = vld [vmem:[#allocation71_spill] sm:$0xff] }
 0x440   : > { %1619 = vst.msk [vmem:[%s7753_s16 + $0x28] sm:$0xff] %vm1331_vm11, %v5390_v45  ;;  %1620 = vst.msk [vmem:[%s7753_s16 + $0x30] sm:$0xff] %vm1331_vm11, %v5390_v45  ;;  %v8852_v30 = vld [vmem:[#allocation64_spill] sm:$0xff]  ;;  %v8853_v58 = vld [vmem:[#allocation81_spill] sm:$0xff] }
 0x441   : > { %4865 = vmatprep.subr.bf16.mxu1 %v3407_v7  ;;  %1621 = vst.msk [vmem:[%s7753_s16 + $0x38] sm:$0xff] %vm1331_vm11, %v5390_v45  ;;  %1622 = vst.msk [vmem:[%s7753_s16 + $0x40] sm:$0xff] %vm1331_vm11, %v5390_v45 }
 0x442   : > { %4866 = vmatpush3.bf16.xpose.msra.mxu1 %v3407_v7  ;;  %1623 = vst.msk [vmem:[%s7753_s16 + $0x48] sm:$0xff] %vm1331_vm11, %v5390_v45  ;;  %1624 = vst.msk [vmem:[%s7753_s16 + $0x50] sm:$0xff] %vm1331_vm11, %v5390_v45  ;;  %v8796_v7 = vpack.c.bf16 %v8794_v11, %v8795_v34  ;;  %v8847_v11 = vpack.c.bf16 %v7380_v28, %v7371_v26  ;;  %v8849_v34 = vld [vmem:[#allocation72_spill] sm:$0xff] }
 0x443   : > { %4899 = vmatprep.subr.bf16.mxu1 %v3571_v48  ;;  %1625 = vst.msk [vmem:[%s7753_s16 + $0x58] sm:$0xff] %vm1331_vm11, %v5390_v45  ;;  %1626 = vst.msk [vmem:[%s7753_s16 + $0x60] sm:$0xff] %vm1331_vm11, %v5390_v45  ;;  %v8851_v59 = vpack.c.bf16 %v8849_v34, %v8850_v33 }
 0x444   : > { %4824 = vmatmul.mubr.bf16.gmra.mrb[60].mxu1 %v8750_v46  ;;  %1627 = vst.msk [vmem:[%s7753_s16 + $0x68] sm:$0xff] %vm1331_vm11, %v5390_v45  ;;  %1628 = vst.msk [vmem:[%s7753_s16 + $0x70] sm:$0xff] %vm1331_vm11, %v5390_v45  ;;  %v8800_v46 = vld [vmem:[#allocation38_spill] sm:$0xff] }
 0x445   : > { %4827 = vmatprep.mubr.bf16.mxu1 %v8753_v23  ;;  %1629 = vst.msk [vmem:[%s7753_s16 + $0x78] sm:$0xff] %vm1331_vm11, %v5390_v45  ;;  %1630 = vst.msk [vmem:[%s7753_s16 + $0x80] sm:$0xff] %vm1331_vm11, %v5390_v45  ;;  %v8802_v2 = vpack.c.bf16 %v8800_v46, %v8801_v5  ;;  %v8803_v23 = vld [vmem:[#allocation42_spill] sm:$0xff]  ;;  %v3898_v28 = vld [vmem:[%s7753_s16] sm:$0xff] }
 0x446   : > { %1631 = vst.msk [vmem:[%s7753_s16 + $0x88] sm:$0xff] %vm1331_vm11, %v5390_v45  ;;  %1632 = vst.msk [vmem:[%s7753_s16 + $0x90] sm:$0xff] %vm1331_vm11, %v5390_v45  ;;  %v8805_v52 = vpack.c.bf16 %v8803_v23, %v8804_v27  ;;  %v3900_v26 = vld [vmem:[%s7753_s16 + $0x10] sm:$0xff]  ;;  %v3899_v46 = vld [vmem:[%s7753_s16 + $0x8] sm:$0xff] }
 0x447   : > { %1633 = vst.msk [vmem:[%s7753_s16 + $0x98] sm:$0xff] %vm1331_vm11, %v5390_v45  ;;  %1634 = vst.msk [vmem:[%s7753_s16 + $0xa0] sm:$0xff] %vm1331_vm11, %v5390_v45 }
 0x448   : > { %1635 = vst.msk [vmem:[%s7753_s16 + $0xa8] sm:$0xff] %vm1331_vm11, %v5390_v45  ;;  %1636 = vst.msk [vmem:[%s7753_s16 + $0xb0] sm:$0xff] %vm1331_vm11, %v5390_v45 }
 0x449   : > { %1637 = vst.msk [vmem:[%s7753_s16 + $0xb8] sm:$0xff] %vm1331_vm11, %v5390_v45  ;;  %1638 = vst.msk [vmem:[%s7753_s16 + $0xc0] sm:$0xff] %vm1331_vm11, %v5390_v45 }
 0x44a   : > { %1639 = vst.msk [vmem:[%s7753_s16 + $0xc8] sm:$0xff] %vm1331_vm11, %v5390_v45  ;;  %1640 = vst.msk [vmem:[%s7753_s16 + $0xd0] sm:$0xff] %vm1331_vm11, %v5390_v45 }
 0x44b   : > { %1641 = vst.msk [vmem:[%s7753_s16 + $0xd8] sm:$0xff] %vm1331_vm11, %v5390_v45  ;;  %1642 = vst.msk [vmem:[%s7753_s16 + $0xe0] sm:$0xff] %vm1331_vm11, %v5390_v45 }
 0x44c   : > { %4828 = vmatmul.mubr.bf16.gmra.mrb[64].mxu1 %v8756_v18  ;;  %1643 = vst.msk [vmem:[%s7753_s16 + $0xe8] sm:$0xff] %vm1331_vm11, %v5390_v45  ;;  %1644 = vst.msk [vmem:[%s7753_s16 + $0xf0] sm:$0xff] %vm1331_vm11, %v5390_v45  ;;  %v8806_v18 = vld [vmem:[#allocation47_spill] sm:$0xff] }
 0x44d   : > { %4867 = vmatprep.mubr.bf16.mxu1 %v8757_v8  ;;  %1645 = vst.msk [vmem:[%s7753_s16 + $0xf8] sm:$0xff] %vm1331_vm11, %v5390_v45  ;;  %1646 = vst.msk [vmem:[%s7758_s21] sm:$0xff] %vm1331_vm11, %v5390_v45  ;;  %v8807_v8 = vld [vmem:[#allocation44_spill] sm:$0xff] }
 0x44e   : > { %1647 = vst.msk [vmem:[%s7758_s21 + $0x8] sm:$0xff] %vm1331_vm11, %v5390_v45  ;;  %1648 = vst.msk [vmem:[%s7758_s21 + $0x10] sm:$0xff] %vm1331_vm11, %v5390_v45  ;;  %v8808_v38 = vpack.c.bf16 %v8806_v18, %v8807_v8  ;;  %v3904_v18 = vld [vmem:[%s7753_s16 + $0x30] sm:$0xff]  ;;  %v3902_v8 = vld [vmem:[%s7753_s16 + $0x20] sm:$0xff] }
 0x44f   : > { %1649 = vst.msk [vmem:[%s7758_s21 + $0x18] sm:$0xff] %vm1331_vm11, %v5390_v45  ;;  %1650 = vst.msk [vmem:[%s7758_s21 + $0x20] sm:$0xff] %vm1331_vm11, %v5390_v45 }
 0x450   : > { %1651 = vst.msk [vmem:[%s7758_s21 + $0x28] sm:$0xff] %vm1331_vm11, %v5390_v45  ;;  %1652 = vst.msk [vmem:[%s7758_s21 + $0x30] sm:$0xff] %vm1331_vm11, %v5390_v45 }
 0x451   : > { %1653 = vst.msk [vmem:[%s7758_s21 + $0x38] sm:$0xff] %vm1331_vm11, %v5390_v45  ;;  %1654 = vst.msk [vmem:[%s7758_s21 + $0x40] sm:$0xff] %vm1331_vm11, %v5390_v45 }
 0x452   : > { %1655 = vst.msk [vmem:[%s7758_s21 + $0x48] sm:$0xff] %vm1331_vm11, %v5390_v45  ;;  %1656 = vst.msk [vmem:[%s7758_s21 + $0x50] sm:$0xff] %vm1331_vm11, %v5390_v45 }
 0x453   : > { %1657 = vst.msk [vmem:[%s7758_s21 + $0x58] sm:$0xff] %vm1331_vm11, %v5390_v45  ;;  %1658 = vst.msk [vmem:[%s7758_s21 + $0x60] sm:$0xff] %vm1331_vm11, %v5390_v45 }
 0x454   : > { %4868 = vmatmul.mubr.bf16.vlgmr.msra.gmra.mrb[68].mxu1 %v8758_v16  ;;  %1659 = vst.msk [vmem:[%s7758_s21 + $0x68] sm:$0xff] %vm1331_vm11, %v5390_v45  ;;  %1660 = vst.msk [vmem:[%s7758_s21 + $0x70] sm:$0xff] %vm1331_vm11, %v5390_v45  ;;  %v8809_v16 = vld [vmem:[#allocation51_spill] sm:$0xff] }
 0x455   : > { %4871 = vmatprep.mubr.bf16.mxu1 %v8759_v31  ;;  %4900 = vmatpush3.bf16.xpose.msra.mxu1 %v3571_v48  ;;  %1661 = vst.msk [vmem:[%s7758_s21 + $0x78] sm:$0xff] %vm1331_vm11, %v5390_v45  ;;  %1662 = vst.msk [vmem:[%s7758_s21 + $0x80] sm:$0xff] %vm1331_vm11, %v5390_v45  ;;  %v8797_v48 = vld [vmem:[#allocation36_spill] sm:$0xff] }
 0x456   : > { %4933 = vmatprep.subr.bf16.mxu1 %v7707_v41  ;;  %1663 = vst.msk [vmem:[%s7758_s21 + $0x88] sm:$0xff] %vm1331_vm11, %v5390_v45  ;;  %1664 = vst.msk [vmem:[%s7758_s21 + $0x90] sm:$0xff] %vm1331_vm11, %v5390_v45  ;;  %v8799_v6 = vpack.c.bf16 %v8797_v48, %v8798_v43 }
 0x457   : > { %1665 = vst.msk [vmem:[%s7758_s21 + $0x98] sm:$0xff] %vm1331_vm11, %v5390_v45  ;;  %1666 = vst.msk [vmem:[%s7758_s21 + $0xa0] sm:$0xff] %vm1331_vm11, %v5390_v45 }
 0x458   : > { %1667 = vst.msk [vmem:[%s7758_s21 + $0xa8] sm:$0xff] %vm1331_vm11, %v5390_v45  ;;  %1668 = vst.msk [vmem:[%s7758_s21 + $0xb0] sm:$0xff] %vm1331_vm11, %v5390_v45 }
 0x459   : > { %1669 = vst.msk [vmem:[%s7758_s21 + $0xb8] sm:$0xff] %vm1331_vm11, %v5390_v45  ;;  %1670 = vst.msk [vmem:[%s7758_s21 + $0xc0] sm:$0xff] %vm1331_vm11, %v5390_v45 }
 0x45a   : > { %1671 = vst.msk [vmem:[%s7758_s21 + $0xc8] sm:$0xff] %vm1331_vm11, %v5390_v45  ;;  %1672 = vst.msk [vmem:[%s7758_s21 + $0xd0] sm:$0xff] %vm1331_vm11, %v5390_v45 }
 0x45b   : > { %1673 = vst.msk [vmem:[%s7758_s21 + $0xd8] sm:$0xff] %vm1331_vm11, %v5390_v45  ;;  %1674 = vst.msk [vmem:[%s7758_s21 + $0xe0] sm:$0xff] %vm1331_vm11, %v5390_v45 }
 0x45c   : > { %4872 = vmatmul.mubr.bf16.gmra.mrb[72].mxu1 %v8760_v57  ;;  %1675 = vst.msk [vmem:[%s7758_s21 + $0xe8] sm:$0xff] %vm1331_vm11, %v5390_v45  ;;  %1676 = vst.msk [vmem:[%s7758_s21 + $0xf0] sm:$0xff] %vm1331_vm11, %v5390_v45  ;;  %v8812_v57 = vld [vmem:[#allocation54_spill] sm:$0xff] }
 0x45d   : > { %4875 = vmatprep.mubr.bf16.mxu1 %v8761_v51  ;;  %1677 = vst.msk [vmem:[%s7758_s21 + $0xf8] sm:$0xff] %vm1331_vm11, %v5390_v45  ;;  %v8813_v51 = vld [vmem:[#allocation53_spill] sm:$0xff]  ;;  %v8828_v45 = vld [vmem:[#allocation39_spill] sm:$0xff] }
 0x464   : > { %4876 = vmatmul.mubr.bf16.gmra.mrb[76].mxu1 %v8762_v56  ;;  %v8814_v56 = vpack.c.bf16 %v8812_v57, %v8813_v51  ;;  %v3903_v57 = vld [vmem:[%s7753_s16 + $0x28] sm:$0xff] }
 0x465   : > { %4879 = vmatprep.mubr.bf16.mxu1 %v8763_v3  ;;  %v8815_v3 = vld [vmem:[#allocation58_spill] sm:$0xff] }
 0x46c   : > { %4880 = vmatmul.mubr.bf16.gmra.mrb[80].mxu1 %v8764_v13  ;;  %v8816_v13 = vld [vmem:[#allocation56_spill] sm:$0xff] }
 0x46d   : > { %4883 = vmatprep.mubr.bf16.mxu1 %v8765_v21  ;;  %v8817_v21 = vpack.c.bf16 %v8815_v3, %v8816_v13 }
 0x474   : > { %4884 = vmatmul.mubr.bf16.gmra.mrb[84].mxu1 %v8766_v55  ;;  %v8818_v55 = vld [vmem:[#allocation63_spill] sm:$0xff] }
 0x475   : > { %4887 = vmatprep.mubr.bf16.mxu1 %v8767_v50  ;;  %v8819_v50 = vld [vmem:[#allocation60_spill] sm:$0xff] }
 0x47c   : > { %4888 = vmatmul.mubr.bf16.gmra.mrb[88].mxu1 %v8768_v1  ;;  %v8820_v1 = vpack.c.bf16 %v8818_v55, %v8819_v50  ;;  %v3908_v55 = vld [vmem:[%s7753_s16 + $0x50] sm:$0xff]  ;;  %v3906_v50 = vld [vmem:[%s7753_s16 + $0x40] sm:$0xff] }
 0x47d   : > { %4891 = vmatprep.mubr.bf16.mxu1 %v8769_v62  ;;  %v8821_v62 = vld [vmem:[#allocation30_spill] sm:$0xff] }
 0x484   : > { %4892 = vmatmul.mubr.bf16.gmra.mrb[92].mxu1 %v8770_v20  ;;  %v8822_v20 = vld [vmem:[#allocation26_spill] sm:$0xff] }
 0x485   : > { %4895 = vmatprep.mubr.bf16.mxu1 %v8771_v39  ;;  %v8823_v39 = vpack.c.bf16 %v8821_v62, %v8822_v20  ;;  %v3909_v62 = vld [vmem:[%s7753_s16 + $0x58] sm:$0xff] }
 0x48c   : > { %4896 = vmatmul.mubr.bf16.gmra.mrb[96].mxu1 %v8772_v47  ;;  %v8824_v47 = vld [vmem:[#allocation45_spill] sm:$0xff] }
 0x48d   : > { %4901 = vmatprep.mubr.bf16.mxu1 %v8775_v44  ;;  %v8826_v40 = vpack.c.bf16 %v8824_v47, %v8825_v14  ;;  %v8827_v44 = vld [vmem:[#allocation43_spill] sm:$0xff]  ;;  %v3907_v47 = vld [vmem:[%s7753_s16 + $0x48] sm:$0xff] }
 0x48e   : > { %v8829_v32 = vpack.c.bf16 %v8827_v44, %v8828_v45 }
 0x494   : > { %4902 = vmatmul.mubr.bf16.vlgmr.msra.gmra.mrb[36].mxu1 %v8778_v35  ;;  %v8831_v35 = vld [vmem:[#allocation57_spill] sm:$0xff] }
 0x495   : > { %4934 = vmatpush3.bf16.xpose.msra.mxu1 %v7707_v41  ;;  %4905 = vmatprep.mubr.bf16.mxu1 %v8781_v42  ;;  %v8810_v41 = vld [vmem:[#allocation49_spill] sm:$0xff]  ;;  %v8832_v60 = vpack.c.bf16 %v8830_v61, %v8831_v35  ;;  %v8834_v42 = vld [vmem:[#allocation55_spill] sm:$0xff]  ;;  %v3912_v61 = vld [vmem:[%s7753_s16 + $0x70] sm:$0xff] }
 0x496   : > { %v8811_v31 = vpack.c.bf16 %v8809_v16, %v8810_v41  ;;  %v8835_v12 = vpack.c.bf16 %v8833_v10, %v8834_v42  ;;  %v3905_v16 = vld [vmem:[%s7753_s16 + $0x38] sm:$0xff]  ;;  %v3910_v35 = vld [vmem:[%s7753_s16 + $0x60] sm:$0xff] }
 0x497   : > { %v3913_v10 = vld [vmem:[%s7753_s16 + $0x78] sm:$0xff] }
 0x49c   : > { %4906 = vmatmul.mubr.bf16.gmra.mrb[40].mxu1 %v8784_v63  ;;  %v8837_v63 = vld [vmem:[#allocation84_spill] sm:$0xff] }
 0x49d   : > { %4909 = vmatprep.mubr.bf16.mxu1 %v8787_v9  ;;  %v8838_v25 = vpack.c.bf16 %v8836_v54, %v8837_v63  ;;  %v8840_v9 = vld [vmem:[#allocation111_spill] sm:$0xff]  ;;  %v3911_v54 = vld [vmem:[%s7753_s16 + $0x68] sm:$0xff] }
 0x49e   : > { %v8841_v24 = vpack.c.bf16 %v8839_v37, %v8840_v9 }
 0x4a4   : > { %4910 = vmatmul.mubr.bf16.gmra.mrb[44].mxu1 %v8790_v49  ;;  %v8843_v49 = vpack.c.bf16 %v7302_v4, %v8842_v17  ;;  %v8848_v4 = vpack.c.bf16 %v7399_v19, %v7390_v53  ;;  %v3901_v19 = vld [vmem:[%s7753_s16 + $0x18] sm:$0xff]  ;;  %v3916_v17 = vld [vmem:[%s7753_s16 + $0x90] sm:$0xff] }
 0x4a5   : > { %4913 = vmatprep.mubr.bf16.mxu1 %v8793_v36  ;;  %v8846_v36 = vpack.c.bf16 %v7361_v15, %v7354_v22  ;;  %v8855_v22 = vld [vmem:[#allocation62_spill] sm:$0xff] }
 0x4a6   : > { %v8856_v15 = vld [vmem:[#allocation66_spill] sm:$0xff] }
 0x4a7   : > { %v8857_v48 = vpack.c.bf16 %v8855_v22, %v8856_v15  ;;  %v3918_v22 = vld [vmem:[%s7753_s16 + $0xa0] sm:$0xff] }
 0x4ac   : > { %4914 = vmatmul.mubr.bf16.gmra.mrb[48].mxu1 %v8796_v7  ;;  %v8854_v7 = vpack.c.bf16 %v8852_v30, %v8853_v58 }
 0x4ad   : > { %4917 = vmatprep.mubr.bf16.mxu1 %v8799_v6 }
 0x4b4   : > { %4918 = vmatmul.mubr.bf16.gmra.mrb[52].mxu1 %v8802_v2 }
 0x4b5   : > { %4921 = vmatprep.mubr.bf16.mxu1 %v8805_v52 }
 0x4bc   : > { %4922 = vmatmul.mubr.bf16.gmra.mrb[56].mxu1 %v8808_v38 }
 0x4bd   : > { %4925 = vmatprep.mubr.bf16.mxu1 %v8811_v31 }
 0x4c4   : > { %4926 = vmatmul.mubr.bf16.gmra.mrb[60].mxu1 %v8814_v56 }
 0x4c5   : > { %4929 = vmatprep.mubr.bf16.mxu1 %v8817_v21 }
 0x4cc   : > { %4930 = vmatmul.mubr.bf16.gmra.mrb[64].mxu1 %v8820_v1 }
 0x4cd   : > { %4935 = vmatprep.mubr.bf16.mxu1 %v8823_v39 }
 0x4d4   : > { %4936 = vmatmul.mubr.bf16.vlgmr.msra.gmra.mrb[68].mxu1 %v8826_v40 }
 0x4d5   : > { %4939 = vmatprep.mubr.bf16.mxu1 %v8829_v32 }
 0x4dc   : > { %4940 = vmatmul.mubr.bf16.gmra.mrb[72].mxu1 %v8832_v60 }
 0x4dd   : > { %4943 = vmatprep.mubr.bf16.mxu1 %v8835_v12 }
 0x4e4   : > { %4944 = vmatmul.mubr.bf16.gmra.mrb[76].mxu1 %v8838_v25 }
 0x4e5   : > { %4947 = vmatprep.mubr.bf16.mxu1 %v8841_v24 }
 0x4ec   : > { %4948 = vmatmul.mubr.bf16.gmra.mrb[80].mxu1 %v8843_v49  ;;  %v3914_v49 = vld [vmem:[%s7753_s16 + $0x80] sm:$0xff] }
 0x4ed   : > { %4951 = vmatprep.mubr.bf16.mxu1 %v8844_v29 }
 0x4f4   : > { %4952 = vmatmul.mubr.bf16.gmra.mrb[84].mxu1 %v8845_v0  ;;  %v3917_v0 = vld [vmem:[%s7753_s16 + $0x98] sm:$0xff] }
 0x4f5   : > { %4955 = vmatprep.mubr.bf16.mxu1 %v8846_v36 }
 0x4fc   : > { %4956 = vmatmul.mubr.bf16.gmra.mrb[88].mxu1 %v8847_v11 }
 0x4fd   : > { %4959 = vmatprep.mubr.bf16.mxu1 %v8848_v4  ;;  %v3915_v4 = vld [vmem:[%s7753_s16 + $0x88] sm:$0xff] }
 0x504   : > { %4960 = vmatmul.mubr.bf16.gmra.mrb[92].mxu1 %v8851_v59 }
 0x505   : > { %4963 = vmatprep.mubr.bf16.mxu1 %v8854_v7  ;;  %v3920_v7 = vld [vmem:[%s7753_s16 + $0xb0] sm:$0xff] }
 0x50c   : > { %4964 = vmatmul.mubr.bf16.gmra.mrb[96].mxu1 %v8857_v48  ;;  %v3921_v48 = vld [vmem:[%s7753_s16 + $0xb8] sm:$0xff] }
 0x567   : > { %v4903_v53 = vpop.f32.mrb[36].mxu1 }
 0x568   : > { %v3932_v43 = vadd.f32 %v4903_v53, %v3900_v26  ;;  %v3607_v6 = vpop.f32.mrb[37].mxu1  ;;  %v3919_v53 = vld [vmem:[%s7753_s16 + $0xa8] sm:$0xff] }
 0x569   : > { %v3930_v5 = vadd.f32 %v3898_v28, %v3607_v6  ;;  %v4904_v2 = vpop.f32.mrb[38].mxu1 }
 0x56a   : > { %3964 = vst.msk [vmem:[%s7753_s16 + $0x10] sm:$0xff] %vm1331_vm11, %v3932_v43  ;;  %v3933_v23 = vadd.f32 %v4904_v2, %v3901_v19  ;;  %v3610_v27 = vpop.f32.mrb[39].mxu1  ;;  %v3924_v2 = vld [vmem:[%s7753_s16 + $0xd0] sm:$0xff] }
 0x56b   : > { %3962 = vst.msk [vmem:[%s7753_s16] sm:$0xff] %vm1331_vm11, %v3930_v5  ;;  %v3931_v52 = vadd.f32 %v3899_v46, %v3610_v27 }
 0x56c   : > { %3965 = vst.msk [vmem:[%s7753_s16 + $0x18] sm:$0xff] %vm1331_vm11, %v3933_v23  ;;  %v3922_v23 = vld [vmem:[%s7753_s16 + $0xc0] sm:$0xff] }
 0x56d   : > { %3963 = vst.msk [vmem:[%s7753_s16 + $0x8] sm:$0xff] %vm1331_vm11, %v3931_v52  ;;  %v3925_v52 = vld [vmem:[%s7753_s16 + $0xd8] sm:$0xff] }
 0x56f   : > { %v4907_v38 = vpop.f32.mrb[40].mxu1 }
 0x570   : > { %v3936_v41 = vadd.f32 %v4907_v38, %v3904_v18  ;;  %v3623_v31 = vpop.f32.mrb[41].mxu1  ;;  %v3923_v38 = vld [vmem:[%s7753_s16 + $0xc8] sm:$0xff] }
 0x571   : > { %v3934_v51 = vadd.f32 %v3902_v8, %v3623_v31  ;;  %v4908_v56 = vpop.f32.mrb[42].mxu1 }
 0x572   : > { %3968 = vst.msk [vmem:[%s7753_s16 + $0x30] sm:$0xff] %vm1331_vm11, %v3936_v41  ;;  %v3937_v3 = vadd.f32 %v4908_v56, %v3905_v16  ;;  %v3626_v13 = vpop.f32.mrb[43].mxu1  ;;  %v3928_v56 = vld [vmem:[%s7753_s16 + $0xf0] sm:$0xff] }
 0x573   : > { %3966 = vst.msk [vmem:[%s7753_s16 + $0x20] sm:$0xff] %vm1331_vm11, %v3934_v51  ;;  %v3935_v21 = vadd.f32 %v3903_v57, %v3626_v13 }
 0x574   : > { %3969 = vst.msk [vmem:[%s7753_s16 + $0x38] sm:$0xff] %vm1331_vm11, %v3937_v3  ;;  %v3926_v3 = vld [vmem:[%s7753_s16 + $0xe0] sm:$0xff] }
 0x575   : > { %3967 = vst.msk [vmem:[%s7753_s16 + $0x28] sm:$0xff] %vm1331_vm11, %v3935_v21  ;;  %v3929_v21 = vld [vmem:[%s7753_s16 + $0xf8] sm:$0xff] }
 0x577   : > { %v4911_v1 = vpop.f32.mrb[44].mxu1 }
 0x578   : > { %v3940_v20 = vadd.f32 %v4911_v1, %v3908_v55  ;;  %v3639_v39 = vpop.f32.mrb[45].mxu1  ;;  %v3927_v1 = vld [vmem:[%s7753_s16 + $0xe8] sm:$0xff] }
 0x579   : > { %v3938_v14 = vadd.f32 %v3906_v50, %v3639_v39  ;;  %v4912_v40 = vpop.f32.mrb[46].mxu1 }
 0x57a   : > { %3972 = vst.msk [vmem:[%s7753_s16 + $0x50] sm:$0xff] %vm1331_vm11, %v3940_v20  ;;  %v3941_v44 = vadd.f32 %v4912_v40, %v3909_v62  ;;  %v3642_v45 = vpop.f32.mrb[47].mxu1  ;;  %v3996_v40 = vld [vmem:[%s7758_s21 + $0x10] sm:$0xff] }
 0x57b   : > { %3970 = vst.msk [vmem:[%s7753_s16 + $0x40] sm:$0xff] %vm1331_vm11, %v3938_v14  ;;  %v3939_v32 = vadd.f32 %v3907_v47, %v3642_v45 }
 0x57c   : > { %3973 = vst.msk [vmem:[%s7753_s16 + $0x58] sm:$0xff] %vm1331_vm11, %v3941_v44  ;;  %v3994_v44 = vld [vmem:[%s7758_s21] sm:$0xff] }
 0x57d   : > { %3971 = vst.msk [vmem:[%s7753_s16 + $0x48] sm:$0xff] %vm1331_vm11, %v3939_v32  ;;  %v3997_v32 = vld [vmem:[%s7758_s21 + $0x18] sm:$0xff] }
 0x57f   : > { %v4915_v60 = vpop.f32.mrb[48].mxu1 }
 0x580   : > { %v3944_v42 = vadd.f32 %v4915_v60, %v3912_v61  ;;  %v3655_v12 = vpop.f32.mrb[49].mxu1  ;;  %v3995_v60 = vld [vmem:[%s7758_s21 + $0x8] sm:$0xff] }
 0x581   : > { %v3942_v63 = vadd.f32 %v3910_v35, %v3655_v12  ;;  %v4916_v25 = vpop.f32.mrb[50].mxu1 }
 0x582   : > { %3976 = vst.msk [vmem:[%s7753_s16 + $0x70] sm:$0xff] %vm1331_vm11, %v3944_v42  ;;  %v3945_v37 = vadd.f32 %v4916_v25, %v3913_v10  ;;  %v3658_v9 = vpop.f32.mrb[51].mxu1  ;;  %v4000_v25 = vld [vmem:[%s7758_s21 + $0x30] sm:$0xff] }
 0x583   : > { %3974 = vst.msk [vmem:[%s7753_s16 + $0x60] sm:$0xff] %vm1331_vm11, %v3942_v63  ;;  %v3943_v24 = vadd.f32 %v3911_v54, %v3658_v9 }
 0x584   : > { %3977 = vst.msk [vmem:[%s7753_s16 + $0x78] sm:$0xff] %vm1331_vm11, %v3945_v37  ;;  %v3998_v37 = vld [vmem:[%s7758_s21 + $0x20] sm:$0xff] }
 0x585   : > { %3975 = vst.msk [vmem:[%s7753_s16 + $0x68] sm:$0xff] %vm1331_vm11, %v3943_v24  ;;  %v4001_v24 = vld [vmem:[%s7758_s21 + $0x38] sm:$0xff] }
 0x587   : > { %v4919_v29 = vpop.f32.mrb[52].mxu1 }
 0x588   : > { %v3948_v36 = vadd.f32 %v4919_v29, %v3916_v17  ;;  %v3671_v11 = vpop.f32.mrb[53].mxu1  ;;  %v3999_v29 = vld [vmem:[%s7758_s21 + $0x28] sm:$0xff] }
 0x589   : > { %v3946_v34 = vadd.f32 %v3914_v49, %v3671_v11  ;;  %v4920_v33 = vpop.f32.mrb[54].mxu1 }
 0x58a   : > { %3980 = vst.msk [vmem:[%s7753_s16 + $0x90] sm:$0xff] %vm1331_vm11, %v3948_v36  ;;  %v3949_v59 = vadd.f32 %v4920_v33, %v3917_v0  ;;  %v3674_v30 = vpop.f32.mrb[55].mxu1  ;;  %v4004_v33 = vld [vmem:[%s7758_s21 + $0x50] sm:$0xff] }
 0x58b   : > { %3978 = vst.msk [vmem:[%s7753_s16 + $0x80] sm:$0xff] %vm1331_vm11, %v3946_v34  ;;  %v3947_v58 = vadd.f32 %v3915_v4, %v3674_v30 }
 0x58c   : > { %3981 = vst.msk [vmem:[%s7753_s16 + $0x98] sm:$0xff] %vm1331_vm11, %v3949_v59  ;;  %v4002_v59 = vld [vmem:[%s7758_s21 + $0x40] sm:$0xff] }
 0x58d   : > { %3979 = vst.msk [vmem:[%s7753_s16 + $0x88] sm:$0xff] %vm1331_vm11, %v3947_v58  ;;  %v4005_v58 = vld [vmem:[%s7758_s21 + $0x58] sm:$0xff] }
 0x58f   : > { %v4923_v15 = vpop.f32.mrb[56].mxu1 }
 0x590   : > { %v3952_v26 = vadd.f32 %v4923_v15, %v3920_v7  ;;  %v3687_v28 = vpop.f32.mrb[57].mxu1  ;;  %v4003_v15 = vld [vmem:[%s7758_s21 + $0x48] sm:$0xff] }
 0x591   : > { %v3950_v19 = vadd.f32 %v3918_v22, %v3687_v28  ;;  %v4924_v43 = vpop.f32.mrb[58].mxu1 }
 0x592   : > { %3984 = vst.msk [vmem:[%s7753_s16 + $0xb0] sm:$0xff] %vm1331_vm11, %v3952_v26  ;;  %v3953_v6 = vadd.f32 %v4924_v43, %v3921_v48  ;;  %v3690_v46 = vpop.f32.mrb[59].mxu1  ;;  %v4008_v43 = vld [vmem:[%s7758_s21 + $0x70] sm:$0xff] }
 0x593   : > { %3982 = vst.msk [vmem:[%s7753_s16 + $0xa0] sm:$0xff] %vm1331_vm11, %v3950_v19  ;;  %v3951_v5 = vadd.f32 %v3919_v53, %v3690_v46 }
 0x594   : > { %3985 = vst.msk [vmem:[%s7753_s16 + $0xb8] sm:$0xff] %vm1331_vm11, %v3953_v6  ;;  %v4006_v6 = vld [vmem:[%s7758_s21 + $0x60] sm:$0xff] }
 0x595   : > { %3983 = vst.msk [vmem:[%s7753_s16 + $0xa8] sm:$0xff] %vm1331_vm11, %v3951_v5  ;;  %v4009_v5 = vld [vmem:[%s7758_s21 + $0x78] sm:$0xff] }
 0x597   : > { %v4927_v27 = vpop.f32.mrb[60].mxu1 }
 0x598   : > { %v3956_v18 = vadd.f32 %v4927_v27, %v3924_v2  ;;  %v3703_v8 = vpop.f32.mrb[61].mxu1  ;;  %v4007_v27 = vld [vmem:[%s7758_s21 + $0x68] sm:$0xff] }
 0x599   : > { %v3954_v16 = vadd.f32 %v3922_v23, %v3703_v8  ;;  %v4928_v41 = vpop.f32.mrb[62].mxu1 }
 0x59a   : > { %3988 = vst.msk [vmem:[%s7753_s16 + $0xd0] sm:$0xff] %vm1331_vm11, %v3956_v18  ;;  %v3957_v31 = vadd.f32 %v4928_v41, %v3925_v52  ;;  %v3706_v57 = vpop.f32.mrb[63].mxu1  ;;  %v4012_v41 = vld [vmem:[%s7758_s21 + $0x90] sm:$0xff] }
 0x59b   : > { %3986 = vst.msk [vmem:[%s7753_s16 + $0xc0] sm:$0xff] %vm1331_vm11, %v3954_v16  ;;  %v3955_v51 = vadd.f32 %v3923_v38, %v3706_v57 }
 0x59c   : > { %3989 = vst.msk [vmem:[%s7753_s16 + $0xd8] sm:$0xff] %vm1331_vm11, %v3957_v31  ;;  %v4010_v31 = vld [vmem:[%s7758_s21 + $0x80] sm:$0xff] }
 0x59d   : > { %3987 = vst.msk [vmem:[%s7753_s16 + $0xc8] sm:$0xff] %vm1331_vm11, %v3955_v51  ;;  %v4013_v51 = vld [vmem:[%s7758_s21 + $0x98] sm:$0xff] }
 0x59f   : > { %v4931_v13 = vpop.f32.mrb[64].mxu1 }
 0x5a0   : > { %v3960_v55 = vadd.f32 %v4931_v13, %v3928_v56  ;;  %v3719_v50 = vpop.f32.mrb[65].mxu1  ;;  %v4011_v13 = vld [vmem:[%s7758_s21 + $0x88] sm:$0xff] }
 0x5a1   : > { %v3958_v62 = vadd.f32 %v3926_v3, %v3719_v50  ;;  %v4932_v20 = vpop.f32.mrb[66].mxu1 }
 0x5a2   : > { %3992 = vst.msk [vmem:[%s7753_s16 + $0xf0] sm:$0xff] %vm1331_vm11, %v3960_v55  ;;  %v3961_v39 = vadd.f32 %v4932_v20, %v3929_v21  ;;  %v3722_v47 = vpop.f32.mrb[67].mxu1  ;;  %v4016_v20 = vld [vmem:[%s7758_s21 + $0xb0] sm:$0xff] }
 0x5a3   : > { %3990 = vst.msk [vmem:[%s7753_s16 + $0xe0] sm:$0xff] %vm1331_vm11, %v3958_v62  ;;  %v3959_v14 = vadd.f32 %v3927_v1, %v3722_v47 }
 0x5a4   : > { %3993 = vst.msk [vmem:[%s7753_s16 + $0xf8] sm:$0xff] %vm1331_vm11, %v3961_v39  ;;  %v4014_v39 = vld [vmem:[%s7758_s21 + $0xa0] sm:$0xff] }
 0x5a5   : > { %3991 = vst.msk [vmem:[%s7753_s16 + $0xe8] sm:$0xff] %vm1331_vm11, %v3959_v14  ;;  %v4017_v14 = vld [vmem:[%s7758_s21 + $0xb8] sm:$0xff] }
 0x5a7   : > { %v4937_v45 = vpop.f32.mrb[68].mxu1 }
 0x5a8   : > { %v4028_v61 = vadd.f32 %v4937_v45, %v3996_v40  ;;  %v3771_v35 = vpop.f32.mrb[69].mxu1  ;;  %v4015_v45 = vld [vmem:[%s7758_s21 + $0xa8] sm:$0xff] }
 0x5a9   : > { %v4026_v10 = vadd.f32 %v3994_v44, %v3771_v35  ;;  %v4938_v42 = vpop.f32.mrb[70].mxu1 }
 0x5aa   : > { %4060 = vst.msk [vmem:[%s7758_s21 + $0x10] sm:$0xff] %vm1331_vm11, %v4028_v61  ;;  %v4029_v12 = vadd.f32 %v4938_v42, %v3997_v32  ;;  %v3774_v54 = vpop.f32.mrb[71].mxu1  ;;  %v4020_v42 = vld [vmem:[%s7758_s21 + $0xd0] sm:$0xff] }
 0x5ab   : > { %4058 = vst.msk [vmem:[%s7758_s21] sm:$0xff] %vm1331_vm11, %v4026_v10  ;;  %v4027_v63 = vadd.f32 %v3995_v60, %v3774_v54 }
 0x5ac   : > { %4061 = vst.msk [vmem:[%s7758_s21 + $0x18] sm:$0xff] %vm1331_vm11, %v4029_v12  ;;  %v4018_v12 = vld [vmem:[%s7758_s21 + $0xc0] sm:$0xff] }
 0x5ad   : > { %4059 = vst.msk [vmem:[%s7758_s21 + $0x8] sm:$0xff] %vm1331_vm11, %v4027_v63  ;;  %v4021_v63 = vld [vmem:[%s7758_s21 + $0xd8] sm:$0xff] }
 0x5af   : > { %v4941_v9 = vpop.f32.mrb[72].mxu1 }
 0x5b0   : > { %v4032_v17 = vadd.f32 %v4941_v9, %v4000_v25  ;;  %v3787_v49 = vpop.f32.mrb[73].mxu1  ;;  %v4019_v9 = vld [vmem:[%s7758_s21 + $0xc8] sm:$0xff] }
 0x5b1   : > { %v4030_v0 = vadd.f32 %v3998_v37, %v3787_v49  ;;  %v4942_v36 = vpop.f32.mrb[74].mxu1 }
 0x5b2   : > { %4064 = vst.msk [vmem:[%s7758_s21 + $0x30] sm:$0xff] %vm1331_vm11, %v4032_v17  ;;  %v4033_v11 = vadd.f32 %v4942_v36, %v4001_v24  ;;  %v3790_v4 = vpop.f32.mrb[75].mxu1  ;;  %v4024_v36 = vld [vmem:[%s7758_s21 + $0xf0] sm:$0xff] }
 0x5b3   : > { %4062 = vst.msk [vmem:[%s7758_s21 + $0x20] sm:$0xff] %vm1331_vm11, %v4030_v0  ;;  %v4031_v34 = vadd.f32 %v3999_v29, %v3790_v4 }
 0x5b4   : > { %4065 = vst.msk [vmem:[%s7758_s21 + $0x38] sm:$0xff] %vm1331_vm11, %v4033_v11  ;;  %v4022_v11 = vld [vmem:[%s7758_s21 + $0xe0] sm:$0xff] }
 0x5b5   : > { %4063 = vst.msk [vmem:[%s7758_s21 + $0x28] sm:$0xff] %vm1331_vm11, %v4031_v34  ;;  %v4025_v34 = vld [vmem:[%s7758_s21 + $0xf8] sm:$0xff] }
 0x5b7   : > { %v4945_v30 = vpop.f32.mrb[76].mxu1 }
 0x5b8   : > { %v4036_v7 = vadd.f32 %v4945_v30, %v4004_v33  ;;  %v3803_v22 = vpop.f32.mrb[77].mxu1  ;;  %v4023_v30 = vld [vmem:[%s7758_s21 + $0xe8] sm:$0xff] }
 0x5b9   : > { %v4034_v48 = vadd.f32 %v4002_v59, %v3803_v22  ;;  %v4946_v26 = vpop.f32.mrb[78].mxu1 }
 0x5ba   : > { %4068 = vst.msk [vmem:[%s7758_s21 + $0x50] sm:$0xff] %vm1331_vm11, %v4036_v7  ;;  %v4037_v28 = vadd.f32 %v4946_v26, %v4005_v58  ;;  %v3806_v53 = vpop.f32.mrb[79].mxu1 }
 0x5bb   : > { %4066 = vst.msk [vmem:[%s7758_s21 + $0x40] sm:$0xff] %vm1331_vm11, %v4034_v48  ;;  %v4035_v19 = vadd.f32 %v4003_v15, %v3806_v53 }
 0x5bc   : > { %4069 = vst.msk [vmem:[%s7758_s21 + $0x58] sm:$0xff] %vm1331_vm11, %v4037_v28 }
 0x5bd   : > { %4067 = vst.msk [vmem:[%s7758_s21 + $0x48] sm:$0xff] %vm1331_vm11, %v4035_v19 }
 0x5bf   : > { %v4949_v46 = vpop.f32.mrb[80].mxu1 }
 0x5c0   : > { %v4040_v2 = vadd.f32 %v4949_v46, %v4008_v43  ;;  %v3819_v23 = vpop.f32.mrb[81].mxu1 }
 0x5c1   : > { %v4038_v52 = vadd.f32 %v4006_v6, %v3819_v23  ;;  %v4950_v18 = vpop.f32.mrb[82].mxu1 }
 0x5c2   : > { %4072 = vst.msk [vmem:[%s7758_s21 + $0x70] sm:$0xff] %vm1331_vm11, %v4040_v2  ;;  %v4041_v8 = vadd.f32 %v4950_v18, %v4009_v5  ;;  %v3822_v38 = vpop.f32.mrb[83].mxu1 }
 0x5c3   : > { %4070 = vst.msk [vmem:[%s7758_s21 + $0x60] sm:$0xff] %vm1331_vm11, %v4038_v52  ;;  %v4039_v16 = vadd.f32 %v4007_v27, %v3822_v38 }
 0x5c4   : > { %4073 = vst.msk [vmem:[%s7758_s21 + $0x78] sm:$0xff] %vm1331_vm11, %v4041_v8 }
 0x5c5   : > { %4071 = vst.msk [vmem:[%s7758_s21 + $0x68] sm:$0xff] %vm1331_vm11, %v4039_v16 }
 0x5c7   : > { %v4953_v57 = vpop.f32.mrb[84].mxu1 }
 0x5c8   : > { %v4044_v56 = vadd.f32 %v4953_v57, %v4012_v41  ;;  %v3835_v3 = vpop.f32.mrb[85].mxu1 }
 0x5c9   : > { %v4042_v21 = vadd.f32 %v4010_v31, %v3835_v3  ;;  %v4954_v55 = vpop.f32.mrb[86].mxu1 }
 0x5ca   : > { %4076 = vst.msk [vmem:[%s7758_s21 + $0x90] sm:$0xff] %vm1331_vm11, %v4044_v56  ;;  %v4045_v50 = vadd.f32 %v4954_v55, %v4013_v51  ;;  %v3838_v1 = vpop.f32.mrb[87].mxu1 }
 0x5cb   : > { %4074 = vst.msk [vmem:[%s7758_s21 + $0x80] sm:$0xff] %vm1331_vm11, %v4042_v21  ;;  %v4043_v62 = vadd.f32 %v4011_v13, %v3838_v1 }
 0x5cc   : > { %4077 = vst.msk [vmem:[%s7758_s21 + $0x98] sm:$0xff] %vm1331_vm11, %v4045_v50 }
 0x5cd   : > { %4075 = vst.msk [vmem:[%s7758_s21 + $0x88] sm:$0xff] %vm1331_vm11, %v4043_v62 }
 0x5cf   : > { %v4957_v47 = vpop.f32.mrb[88].mxu1 }
 0x5d0   : > { %v4048_v40 = vadd.f32 %v4957_v47, %v4016_v20  ;;  %v3851_v44 = vpop.f32.mrb[89].mxu1 }
 0x5d1   : > { %v4046_v32 = vadd.f32 %v4014_v39, %v3851_v44  ;;  %v4958_v61 = vpop.f32.mrb[90].mxu1 }
 0x5d2   : > { %4080 = vst.msk [vmem:[%s7758_s21 + $0xb0] sm:$0xff] %vm1331_vm11, %v4048_v40  ;;  %v4049_v35 = vadd.f32 %v4958_v61, %v4017_v14  ;;  %v3854_v60 = vpop.f32.mrb[91].mxu1 }
 0x5d3   : > { %4078 = vst.msk [vmem:[%s7758_s21 + $0xa0] sm:$0xff] %vm1331_vm11, %v4046_v32  ;;  %v4047_v10 = vadd.f32 %v4015_v45, %v3854_v60 }
 0x5d4   : > { %4081 = vst.msk [vmem:[%s7758_s21 + $0xb8] sm:$0xff] %vm1331_vm11, %v4049_v35 }
 0x5d5   : > { %4079 = vst.msk [vmem:[%s7758_s21 + $0xa8] sm:$0xff] %vm1331_vm11, %v4047_v10 }
 0x5d7   : > { %v4961_v54 = vpop.f32.mrb[92].mxu1 }
 0x5d8   : > { %v4052_v25 = vadd.f32 %v4961_v54, %v4020_v42  ;;  %v3867_v37 = vpop.f32.mrb[93].mxu1 }
 0x5d9   : > { %v4050_v24 = vadd.f32 %v4018_v12, %v3867_v37  ;;  %v4962_v17 = vpop.f32.mrb[94].mxu1 }
 0x5da   : > { %4084 = vst.msk [vmem:[%s7758_s21 + $0xd0] sm:$0xff] %vm1331_vm11, %v4052_v25  ;;  %v4053_v49 = vadd.f32 %v4962_v17, %v4021_v63  ;;  %v3870_v29 = vpop.f32.mrb[95].mxu1 }
 0x5db   : > { %4082 = vst.msk [vmem:[%s7758_s21 + $0xc0] sm:$0xff] %vm1331_vm11, %v4050_v24  ;;  %v4051_v0 = vadd.f32 %v4019_v9, %v3870_v29 }
 0x5dc   : > { %4085 = vst.msk [vmem:[%s7758_s21 + $0xd8] sm:$0xff] %vm1331_vm11, %v4053_v49 }
 0x5dd   : > { %4083 = vst.msk [vmem:[%s7758_s21 + $0xc8] sm:$0xff] %vm1331_vm11, %v4051_v0 }
 0x5df   : > { %v4965_v4 = vpop.f32.mrb[96].mxu1 }
 0x5e0   : > { %v4056_v33 = vadd.f32 %v4965_v4, %v4024_v36  ;;  %v3883_v59 = vpop.f32.mrb[97].mxu1 }
 0x5e1   : > { %v4054_v58 = vadd.f32 %v4022_v11, %v3883_v59  ;;  %v4966_v7 = vpop.f32.mrb[98].mxu1 }
 0x5e2   : > { %4088 = vst.msk [vmem:[%s7758_s21 + $0xf0] sm:$0xff] %vm1331_vm11, %v4056_v33  ;;  %v4057_v22 = vadd.f32 %v4966_v7, %v4025_v34  ;;  %v3886_v15 = vpop.f32.mrb[99].mxu1 }
 0x5e3   : > { %4086 = vst.msk [vmem:[%s7758_s21 + $0xe0] sm:$0xff] %vm1331_vm11, %v4054_v58  ;;  %v4055_v48 = vadd.f32 %v4023_v30, %v3886_v15 }
 0x5e4   : > { %4089 = vst.msk [vmem:[%s7758_s21 + $0xf8] sm:$0xff] %vm1331_vm11, %v4057_v22 }
 0x5e5   : > { %4087 = vst.msk [vmem:[%s7758_s21 + $0xe8] sm:$0xff] %vm1331_vm11, %v4055_v48 }
 0x5e6 PF: > { %s23_s23 = sadd.s32 1, %s5379_s23   ;;  %s8858_s21 = smov %s5375_s22 }
 0x5e7   : > { %p20_p5 = scmp.ge.s32.totalorder %s23_s23, 4   ;;  %s8859_s22 = smov %s8861_s24 }
 0x5e9   :  { %22 = sbr.rel (!%p20_p5) target bundleno = 2 (0x2), region = 117 }

</bundles_post_ra>
